<compile_context>
chip_gen: v7x
topology: tpu7x:2x2x1
jax: 0.10.0
libtpu: 0.0.40
codegen_flags: <defaults>
</compile_context>

<pallas_src>
import functools

import numpy as np
import jax
import jax.numpy as jnp
from jax import lax
from jax.experimental import pallas as pl
from jax.experimental.pallas import tpu as pltpu


def _spectral_kernel(x_ref, w_ref, b_ref, o_ref, col_ref, *,
                     H, W, Wp, CinK, HWp, KT):
    """One batch element.

    x_ref  : (1, CinK, Lflat)      padded image, spatial flattened on the lane axis
    w_ref  : (3*Cout, KT*KT*CinK)  combined (zero-embedded) weights, all 3 branches
    b_ref  : (3*Cout, 1)           combined bias
    o_ref  : (1, 3*Cout, H*W)      lane-dense output (H*W = multiple of 128)
    col_ref: VMEM scratch (KT*KT*CinK, H*Wp)  im2col slab
    """
    xv = x_ref[0]                                        # (CinK, Lflat)

    # In-kernel im2col: each 7x7 tap is a static lane-shifted window of the flat
    # padded image (pure lane shift -> XLU, no tile-crossing reshape relayouts).
    # Each iteration ends in a scratch store, so live ranges stay bounded.
    for t in range(KT * KT):
        ty, tx = t // KT, t % KT
        s = ty * Wp + tx
        col_ref[t * CinK:(t + 1) * CinK, :] = xv[:, s:s + HWp]

    # ONE MXU matmul for all three branches: (3*Cout, 1568) @ (1568, H*Wp).
    acc = jnp.dot(w_ref[...], col_ref[...],
                  preferred_element_type=jnp.float32)    # (3*Cout, H*Wp)

    # Drop the padded-width columns (x >= W) of every row -> (3*Cout, H*W),
    # then one dense (unmasked) store of a 256-lane-wide slab.
    compact = jnp.concatenate(
        [acc[:, y * Wp:y * Wp + W] for y in range(H)], axis=1)

    out = jnp.maximum(compact + b_ref[...], 0.0)         # bias + fused ReLU
    o_ref[0] = out.astype(o_ref.dtype)


def _combined_weights(params, Cin, K, Cout, KT=7):
    """Zero-embed the 5x5/3x3 kernels into the 7x7 tap grid and flatten so rows
    match the im2col slab order (tap-major, channel-minor). Output-channel order
    matches torch.cat([conv_7x7, conv_5x5, conv_3x3])."""
    CinK = Cin * K
    w_embed = jnp.zeros((3 * Cout, KT, KT, CinK), jnp.float32)
    biases = []
    for bi, k in enumerate((7, 5, 3)):
        w, b = params[k]                                  # (Cout, Cin, K, k, k), (Cout,)
        off = (KT - k) // 2
        wk = jnp.transpose(w.reshape(Cout, CinK, k, k), (0, 2, 3, 1))   # (Cout,k,k,CinK)
        w_embed = w_embed.at[bi * Cout:(bi + 1) * Cout,
                             off:off + k, off:off + k, :].set(wk)
        biases.append(b)
    w_flat = w_embed.reshape(3 * Cout, KT * KT * CinK)    # row = (ty*7+tx)*CinK + c
    b_flat = jnp.concatenate(biases).reshape(3 * Cout, 1)
    return w_flat, b_flat


def spectral_conv(x, params):
    """x: (N, Cin, K, H, W) NCDHW (PyTorch). Returns (N, 3*Cout, H, W) NCHW."""
    N, Cin, K, H, W = x.shape
    CinK = Cin * K
    Cout = params[3][0].shape[0]
    KT, p = 7, 3
    Hp, Wp = H + 2 * p, W + 2 * p
    HWp = H * Wp
    # One extra zero row at the bottom so the largest tap shift (2p*Wp + 2p) plus a
    # full H*Wp window never reads past the end of the flat slab.
    extra_rows = -(-2 * p // Wp)                          # ceil(2p / Wp) == 1 here
    Lflat = (Hp + extra_rows) * Wp

    x2d = x.reshape(N, CinK, H, W)                        # fold depth into channels (free)
    xpad = jnp.pad(x2d, ((0, 0), (0, 0), (p, p + extra_rows), (p, p)))
    xflat = xpad.reshape(N, CinK, Lflat)                  # lane axis = flattened padded plane

    w_flat, b_flat = _combined_weights(params, Cin, K, Cout, KT)

    kern = functools.partial(_spectral_kernel, H=H, W=W, Wp=Wp,
                             CinK=CinK, HWp=HWp, KT=KT)
    out = pl.pallas_call(
        kern,
        out_shape=jax.ShapeDtypeStruct((N, 3 * Cout, H * W), x.dtype),
        grid=(N,),
        in_specs=[
            pl.BlockSpec((1, CinK, Lflat), lambda n: (n, 0, 0)),
            # weights / bias are grid-invariant (constant index_map) -> single DMA.
            pl.BlockSpec((3 * Cout, KT * KT * CinK), lambda n: (0, 0)),
            pl.BlockSpec((3 * Cout, 1), lambda n: (0, 0)),
        ],
        out_specs=pl.BlockSpec((1, 3 * Cout, H * W), lambda n: (n, 0, 0)),
        scratch_shapes=[pltpu.VMEM((KT * KT * CinK, HWp), jnp.float32)],
        compiler_params=pltpu.CompilerParams(dimension_semantics=("parallel",)),
    )(xflat, w_flat, b_flat)
    # TODO(synk): for large H/W on v7x (64 MiB VMEM / 2 TCs), tile H into row bands with
    # a (KT-1)-row halo and add it as a second "parallel" grid axis.
    return out.reshape(N, 3 * Cout, H, W)                 # contiguous reshape, no transpose


def _reference(x, params, N, Cin, Cout, K, H, W):
    """Pure-JAX reference via lax.conv (depth collapsed into channels)."""
    x2d = x.reshape(N, Cin * K, H, W)
    branches = []
    for k in (7, 5, 3):
        w, b = params[k]
        p = k // 2
        w2d = w.reshape(Cout, Cin * K, k, k)
        y = lax.conv_general_dilated(
            x2d, w2d, window_strides=(1, 1), padding=[(p, p), (p, p)],
            dimension_numbers=('NCHW', 'OIHW', 'NCHW'))
        branches.append(y + b.reshape(1, Cout, 1, 1))
    return jnp.maximum(jnp.concatenate(branches, axis=1), 0.0)


if __name__ == "__main__":
    N, Cin, Cout, K, H, W = 2, 4, 4, 8, 16, 16

    key = jax.random.PRNGKey(0)
    kx, *wkeys = jax.random.split(key, 7)
    x = jax.random.normal(kx, (N, Cin, K, H, W), dtype=jnp.float32)

    # Deterministic parameter init (PyTorch Conv3d default: U(-1/sqrt(fan_in), +...)).
    params = {}
    wk = iter(wkeys)
    for k in (3, 5, 7):
        fan_in = Cin * K * k * k
        bound = 1.0 / np.sqrt(fan_in)
        w = jax.random.uniform(next(wk), (Cout, Cin, K, k, k),
                               minval=-bound, maxval=bound, dtype=jnp.float32)
        b = jax.random.uniform(next(wk), (Cout,),
                               minval=-bound, maxval=bound, dtype=jnp.float32)
        params[k] = (w, b)

    out = jax.jit(lambda xin: spectral_conv(xin, params))(x)
    out = jax.block_until_ready(out)

    ref = _reference(x, params, N, Cin, Cout, K, H, W)
    assert out.shape == (N, 3 * Cout, H, W), out.shape
    np.testing.assert_allclose(np.asarray(out), np.asarray(ref), atol=1e-4, rtol=1e-4)
    print("KERNEL_OK")
</pallas_src>

<mosaic_0001>
module attributes {stable_mosaic.version = 11 : i64} {
  func.func @_spectral_kernel(%arg0: i32, %arg1: memref<1x32x506xf32, #tpu.memory_space<vmem>>, %arg2: memref<12x1568xf32, #tpu.memory_space<vmem>>, %arg3: memref<12x1xf32, #tpu.memory_space<vmem>>, %arg4: memref<1x12x256xf32, #tpu.memory_space<vmem>>, %arg5: memref<1568x352xf32, #tpu.memory_space<vmem>>) attributes {dimension_semantics = [#tpu.dimension_semantics<parallel>], iteration_bounds = array<i64: 2>, scalar_prefetch = 0 : i64, scratch_operands = 1 : i64, tpu.core_type = #tpu.core_type<tc>, window_params = [{transform_indices = @transform_0, window_bounds = array<i64: 1, 32, 506>}, {pipeline_mode = #tpu.pipeline_mode<synchronous>, transform_indices = @transform_1, window_bounds = array<i64: 12, 1568>}, {pipeline_mode = #tpu.pipeline_mode<synchronous>, transform_indices = @transform_2, window_bounds = array<i64: 12, 1>}, {transform_indices = @transform_3, window_bounds = array<i64: 1, 12, 256>}]} {
    %c0 = arith.constant 0 : index
    %c0_0 = arith.constant 0 : index
    %c0_1 = arith.constant 0 : index
    %0 = vector.load %arg1[%c0, %c0_0, %c0_1] : memref<1x32x506xf32, #tpu.memory_space<vmem>>, vector<1x32x506xf32>
    %1 = vector.shape_cast %0 : vector<1x32x506xf32> to vector<32x506xf32>
    %2 = vector.extract_strided_slice %1 {offsets = [0, 0], sizes = [32, 352], strides = [1, 1]} : vector<32x506xf32> to vector<32x352xf32>
    %c0_2 = arith.constant 0 : index
    %c0_3 = arith.constant 0 : index
    %3 = vector.load %arg5[%c0_2, %c0_3] : memref<1568x352xf32, #tpu.memory_space<vmem>>, vector<32x352xf32>
    tpu.vector_store %arg5[%c0_2, %c0_3], %2 {strides = array<i32>} : memref<1568x352xf32, #tpu.memory_space<vmem>>, vector<32x352xf32>,
    %4 = vector.extract_strided_slice %1 {offsets = [0, 1], sizes = [32, 352], strides = [1, 1]} : vector<32x506xf32> to vector<32x352xf32>
    %c32 = arith.constant 32 : index
    %c0_4 = arith.constant 0 : index
    %5 = vector.load %arg5[%c32, %c0_4] : memref<1568x352xf32, #tpu.memory_space<vmem>>, vector<32x352xf32>
    tpu.vector_store %arg5[%c32, %c0_4], %4 {strides = array<i32>} : memref<1568x352xf32, #tpu.memory_space<vmem>>, vector<32x352xf32>,
    %6 = vector.extract_strided_slice %1 {offsets = [0, 2], sizes = [32, 352], strides = [1, 1]} : vector<32x506xf32> to vector<32x352xf32>
    %c64 = arith.constant 64 : index
    %c0_5 = arith.constant 0 : index
    %7 = vector.load %arg5[%c64, %c0_5] : memref<1568x352xf32, #tpu.memory_space<vmem>>, vector<32x352xf32>
    tpu.vector_store %arg5[%c64, %c0_5], %6 {strides = array<i32>} : memref<1568x352xf32, #tpu.memory_space<vmem>>, vector<32x352xf32>,
    %8 = vector.extract_strided_slice %1 {offsets = [0, 3], sizes = [32, 352], strides = [1, 1]} : vector<32x506xf32> to vector<32x352xf32>
    %c96 = arith.constant 96 : index
    %c0_6 = arith.constant 0 : index
    %9 = vector.load %arg5[%c96, %c0_6] : memref<1568x352xf32, #tpu.memory_space<vmem>>, vector<32x352xf32>
    tpu.vector_store %arg5[%c96, %c0_6], %8 {strides = array<i32>} : memref<1568x352xf32, #tpu.memory_space<vmem>>, vector<32x352xf32>,
    %10 = vector.extract_strided_slice %1 {offsets = [0, 4], sizes = [32, 352], strides = [1, 1]} : vector<32x506xf32> to vector<32x352xf32>
    %c128 = arith.constant 128 : index
    %c0_7 = arith.constant 0 : index
    %11 = vector.load %arg5[%c128, %c0_7] : memref<1568x352xf32, #tpu.memory_space<vmem>>, vector<32x352xf32>
    tpu.vector_store %arg5[%c128, %c0_7], %10 {strides = array<i32>} : memref<1568x352xf32, #tpu.memory_space<vmem>>, vector<32x352xf32>,
    %12 = vector.extract_strided_slice %1 {offsets = [0, 5], sizes = [32, 352], strides = [1, 1]} : vector<32x506xf32> to vector<32x352xf32>
    %c160 = arith.constant 160 : index
    %c0_8 = arith.constant 0 : index
    %13 = vector.load %arg5[%c160, %c0_8] : memref<1568x352xf32, #tpu.memory_space<vmem>>, vector<32x352xf32>
    tpu.vector_store %arg5[%c160, %c0_8], %12 {strides = array<i32>} : memref<1568x352xf32, #tpu.memory_space<vmem>>, vector<32x352xf32>,
    %14 = vector.extract_strided_slice %1 {offsets = [0, 6], sizes = [32, 352], strides = [1, 1]} : vector<32x506xf32> to vector<32x352xf32>
    %c192 = arith.constant 192 : index
    %c0_9 = arith.constant 0 : index
    %15 = vector.load %arg5[%c192, %c0_9] : memref<1568x352xf32, #tpu.memory_space<vmem>>, vector<32x352xf32>
    tpu.vector_store %arg5[%c192, %c0_9], %14 {strides = array<i32>} : memref<1568x352xf32, #tpu.memory_space<vmem>>, vector<32x352xf32>,
    %16 = vector.extract_strided_slice %1 {offsets = [0, 22], sizes = [32, 352], strides = [1, 1]} : vector<32x506xf32> to vector<32x352xf32>
    %c224 = arith.constant 224 : index
    %c0_10 = arith.constant 0 : index
    %17 = vector.load %arg5[%c224, %c0_10] : memref<1568x352xf32, #tpu.memory_space<vmem>>, vector<32x352xf32>
    tpu.vector_store %arg5[%c224, %c0_10], %16 {strides = array<i32>} : memref<1568x352xf32, #tpu.memory_space<vmem>>, vector<32x352xf32>,
    %18 = vector.extract_strided_slice %1 {offsets = [0, 23], sizes = [32, 352], strides = [1, 1]} : vector<32x506xf32> to vector<32x352xf32>
    %c256 = arith.constant 256 : index
    %c0_11 = arith.constant 0 : index
    %19 = vector.load %arg5[%c256, %c0_11] : memref<1568x352xf32, #tpu.memory_space<vmem>>, vector<32x352xf32>
    tpu.vector_store %arg5[%c256, %c0_11], %18 {strides = array<i32>} : memref<1568x352xf32, #tpu.memory_space<vmem>>, vector<32x352xf32>,
    %20 = vector.extract_strided_slice %1 {offsets = [0, 24], sizes = [32, 352], strides = [1, 1]} : vector<32x506xf32> to vector<32x352xf32>
    %c288 = arith.constant 288 : index
    %c0_12 = arith.constant 0 : index
    %21 = vector.load %arg5[%c288, %c0_12] : memref<1568x352xf32, #tpu.memory_space<vmem>>, vector<32x352xf32>
    tpu.vector_store %arg5[%c288, %c0_12], %20 {strides = array<i32>} : memref<1568x352xf32, #tpu.memory_space<vmem>>, vector<32x352xf32>,
    %22 = vector.extract_strided_slice %1 {offsets = [0, 25], sizes = [32, 352], strides = [1, 1]} : vector<32x506xf32> to vector<32x352xf32>
    %c320 = arith.constant 320 : index
    %c0_13 = arith.constant 0 : index
    %23 = vector.load %arg5[%c320, %c0_13] : memref<1568x352xf32, #tpu.memory_space<vmem>>, vector<32x352xf32>
    tpu.vector_store %arg5[%c320, %c0_13], %22 {strides = array<i32>} : memref<1568x352xf32, #tpu.memory_space<vmem>>, vector<32x352xf32>,
    %24 = vector.extract_strided_slice %1 {offsets = [0, 26], sizes = [32, 352], strides = [1, 1]} : vector<32x506xf32> to vector<32x352xf32>
    %c352 = arith.constant 352 : index
    %c0_14 = arith.constant 0 : index
    %25 = vector.load %arg5[%c352, %c0_14] : memref<1568x352xf32, #tpu.memory_space<vmem>>, vector<32x352xf32>
    tpu.vector_store %arg5[%c352, %c0_14], %24 {strides = array<i32>} : memref<1568x352xf32, #tpu.memory_space<vmem>>, vector<32x352xf32>,
    %26 = vector.extract_strided_slice %1 {offsets = [0, 27], sizes = [32, 352], strides = [1, 1]} : vector<32x506xf32> to vector<32x352xf32>
    %c384 = arith.constant 384 : index
    %c0_15 = arith.constant 0 : index
    %27 = vector.load %arg5[%c384, %c0_15] : memref<1568x352xf32, #tpu.memory_space<vmem>>, vector<32x352xf32>
    tpu.vector_store %arg5[%c384, %c0_15], %26 {strides = array<i32>} : memref<1568x352xf32, #tpu.memory_space<vmem>>, vector<32x352xf32>,
    %28 = vector.extract_strided_slice %1 {offsets = [0, 28], sizes = [32, 352], strides = [1, 1]} : vector<32x506xf32> to vector<32x352xf32>
    %c416 = arith.constant 416 : index
    %c0_16 = arith.constant 0 : index
    %29 = vector.load %arg5[%c416, %c0_16] : memref<1568x352xf32, #tpu.memory_space<vmem>>, vector<32x352xf32>
    tpu.vector_store %arg5[%c416, %c0_16], %28 {strides = array<i32>} : memref<1568x352xf32, #tpu.memory_space<vmem>>, vector<32x352xf32>,
    %30 = vector.extract_strided_slice %1 {offsets = [0, 44], sizes = [32, 352], strides = [1, 1]} : vector<32x506xf32> to vector<32x352xf32>
    %c448 = arith.constant 448 : index
    %c0_17 = arith.constant 0 : index
    %31 = vector.load %arg5[%c448, %c0_17] : memref<1568x352xf32, #tpu.memory_space<vmem>>, vector<32x352xf32>
    tpu.vector_store %arg5[%c448, %c0_17], %30 {strides = array<i32>} : memref<1568x352xf32, #tpu.memory_space<vmem>>, vector<32x352xf32>,
    %32 = vector.extract_strided_slice %1 {offsets = [0, 45], sizes = [32, 352], strides = [1, 1]} : vector<32x506xf32> to vector<32x352xf32>
    %c480 = arith.constant 480 : index
    %c0_18 = arith.constant 0 : index
    %33 = vector.load %arg5[%c480, %c0_18] : memref<1568x352xf32, #tpu.memory_space<vmem>>, vector<32x352xf32>
    tpu.vector_store %arg5[%c480, %c0_18], %32 {strides = array<i32>} : memref<1568x352xf32, #tpu.memory_space<vmem>>, vector<32x352xf32>,
    %34 = vector.extract_strided_slice %1 {offsets = [0, 46], sizes = [32, 352], strides = [1, 1]} : vector<32x506xf32> to vector<32x352xf32>
    %c512 = arith.constant 512 : index
    %c0_19 = arith.constant 0 : index
    %35 = vector.load %arg5[%c512, %c0_19] : memref<1568x352xf32, #tpu.memory_space<vmem>>, vector<32x352xf32>
    tpu.vector_store %arg5[%c512, %c0_19], %34 {strides = array<i32>} : memref<1568x352xf32, #tpu.memory_space<vmem>>, vector<32x352xf32>,
    %36 = vector.extract_strided_slice %1 {offsets = [0, 47], sizes = [32, 352], strides = [1, 1]} : vector<32x506xf32> to vector<32x352xf32>
    %c544 = arith.constant 544 : index
    %c0_20 = arith.constant 0 : index
    %37 = vector.load %arg5[%c544, %c0_20] : memref<1568x352xf32, #tpu.memory_space<vmem>>, vector<32x352xf32>
    tpu.vector_store %arg5[%c544, %c0_20], %36 {strides = array<i32>} : memref<1568x352xf32, #tpu.memory_space<vmem>>, vector<32x352xf32>,
    %38 = vector.extract_strided_slice %1 {offsets = [0, 48], sizes = [32, 352], strides = [1, 1]} : vector<32x506xf32> to vector<32x352xf32>
    %c576 = arith.constant 576 : index
    %c0_21 = arith.constant 0 : index
    %39 = vector.load %arg5[%c576, %c0_21] : memref<1568x352xf32, #tpu.memory_space<vmem>>, vector<32x352xf32>
    tpu.vector_store %arg5[%c576, %c0_21], %38 {strides = array<i32>} : memref<1568x352xf32, #tpu.memory_space<vmem>>, vector<32x352xf32>,
    %40 = vector.extract_strided_slice %1 {offsets = [0, 49], sizes = [32, 352], strides = [1, 1]} : vector<32x506xf32> to vector<32x352xf32>
    %c608 = arith.constant 608 : index
    %c0_22 = arith.constant 0 : index
    %41 = vector.load %arg5[%c608, %c0_22] : memref<1568x352xf32, #tpu.memory_space<vmem>>, vector<32x352xf32>
    tpu.vector_store %arg5[%c608, %c0_22], %40 {strides = array<i32>} : memref<1568x352xf32, #tpu.memory_space<vmem>>, vector<32x352xf32>,
    %42 = vector.extract_strided_slice %1 {offsets = [0, 50], sizes = [32, 352], strides = [1, 1]} : vector<32x506xf32> to vector<32x352xf32>
    %c640 = arith.constant 640 : index
    %c0_23 = arith.constant 0 : index
    %43 = vector.load %arg5[%c640, %c0_23] : memref<1568x352xf32, #tpu.memory_space<vmem>>, vector<32x352xf32>
    tpu.vector_store %arg5[%c640, %c0_23], %42 {strides = array<i32>} : memref<1568x352xf32, #tpu.memory_space<vmem>>, vector<32x352xf32>,
    %44 = vector.extract_strided_slice %1 {offsets = [0, 66], sizes = [32, 352], strides = [1, 1]} : vector<32x506xf32> to vector<32x352xf32>
    %c672 = arith.constant 672 : index
    %c0_24 = arith.constant 0 : index
    %45 = vector.load %arg5[%c672, %c0_24] : memref<1568x352xf32, #tpu.memory_space<vmem>>, vector<32x352xf32>
    tpu.vector_store %arg5[%c672, %c0_24], %44 {strides = array<i32>} : memref<1568x352xf32, #tpu.memory_space<vmem>>, vector<32x352xf32>,
    %46 = vector.extract_strided_slice %1 {offsets = [0, 67], sizes = [32, 352], strides = [1, 1]} : vector<32x506xf32> to vector<32x352xf32>
    %c704 = arith.constant 704 : index
    %c0_25 = arith.constant 0 : index
    %47 = vector.load %arg5[%c704, %c0_25] : memref<1568x352xf32, #tpu.memory_space<vmem>>, vector<32x352xf32>
    tpu.vector_store %arg5[%c704, %c0_25], %46 {strides = array<i32>} : memref<1568x352xf32, #tpu.memory_space<vmem>>, vector<32x352xf32>,
    %48 = vector.extract_strided_slice %1 {offsets = [0, 68], sizes = [32, 352], strides = [1, 1]} : vector<32x506xf32> to vector<32x352xf32>
    %c736 = arith.constant 736 : index
    %c0_26 = arith.constant 0 : index
    %49 = vector.load %arg5[%c736, %c0_26] : memref<1568x352xf32, #tpu.memory_space<vmem>>, vector<32x352xf32>
    tpu.vector_store %arg5[%c736, %c0_26], %48 {strides = array<i32>} : memref<1568x352xf32, #tpu.memory_space<vmem>>, vector<32x352xf32>,
    %50 = vector.extract_strided_slice %1 {offsets = [0, 69], sizes = [32, 352], strides = [1, 1]} : vector<32x506xf32> to vector<32x352xf32>
    %c768 = arith.constant 768 : index
    %c0_27 = arith.constant 0 : index
    %51 = vector.load %arg5[%c768, %c0_27] : memref<1568x352xf32, #tpu.memory_space<vmem>>, vector<32x352xf32>
    tpu.vector_store %arg5[%c768, %c0_27], %50 {strides = array<i32>} : memref<1568x352xf32, #tpu.memory_space<vmem>>, vector<32x352xf32>,
    %52 = vector.extract_strided_slice %1 {offsets = [0, 70], sizes = [32, 352], strides = [1, 1]} : vector<32x506xf32> to vector<32x352xf32>
    %c800 = arith.constant 800 : index
    %c0_28 = arith.constant 0 : index
    %53 = vector.load %arg5[%c800, %c0_28] : memref<1568x352xf32, #tpu.memory_space<vmem>>, vector<32x352xf32>
    tpu.vector_store %arg5[%c800, %c0_28], %52 {strides = array<i32>} : memref<1568x352xf32, #tpu.memory_space<vmem>>, vector<32x352xf32>,
    %54 = vector.extract_strided_slice %1 {offsets = [0, 71], sizes = [32, 352], strides = [1, 1]} : vector<32x506xf32> to vector<32x352xf32>
    %c832 = arith.constant 832 : index
    %c0_29 = arith.constant 0 : index
    %55 = vector.load %arg5[%c832, %c0_29] : memref<1568x352xf32, #tpu.memory_space<vmem>>, vector<32x352xf32>
    tpu.vector_store %arg5[%c832, %c0_29], %54 {strides = array<i32>} : memref<1568x352xf32, #tpu.memory_space<vmem>>, vector<32x352xf32>,
    %56 = vector.extract_strided_slice %1 {offsets = [0, 72], sizes = [32, 352], strides = [1, 1]} : vector<32x506xf32> to vector<32x352xf32>
    %c864 = arith.constant 864 : index
    %c0_30 = arith.constant 0 : index
    %57 = vector.load %arg5[%c864, %c0_30] : memref<1568x352xf32, #tpu.memory_space<vmem>>, vector<32x352xf32>
    tpu.vector_store %arg5[%c864, %c0_30], %56 {strides = array<i32>} : memref<1568x352xf32, #tpu.memory_space<vmem>>, vector<32x352xf32>,
    %58 = vector.extract_strided_slice %1 {offsets = [0, 88], sizes = [32, 352], strides = [1, 1]} : vector<32x506xf32> to vector<32x352xf32>
    %c896 = arith.constant 896 : index
    %c0_31 = arith.constant 0 : index
    %59 = vector.load %arg5[%c896, %c0_31] : memref<1568x352xf32, #tpu.memory_space<vmem>>, vector<32x352xf32>
    tpu.vector_store %arg5[%c896, %c0_31], %58 {strides = array<i32>} : memref<1568x352xf32, #tpu.memory_space<vmem>>, vector<32x352xf32>,
    %60 = vector.extract_strided_slice %1 {offsets = [0, 89], sizes = [32, 352], strides = [1, 1]} : vector<32x506xf32> to vector<32x352xf32>
    %c928 = arith.constant 928 : index
    %c0_32 = arith.constant 0 : index
    %61 = vector.load %arg5[%c928, %c0_32] : memref<1568x352xf32, #tpu.memory_space<vmem>>, vector<32x352xf32>
    tpu.vector_store %arg5[%c928, %c0_32], %60 {strides = array<i32>} : memref<1568x352xf32, #tpu.memory_space<vmem>>, vector<32x352xf32>,
    %62 = vector.extract_strided_slice %1 {offsets = [0, 90], sizes = [32, 352], strides = [1, 1]} : vector<32x506xf32> to vector<32x352xf32>
    %c960 = arith.constant 960 : index
    %c0_33 = arith.constant 0 : index
    %63 = vector.load %arg5[%c960, %c0_33] : memref<1568x352xf32, #tpu.memory_space<vmem>>, vector<32x352xf32>
    tpu.vector_store %arg5[%c960, %c0_33], %62 {strides = array<i32>} : memref<1568x352xf32, #tpu.memory_space<vmem>>, vector<32x352xf32>,
    %64 = vector.extract_strided_slice %1 {offsets = [0, 91], sizes = [32, 352], strides = [1, 1]} : vector<32x506xf32> to vector<32x352xf32>
    %c992 = arith.constant 992 : index
    %c0_34 = arith.constant 0 : index
    %65 = vector.load %arg5[%c992, %c0_34] : memref<1568x352xf32, #tpu.memory_space<vmem>>, vector<32x352xf32>
    tpu.vector_store %arg5[%c992, %c0_34], %64 {strides = array<i32>} : memref<1568x352xf32, #tpu.memory_space<vmem>>, vector<32x352xf32>,
    %66 = vector.extract_strided_slice %1 {offsets = [0, 92], sizes = [32, 352], strides = [1, 1]} : vector<32x506xf32> to vector<32x352xf32>
    %c1024 = arith.constant 1024 : index
    %c0_35 = arith.constant 0 : index
    %67 = vector.load %arg5[%c1024, %c0_35] : memref<1568x352xf32, #tpu.memory_space<vmem>>, vector<32x352xf32>
    tpu.vector_store %arg5[%c1024, %c0_35], %66 {strides = array<i32>} : memref<1568x352xf32, #tpu.memory_space<vmem>>, vector<32x352xf32>,
    %68 = vector.extract_strided_slice %1 {offsets = [0, 93], sizes = [32, 352], strides = [1, 1]} : vector<32x506xf32> to vector<32x352xf32>
    %c1056 = arith.constant 1056 : index
    %c0_36 = arith.constant 0 : index
    %69 = vector.load %arg5[%c1056, %c0_36] : memref<1568x352xf32, #tpu.memory_space<vmem>>, vector<32x352xf32>
    tpu.vector_store %arg5[%c1056, %c0_36], %68 {strides = array<i32>} : memref<1568x352xf32, #tpu.memory_space<vmem>>, vector<32x352xf32>,
    %70 = vector.extract_strided_slice %1 {offsets = [0, 94], sizes = [32, 352], strides = [1, 1]} : vector<32x506xf32> to vector<32x352xf32>
    %c1088 = arith.constant 1088 : index
    %c0_37 = arith.constant 0 : index
    %71 = vector.load %arg5[%c1088, %c0_37] : memref<1568x352xf32, #tpu.memory_space<vmem>>, vector<32x352xf32>
    tpu.vector_store %arg5[%c1088, %c0_37], %70 {strides = array<i32>} : memref<1568x352xf32, #tpu.memory_space<vmem>>, vector<32x352xf32>,
    %72 = vector.extract_strided_slice %1 {offsets = [0, 110], sizes = [32, 352], strides = [1, 1]} : vector<32x506xf32> to vector<32x352xf32>
    %c1120 = arith.constant 1120 : index
    %c0_38 = arith.constant 0 : index
    %73 = vector.load %arg5[%c1120, %c0_38] : memref<1568x352xf32, #tpu.memory_space<vmem>>, vector<32x352xf32>
    tpu.vector_store %arg5[%c1120, %c0_38], %72 {strides = array<i32>} : memref<1568x352xf32, #tpu.memory_space<vmem>>, vector<32x352xf32>,
    %74 = vector.extract_strided_slice %1 {offsets = [0, 111], sizes = [32, 352], strides = [1, 1]} : vector<32x506xf32> to vector<32x352xf32>
    %c1152 = arith.constant 1152 : index
    %c0_39 = arith.constant 0 : index
    %75 = vector.load %arg5[%c1152, %c0_39] : memref<1568x352xf32, #tpu.memory_space<vmem>>, vector<32x352xf32>
    tpu.vector_store %arg5[%c1152, %c0_39], %74 {strides = array<i32>} : memref<1568x352xf32, #tpu.memory_space<vmem>>, vector<32x352xf32>,
    %76 = vector.extract_strided_slice %1 {offsets = [0, 112], sizes = [32, 352], strides = [1, 1]} : vector<32x506xf32> to vector<32x352xf32>
    %c1184 = arith.constant 1184 : index
    %c0_40 = arith.constant 0 : index
    %77 = vector.load %arg5[%c1184, %c0_40] : memref<1568x352xf32, #tpu.memory_space<vmem>>, vector<32x352xf32>
    tpu.vector_store %arg5[%c1184, %c0_40], %76 {strides = array<i32>} : memref<1568x352xf32, #tpu.memory_space<vmem>>, vector<32x352xf32>,
    %78 = vector.extract_strided_slice %1 {offsets = [0, 113], sizes = [32, 352], strides = [1, 1]} : vector<32x506xf32> to vector<32x352xf32>
    %c1216 = arith.constant 1216 : index
    %c0_41 = arith.constant 0 : index
    %79 = vector.load %arg5[%c1216, %c0_41] : memref<1568x352xf32, #tpu.memory_space<vmem>>, vector<32x352xf32>
    tpu.vector_store %arg5[%c1216, %c0_41], %78 {strides = array<i32>} : memref<1568x352xf32, #tpu.memory_space<vmem>>, vector<32x352xf32>,
    %80 = vector.extract_strided_slice %1 {offsets = [0, 114], sizes = [32, 352], strides = [1, 1]} : vector<32x506xf32> to vector<32x352xf32>
    %c1248 = arith.constant 1248 : index
    %c0_42 = arith.constant 0 : index
    %81 = vector.load %arg5[%c1248, %c0_42] : memref<1568x352xf32, #tpu.memory_space<vmem>>, vector<32x352xf32>
    tpu.vector_store %arg5[%c1248, %c0_42], %80 {strides = array<i32>} : memref<1568x352xf32, #tpu.memory_space<vmem>>, vector<32x352xf32>,
    %82 = vector.extract_strided_slice %1 {offsets = [0, 115], sizes = [32, 352], strides = [1, 1]} : vector<32x506xf32> to vector<32x352xf32>
    %c1280 = arith.constant 1280 : index
    %c0_43 = arith.constant 0 : index
    %83 = vector.load %arg5[%c1280, %c0_43] : memref<1568x352xf32, #tpu.memory_space<vmem>>, vector<32x352xf32>
    tpu.vector_store %arg5[%c1280, %c0_43], %82 {strides = array<i32>} : memref<1568x352xf32, #tpu.memory_space<vmem>>, vector<32x352xf32>,
    %84 = vector.extract_strided_slice %1 {offsets = [0, 116], sizes = [32, 352], strides = [1, 1]} : vector<32x506xf32> to vector<32x352xf32>
    %c1312 = arith.constant 1312 : index
    %c0_44 = arith.constant 0 : index
    %85 = vector.load %arg5[%c1312, %c0_44] : memref<1568x352xf32, #tpu.memory_space<vmem>>, vector<32x352xf32>
    tpu.vector_store %arg5[%c1312, %c0_44], %84 {strides = array<i32>} : memref<1568x352xf32, #tpu.memory_space<vmem>>, vector<32x352xf32>,
    %86 = vector.extract_strided_slice %1 {offsets = [0, 132], sizes = [32, 352], strides = [1, 1]} : vector<32x506xf32> to vector<32x352xf32>
    %c1344 = arith.constant 1344 : index
    %c0_45 = arith.constant 0 : index
    %87 = vector.load %arg5[%c1344, %c0_45] : memref<1568x352xf32, #tpu.memory_space<vmem>>, vector<32x352xf32>
    tpu.vector_store %arg5[%c1344, %c0_45], %86 {strides = array<i32>} : memref<1568x352xf32, #tpu.memory_space<vmem>>, vector<32x352xf32>,
    %88 = vector.extract_strided_slice %1 {offsets = [0, 133], sizes = [32, 352], strides = [1, 1]} : vector<32x506xf32> to vector<32x352xf32>
    %c1376 = arith.constant 1376 : index
    %c0_46 = arith.constant 0 : index
    %89 = vector.load %arg5[%c1376, %c0_46] : memref<1568x352xf32, #tpu.memory_space<vmem>>, vector<32x352xf32>
    tpu.vector_store %arg5[%c1376, %c0_46], %88 {strides = array<i32>} : memref<1568x352xf32, #tpu.memory_space<vmem>>, vector<32x352xf32>,
    %90 = vector.extract_strided_slice %1 {offsets = [0, 134], sizes = [32, 352], strides = [1, 1]} : vector<32x506xf32> to vector<32x352xf32>
    %c1408 = arith.constant 1408 : index
    %c0_47 = arith.constant 0 : index
    %91 = vector.load %arg5[%c1408, %c0_47] : memref<1568x352xf32, #tpu.memory_space<vmem>>, vector<32x352xf32>
    tpu.vector_store %arg5[%c1408, %c0_47], %90 {strides = array<i32>} : memref<1568x352xf32, #tpu.memory_space<vmem>>, vector<32x352xf32>,
    %92 = vector.extract_strided_slice %1 {offsets = [0, 135], sizes = [32, 352], strides = [1, 1]} : vector<32x506xf32> to vector<32x352xf32>
    %c1440 = arith.constant 1440 : index
    %c0_48 = arith.constant 0 : index
    %93 = vector.load %arg5[%c1440, %c0_48] : memref<1568x352xf32, #tpu.memory_space<vmem>>, vector<32x352xf32>
    tpu.vector_store %arg5[%c1440, %c0_48], %92 {strides = array<i32>} : memref<1568x352xf32, #tpu.memory_space<vmem>>, vector<32x352xf32>,
    %94 = vector.extract_strided_slice %1 {offsets = [0, 136], sizes = [32, 352], strides = [1, 1]} : vector<32x506xf32> to vector<32x352xf32>
    %c1472 = arith.constant 1472 : index
    %c0_49 = arith.constant 0 : index
    %95 = vector.load %arg5[%c1472, %c0_49] : memref<1568x352xf32, #tpu.memory_space<vmem>>, vector<32x352xf32>
    tpu.vector_store %arg5[%c1472, %c0_49], %94 {strides = array<i32>} : memref<1568x352xf32, #tpu.memory_space<vmem>>, vector<32x352xf32>,
    %96 = vector.extract_strided_slice %1 {offsets = [0, 137], sizes = [32, 352], strides = [1, 1]} : vector<32x506xf32> to vector<32x352xf32>
    %c1504 = arith.constant 1504 : index
    %c0_50 = arith.constant 0 : index
    %97 = vector.load %arg5[%c1504, %c0_50] : memref<1568x352xf32, #tpu.memory_space<vmem>>, vector<32x352xf32>
    tpu.vector_store %arg5[%c1504, %c0_50], %96 {strides = array<i32>} : memref<1568x352xf32, #tpu.memory_space<vmem>>, vector<32x352xf32>,
    %98 = vector.extract_strided_slice %1 {offsets = [0, 138], sizes = [32, 352], strides = [1, 1]} : vector<32x506xf32> to vector<32x352xf32>
    %c1536 = arith.constant 1536 : index
    %c0_51 = arith.constant 0 : index
    %99 = vector.load %arg5[%c1536, %c0_51] : memref<1568x352xf32, #tpu.memory_space<vmem>>, vector<32x352xf32>
    tpu.vector_store %arg5[%c1536, %c0_51], %98 {strides = array<i32>} : memref<1568x352xf32, #tpu.memory_space<vmem>>, vector<32x352xf32>,
    %c0_52 = arith.constant 0 : index
    %c0_53 = arith.constant 0 : index
    %100 = vector.load %arg2[%c0_52, %c0_53] : memref<12x1568xf32, #tpu.memory_space<vmem>>, vector<12x1568xf32>
    %c0_54 = arith.constant 0 : index
    %c0_55 = arith.constant 0 : index
    %101 = vector.load %arg5[%c0_54, %c0_55] : memref<1568x352xf32, #tpu.memory_space<vmem>>, vector<1568x352xf32>
    %cst = arith.constant dense<0.000000e+00> : vector<12x352xf32>
    %102 = tpu.matmul %100, %101, %cst {dimension_numbers = #tpu.dot_dimension_numbers<[1], [0], [0], [1], [0, 0, 1, 1], [], []>} : vector<12x1568xf32>, vector<1568x352xf32>, vector<12x352xf32> -> vector<12x352xf32>
    %103 = vector.extract_strided_slice %102 {offsets = [0, 0], sizes = [12, 16], strides = [1, 1]} : vector<12x352xf32> to vector<12x16xf32>
    %104 = vector.extract_strided_slice %102 {offsets = [0, 22], sizes = [12, 16], strides = [1, 1]} : vector<12x352xf32> to vector<12x16xf32>
    %105 = vector.extract_strided_slice %102 {offsets = [0, 44], sizes = [12, 16], strides = [1, 1]} : vector<12x352xf32> to vector<12x16xf32>
    %106 = vector.extract_strided_slice %102 {offsets = [0, 66], sizes = [12, 16], strides = [1, 1]} : vector<12x352xf32> to vector<12x16xf32>
    %107 = vector.extract_strided_slice %102 {offsets = [0, 88], sizes = [12, 16], strides = [1, 1]} : vector<12x352xf32> to vector<12x16xf32>
    %108 = vector.extract_strided_slice %102 {offsets = [0, 110], sizes = [12, 16], strides = [1, 1]} : vector<12x352xf32> to vector<12x16xf32>
    %109 = vector.extract_strided_slice %102 {offsets = [0, 132], sizes = [12, 16], strides = [1, 1]} : vector<12x352xf32> to vector<12x16xf32>
    %110 = vector.extract_strided_slice %102 {offsets = [0, 154], sizes = [12, 16], strides = [1, 1]} : vector<12x352xf32> to vector<12x16xf32>
    %111 = vector.extract_strided_slice %102 {offsets = [0, 176], sizes = [12, 16], strides = [1, 1]} : vector<12x352xf32> to vector<12x16xf32>
    %112 = vector.extract_strided_slice %102 {offsets = [0, 198], sizes = [12, 16], strides = [1, 1]} : vector<12x352xf32> to vector<12x16xf32>
    %113 = vector.extract_strided_slice %102 {offsets = [0, 220], sizes = [12, 16], strides = [1, 1]} : vector<12x352xf32> to vector<12x16xf32>
    %114 = vector.extract_strided_slice %102 {offsets = [0, 242], sizes = [12, 16], strides = [1, 1]} : vector<12x352xf32> to vector<12x16xf32>
    %115 = vector.extract_strided_slice %102 {offsets = [0, 264], sizes = [12, 16], strides = [1, 1]} : vector<12x352xf32> to vector<12x16xf32>
    %116 = vector.extract_strided_slice %102 {offsets = [0, 286], sizes = [12, 16], strides = [1, 1]} : vector<12x352xf32> to vector<12x16xf32>
    %117 = vector.extract_strided_slice %102 {offsets = [0, 308], sizes = [12, 16], strides = [1, 1]} : vector<12x352xf32> to vector<12x16xf32>
    %118 = vector.extract_strided_slice %102 {offsets = [0, 330], sizes = [12, 16], strides = [1, 1]} : vector<12x352xf32> to vector<12x16xf32>
    %119 = tpu.concatenate %103, %104, %105, %106, %107, %108, %109, %110, %111, %112, %113, %114, %115, %116, %117, %118 in 1 : vector<12x16xf32>, vector<12x16xf32>, vector<12x16xf32>, vector<12x16xf32>, vector<12x16xf32>, vector<12x16xf32>, vector<12x16xf32>, vector<12x16xf32>, vector<12x16xf32>, vector<12x16xf32>, vector<12x16xf32>, vector<12x16xf32>, vector<12x16xf32>, vector<12x16xf32>, vector<12x16xf32>, vector<12x16xf32> -> vector<12x256xf32>
    %c0_56 = arith.constant 0 : index
    %c0_57 = arith.constant 0 : index
    %120 = vector.load %arg3[%c0_56, %c0_57] : memref<12x1xf32, #tpu.memory_space<vmem>>, vector<12x1xf32>
    %121 = vector.broadcast %120 : vector<12x1xf32> to vector<12x256xf32>
    %122 = arith.addf %119, %121 : vector<12x256xf32>
    %cst_58 = arith.constant 0.000000e+00 : f32
    %123 = vector.broadcast %cst_58 : f32 to vector<12x256xf32>
    %124 = arith.maximumf %122, %123 : vector<12x256xf32>
    %c0_59 = arith.constant 0 : index
    %c0_60 = arith.constant 0 : index
    %c0_61 = arith.constant 0 : index
    %125 = vector.load %arg4[%c0_59, %c0_60, %c0_61] : memref<1x12x256xf32, #tpu.memory_space<vmem>>, vector<1x12x256xf32>
    %126 = vector.shape_cast %125 : vector<1x12x256xf32> to vector<12x256xf32>
    %127 = vector.shape_cast %124 : vector<12x256xf32> to vector<1x12x256xf32>
    tpu.vector_store %arg4[%c0_59, %c0_60, %c0_61], %127 {strides = array<i32>} : memref<1x12x256xf32, #tpu.memory_space<vmem>>, vector<1x12x256xf32>,
    return
  }
  func.func @transform_0(%arg0: i32) -> (i32, i32, i32) {
    %c0_i32 = arith.constant 0 : i32
    %c0_i32_0 = arith.constant 0 : i32
    %c0_i32_1 = arith.constant 0 : i32
    return %arg0, %c0_i32, %c0_i32_0 : i32, i32, i32
  }
  func.func @transform_1(%arg0: i32) -> (i32, i32) {
    %c0_i32 = arith.constant 0 : i32
    %c0_i32_0 = arith.constant 0 : i32
    %c0_i32_1 = arith.constant 0 : i32
    return %c0_i32, %c0_i32_0 : i32, i32
  }
  func.func @transform_2(%arg0: i32) -> (i32, i32) {
    %c0_i32 = arith.constant 0 : i32
    %c0_i32_0 = arith.constant 0 : i32
    %c0_i32_1 = arith.constant 0 : i32
    return %c0_i32, %c0_i32_0 : i32, i32
  }
  func.func @transform_3(%arg0: i32) -> (i32, i32, i32) {
    %c0_i32 = arith.constant 0 : i32
    %c0_i32_0 = arith.constant 0 : i32
    %c0_i32_1 = arith.constant 0 : i32
    return %arg0, %c0_i32, %c0_i32_0 : i32, i32, i32
  }
}

</mosaic_0001>

<bundles_post_ra>
// kernel: _lambda_.1
= control target key start
LH: loop header
LB: loop body
LE: loop exit
PB: predicated region body
PF: predicated region fallthrough
CT: control target
= control target key end

     0   :  { %s6197_s12 = smov 0   ;;  %s8862_s0 = inlined_call_operand.vmem [shape: f32[2,32,506], index: 0, kind: input, shape index: {}]   ;;  %s8863_s1 = inlined_call_operand.vmem [shape: f32[12,1568], index: 1, kind: input, shape index: {}]   ;;  %s8864_s2 = inlined_call_operand.vmem [shape: f32[12,1], index: 2, kind: input, shape index: {}]   ;;  %s8865_s3 = inlined_call_operand.vmem [shape: f32[2,12,256], index: 3, kind: output, shape index: {}]  }
   0x1 LB: > { %s5110_s13 = sadd.s32 4294967295, %s6119_s12   ;;  %p5114_p0 = scmp.ge.s32.totalorder %s6119_s12, 1  ;;  %s6119_s12 = sphi %s6197_s12, %s13_s12  }
   0x2   : > { %p137_p1 = scmp.lt.s32.totalorder %s6119_s12, 3 }
   0x4   : > { %p138_p2 = pnand %p5114_p0, %p137_p1 }
   0x6   : > { %141 = sbr.rel (%p138_p2) target bundleno = 1882 (0x75a), region = 32 }
   0xd   : > { %p161_p3 = scmp.lt.s32.totalorder %s5110_s13, 1  ;;  %vm189_vm0 = vcmask 785408   ;;  %s6121_s18 = smov 127   ;;  %vm236_vm1 = vcmask 1039360   ;;  %vm293_vm2 = vcmask 1031168   ;;  %vm350_vm3 = vcmask 1022976  }
   0xe   : > { %s6122_s19 = smov 126   ;;  %s6123_s20 = smov 125   ;;  %vm407_vm4 = vcmask 1014784   ;;  %vm464_vm5 = vcmask 1006592   ;;  %vm521_vm6 = vcmask 998400   ;;  %vm578_vm7 = vcmask 867328  }
   0xf   : > { %s8879_s13 = smov (!%p161_p3, %s5110_s13), 1  ;;  %s6124_s21 = smov 124   ;;  %vm635_vm8 = vcmask 859136   ;;  %vm692_vm9 = vcmask 850944   ;;  %vm749_vm10 = vcmask 842752   ;;  %vm806_vm11 = vcmask 834560  }
  0x10   : > { %s5125_s14 = sshll.u32 %s8879_s13, 7  ;;  %s6125_s22 = smov 123   ;;  %vm863_vm12 = vcmask 826368   ;;  %vm920_vm13 = vcmask 818176   ;;  %vm989_vm14 = vcmask 687104   ;;  %vm1058_vm15 = vcmask 678912  }
  0x11   : > { %s6211_s17 = scalar_lea.vmem %s8862_s0, %s5125_s14  ;;  %s6126_s23 = smov 122  }
  0x12   : > { %v6214_v0 = vld [vmem:[%s6211_s17 + $0x10] sm:$0xff]  ;;  %v6217_v1 = vld [vmem:[%s6211_s17] sm:$0xff]  ;;  %v6229_v3 = vld [vmem:[%s6211_s17 + $0x8] sm:$0xff]  ;;  %s6127_s24 = smov 106   ;;  %s6128_s25 = smov 105  }
  0x13   : > { %v6220_v2 = vld [vmem:[%s6211_s17 + $0x20] sm:$0xff]  ;;  %216 = vrot.lane.b32.xlu1 %v6214_v0, %s6121_s18  ;;  %212 = vrot.lane.b32.xlu0 %v6217_v1, %s6121_s18  ;;  %187 = vst [vmem:[#allocation2] sm:$0xff] %v6217_v1  ;;  %v6232_v4 = vld [vmem:[%s6211_s17 + $0x30] sm:$0xff]  ;;  %190 = vst.msk [vmem:[#allocation2 + $0x10] sm:$0xff] %vm189_vm0, %v6214_v0  ;;  %s6129_s26 = smov 104   ;;  %s6130_s27 = smov 103  }
  0x14   : > { %191 = vst [vmem:[#allocation2 + $0x18] sm:$0xff] %v6220_v2  ;;  %188 = vst [vmem:[#allocation2 + $0x8] sm:$0xff] %v6229_v3  ;;  %v6238_v5 = vld [vmem:[%s6211_s17 + $0x28] sm:$0xff]  ;;  %v6244_v7 = vld [vmem:[%s6211_s17 + $0x40] sm:$0xff]  ;;  %v5374_v12 = vpack.c.bf16 %v6220_v2, %v6217_v1  ;;  %s6131_s28 = smov 102   ;;  %s6132_s29 = smov 101  }
  0x15   : > { %v6241_v6 = vld [vmem:[%s6211_s17 + $0x48] sm:$0xff]  ;;  %193 = vst.msk [vmem:[#allocation2 + $0x28] sm:$0xff] %vm189_vm0, %v6232_v4  ;;  %192 = vst [vmem:[#allocation2 + $0x20] sm:$0xff] %v6238_v5  ;;  %v6252_v8 = vld [vmem:[%s6211_s17 + $0x60] sm:$0xff]  ;;  %v5372_v11 = vpack.c.bf16 %v6238_v5, %v6229_v3  ;;  %s6133_s30 = smov 100   ;;  %s6134_s4 = smov 84  }
  0x16   : > { %195 = vst [vmem:[#allocation2 + $0x38] sm:$0xff] %v6241_v6  ;;  %194 = vst [vmem:[#allocation2 + $0x30] sm:$0xff] %v6244_v7  ;;  %v6255_v9 = vld [vmem:[%s6211_s17 + $0x50] sm:$0xff]  ;;  %v6266_v13 = vld [vmem:[%s6211_s17 + $0x68] sm:$0xff]  ;;  %v5378_v15 = vpack.c.bf16 %v6252_v8, %v6244_v7  ;;  %s6135_s5 = smov 83   ;;  %s6136_s6 = smov 82  }
  0x17   : > { %v6258_v10 = vld [vmem:[%s6211_s17 + $0x70] sm:$0xff]  ;;  %197 = vst [vmem:[#allocation2 + $0x48] sm:$0xff] %v6252_v8  ;;  %196 = vst.msk [vmem:[#allocation2 + $0x40] sm:$0xff] %vm189_vm0, %v6255_v9  ;;  %218 = vrot.lane.b32.xlu1 %v6220_v2, %s6121_s18  ;;  %214 = vrot.lane.b32.xlu0 %v6229_v3, %s6121_s18  ;;  %v5376_v14 = vpack.c.bf16 %v6266_v13, %v6241_v6  ;;  %s6137_s9 = smov 81   ;;  %s6138_s10 = smov 80  }
  0x18   : > { %199 = vst.msk [vmem:[#allocation2 + $0x58] sm:$0xff] %vm189_vm0, %v6258_v10  ;;  %198 = vst [vmem:[#allocation2 + $0x50] sm:$0xff] %v6266_v13  ;;  %5373 = vmatprep.subr.bf16.mxu1 %v5372_v11  ;;  %s6139_s11 = smov 79   ;;  %s6140_s16 = smov 78  }
  0x19   : > { %5375 = vmatpush1.bf16.msra.mxu1 %v5374_v12  ;;  %s6147_s7 = smov 56   ;;  %s6149_s14 = smov 39  }
  0x1a   : > { %5377 = vmatprep.subr.bf16.mxu1 %v5376_v14  ;;  %s6150_s15 = smov 38   ;;  %s6176_s8 = smov 86  }
  0x1b   : > { %222 = vrot.lane.b32.xlu1 %v6232_v4, %s6121_s18  ;;  %220 = vrot.lane.b32.xlu0 %v6238_v5, %s6121_s18 }
  0x1d   : > { %5379 = vmatpush1.bf16.msra.mxu1 %v5378_v15 }
  0x1f   : > { %226 = vrot.lane.b32.xlu1 %v6241_v6, %s6121_s18  ;;  %224 = vrot.lane.b32.xlu0 %v6244_v7, %s6121_s18 }
  0x23   : > { %230 = vrot.lane.b32.xlu1 %v6252_v8, %s6121_s18  ;;  %228 = vrot.lane.b32.xlu0 %v6255_v9, %s6121_s18 }
  0x27   : > { %234 = vrot.lane.b32.xlu1 %v6258_v10, %s6121_s18  ;;  %232 = vrot.lane.b32.xlu0 %v6266_v13, %s6121_s18  ;;  %s6141_s18 = smov 62  }
  0x2b   : > { %271 = vrot.lane.b32.xlu1 %v6229_v3, %s6122_s19  ;;  %269 = vrot.lane.b32.xlu0 %v6217_v1, %s6122_s19 }
  0x2f   : > { %275 = vrot.lane.b32.xlu1 %v6220_v2, %s6122_s19  ;;  %273 = vrot.lane.b32.xlu0 %v6214_v0, %s6122_s19 }
  0x33   : > { %279 = vrot.lane.b32.xlu1 %v6232_v4, %s6122_s19  ;;  %277 = vrot.lane.b32.xlu0 %v6238_v5, %s6122_s19 }
  0x37   : > { %283 = vrot.lane.b32.xlu1 %v6241_v6, %s6122_s19  ;;  %281 = vrot.lane.b32.xlu0 %v6244_v7, %s6122_s19 }
  0x3b   : > { %287 = vrot.lane.b32.xlu1 %v6252_v8, %s6122_s19  ;;  %285 = vrot.lane.b32.xlu0 %v6255_v9, %s6122_s19 }
  0x3f   : > { %291 = vrot.lane.b32.xlu1 %v6258_v10, %s6122_s19  ;;  %289 = vrot.lane.b32.xlu0 %v6266_v13, %s6122_s19  ;;  %s6142_s19 = smov 61  }
  0x43   : > { %328 = vrot.lane.b32.xlu1 %v6229_v3, %s6123_s20  ;;  %326 = vrot.lane.b32.xlu0 %v6217_v1, %s6123_s20 }
  0x47   : > { %332 = vrot.lane.b32.xlu1 %v6220_v2, %s6123_s20  ;;  %330 = vrot.lane.b32.xlu0 %v6214_v0, %s6123_s20 }
  0x4b   : > { %336 = vrot.lane.b32.xlu1 %v6232_v4, %s6123_s20  ;;  %334 = vrot.lane.b32.xlu0 %v6238_v5, %s6123_s20 }
  0x4f   : > { %340 = vrot.lane.b32.xlu1 %v6241_v6, %s6123_s20  ;;  %338 = vrot.lane.b32.xlu0 %v6244_v7, %s6123_s20 }
  0x53   : > { %344 = vrot.lane.b32.xlu1 %v6252_v8, %s6123_s20  ;;  %342 = vrot.lane.b32.xlu0 %v6255_v9, %s6123_s20 }
  0x57   : > { %348 = vrot.lane.b32.xlu1 %v6258_v10, %s6123_s20  ;;  %346 = vrot.lane.b32.xlu0 %v6266_v13, %s6123_s20  ;;  %s6143_s20 = smov 60  }
  0x5b   : > { %385 = vrot.lane.b32.xlu1 %v6229_v3, %s6124_s21  ;;  %383 = vrot.lane.b32.xlu0 %v6217_v1, %s6124_s21 }
  0x5f   : > { %389 = vrot.lane.b32.xlu1 %v6220_v2, %s6124_s21  ;;  %387 = vrot.lane.b32.xlu0 %v6214_v0, %s6124_s21 }
  0x63   : > { %393 = vrot.lane.b32.xlu1 %v6232_v4, %s6124_s21  ;;  %391 = vrot.lane.b32.xlu0 %v6238_v5, %s6124_s21 }
  0x67   : > { %397 = vrot.lane.b32.xlu1 %v6241_v6, %s6124_s21  ;;  %395 = vrot.lane.b32.xlu0 %v6244_v7, %s6124_s21 }
  0x6b   : > { %401 = vrot.lane.b32.xlu1 %v6252_v8, %s6124_s21  ;;  %399 = vrot.lane.b32.xlu0 %v6255_v9, %s6124_s21 }
  0x6f   : > { %405 = vrot.lane.b32.xlu1 %v6258_v10, %s6124_s21  ;;  %403 = vrot.lane.b32.xlu0 %v6266_v13, %s6124_s21 }
  0x73   : > { %442 = vrot.lane.b32.xlu1 %v6229_v3, %s6125_s22  ;;  %440 = vrot.lane.b32.xlu0 %v6217_v1, %s6125_s22 }
  0x77   : > { %446 = vrot.lane.b32.xlu1 %v6220_v2, %s6125_s22  ;;  %444 = vrot.lane.b32.xlu0 %v6214_v0, %s6125_s22 }
  0x7b   : > { %450 = vrot.lane.b32.xlu1 %v6232_v4, %s6125_s22  ;;  %448 = vrot.lane.b32.xlu0 %v6238_v5, %s6125_s22 }
  0x7f   : > { %454 = vrot.lane.b32.xlu1 %v6241_v6, %s6125_s22  ;;  %452 = vrot.lane.b32.xlu0 %v6244_v7, %s6125_s22 }
  0x83   : > { %458 = vrot.lane.b32.xlu1 %v6252_v8, %s6125_s22  ;;  %456 = vrot.lane.b32.xlu0 %v6255_v9, %s6125_s22 }
  0x85   : > { %v217_v16 = vpop.permute.xlu1 %216  ;;  %v213_v17 = vpop.permute.xlu0 %212 }
  0x86   : > { %259 = vst.msk [vmem:[#allocation2 + $0x70] sm:$0xff] %vm189_vm0, %v217_v16 }
  0x87   : > { %462 = vrot.lane.b32.xlu1 %v6258_v10, %s6125_s22  ;;  %460 = vrot.lane.b32.xlu0 %v6266_v13, %s6125_s22 }
  0x89   : > { %v219_v18 = vpop.permute.xlu1 %218  ;;  %v215_v19 = vpop.permute.xlu0 %214 }
  0x8a   : > { %v237_v20 = vsel %vm236_vm1, %v213_v17, %v215_v19  ;;  %v238_v21 = vsel %vm236_vm1, %v215_v19, %v217_v16 }
  0x8b   : > { %499 = vrot.lane.b32.xlu1 %v6229_v3, %s6126_s23  ;;  %497 = vrot.lane.b32.xlu0 %v6217_v1, %s6126_s23 }
  0x8d   : > { %v223_v22 = vpop.permute.xlu1 %222  ;;  %v221_v23 = vpop.permute.xlu0 %220 }
  0x8e   : > { %262 = vst.msk [vmem:[#allocation2 + $0x88] sm:$0xff] %vm189_vm0, %v223_v22  ;;  %v239_v24 = vsel %vm236_vm1, %v219_v18, %v221_v23  ;;  %v240_v25 = vsel %vm236_vm1, %v221_v23, %v223_v22 }
  0x8f   : > { %503 = vrot.lane.b32.xlu1 %v6220_v2, %s6126_s23  ;;  %501 = vrot.lane.b32.xlu0 %v6214_v0, %s6126_s23  ;;  %v5380_v26 = vpack.c.bf16 %v240_v25, %v238_v21  ;;  %v5382_v27 = vpack.c.bf16 %v239_v24, %v237_v20 }
  0x91   : > { %v227_v28 = vpop.permute.xlu1 %226  ;;  %v225_v29 = vpop.permute.xlu0 %224  ;;  %5381 = vmatprep.subr.bf16.mxu1 %v5380_v26 }
  0x92   : > { %v241_v30 = vsel %vm236_vm1, %v225_v29, %v227_v28  ;;  %5383 = vmatpush1.bf16.msra.mxu1 %v5382_v27 }
  0x93   : > { %507 = vrot.lane.b32.xlu1 %v6232_v4, %s6126_s23  ;;  %505 = vrot.lane.b32.xlu0 %v6238_v5, %s6126_s23 }
  0x95   : > { %v231_v31 = vpop.permute.xlu1 %230  ;;  %v229_v32 = vpop.permute.xlu0 %228 }
  0x96   : > { %v242_v33 = vsel %vm236_vm1, %v227_v28, %v229_v32  ;;  %265 = vst.msk [vmem:[#allocation2 + $0xa0] sm:$0xff] %vm189_vm0, %v229_v32 }
  0x97   : > { %511 = vrot.lane.b32.xlu1 %v6241_v6, %s6126_s23  ;;  %509 = vrot.lane.b32.xlu0 %v6244_v7, %s6126_s23 }
  0x99   : > { %v235_v34 = vpop.permute.xlu1 %234  ;;  %v233_v35 = vpop.permute.xlu0 %232 }
  0x9a   : > { %268 = vst.msk [vmem:[#allocation2 + $0xb8] sm:$0xff] %vm189_vm0, %v235_v34  ;;  %v243_v36 = vsel %vm236_vm1, %v231_v31, %v233_v35  ;;  %v244_v37 = vsel %vm236_vm1, %v233_v35, %v235_v34  ;;  %vm1127_vm1 = vcmask 670720  }
  0x9b   : > { %515 = vrot.lane.b32.xlu1 %v6252_v8, %s6126_s23  ;;  %513 = vrot.lane.b32.xlu0 %v6255_v9, %s6126_s23  ;;  %v5384_v38 = vpack.c.bf16 %v244_v37, %v242_v33  ;;  %v5386_v39 = vpack.c.bf16 %v243_v36, %v241_v30 }
  0x9d   : > { %v272_v40 = vpop.permute.xlu1 %271  ;;  %v270_v41 = vpop.permute.xlu0 %269  ;;  %5385 = vmatprep.subr.bf16.mxu1 %v5384_v38 }
  0x9e   : > { %v294_v42 = vsel %vm293_vm2, %v270_v41, %v272_v40  ;;  %5387 = vmatpush1.bf16.msra.mxu1 %v5386_v39 }
  0x9f   : > { %519 = vrot.lane.b32.xlu1 %v6258_v10, %s6126_s23  ;;  %517 = vrot.lane.b32.xlu0 %v6266_v13, %s6126_s23 }
  0xa1   : > { %v276_v43 = vpop.permute.xlu1 %275  ;;  %v274_v44 = vpop.permute.xlu0 %273 }
  0xa2   : > { %v295_v45 = vsel %vm293_vm2, %v272_v40, %v274_v44  ;;  %316 = vst.msk [vmem:[#allocation2 + $0xd0] sm:$0xff] %vm189_vm0, %v274_v44 }
  0xa3   : > { %556 = vrot.lane.b32.xlu1 %v6229_v3, %s6127_s24  ;;  %554 = vrot.lane.b32.xlu0 %v6217_v1, %s6127_s24 }
  0xa5   : > { %v280_v46 = vpop.permute.xlu1 %279  ;;  %v278_v47 = vpop.permute.xlu0 %277 }
  0xa6   : > { %319 = vst.msk [vmem:[#allocation2 + $0xe8] sm:$0xff] %vm189_vm0, %v280_v46  ;;  %v296_v48 = vsel %vm293_vm2, %v276_v43, %v278_v47  ;;  %v297_v49 = vsel %vm293_vm2, %v278_v47, %v280_v46 }
  0xa7   : > { %560 = vrot.lane.b32.xlu1 %v6220_v2, %s6127_s24  ;;  %558 = vrot.lane.b32.xlu0 %v6214_v0, %s6127_s24  ;;  %v5388_v50 = vpack.c.bf16 %v297_v49, %v295_v45  ;;  %v5390_v51 = vpack.c.bf16 %v296_v48, %v294_v42 }
  0xa9   : > { %v284_v52 = vpop.permute.xlu1 %283  ;;  %v282_v53 = vpop.permute.xlu0 %281  ;;  %5389 = vmatprep.subr.bf16.mxu1 %v5388_v50 }
  0xaa   : > { %v298_v54 = vsel %vm293_vm2, %v282_v53, %v284_v52  ;;  %5391 = vmatpush1.bf16.msra.mxu1 %v5390_v51 }
  0xab   : > { %564 = vrot.lane.b32.xlu1 %v6232_v4, %s6127_s24  ;;  %562 = vrot.lane.b32.xlu0 %v6238_v5, %s6127_s24 }
  0xad   : > { %v288_v55 = vpop.permute.xlu1 %287  ;;  %v286_v56 = vpop.permute.xlu0 %285 }
  0xae   : > { %v299_v57 = vsel %vm293_vm2, %v284_v52, %v286_v56  ;;  %322 = vst.msk [vmem:[#allocation2 + $0x100] sm:$0xff] %vm189_vm0, %v286_v56 }
  0xaf   : > { %568 = vrot.lane.b32.xlu1 %v6241_v6, %s6127_s24  ;;  %566 = vrot.lane.b32.xlu0 %v6244_v7, %s6127_s24 }
  0xb1   : > { %v292_v58 = vpop.permute.xlu1 %291  ;;  %v290_v59 = vpop.permute.xlu0 %289 }
  0xb2   : > { %325 = vst.msk [vmem:[#allocation2 + $0x118] sm:$0xff] %vm189_vm0, %v292_v58  ;;  %v300_v60 = vsel %vm293_vm2, %v288_v55, %v290_v59  ;;  %v301_v61 = vsel %vm293_vm2, %v290_v59, %v292_v58  ;;  %vm1196_vm2 = vcmask 662528  }
  0xb3   : > { %572 = vrot.lane.b32.xlu1 %v6252_v8, %s6127_s24  ;;  %570 = vrot.lane.b32.xlu0 %v6255_v9, %s6127_s24  ;;  %v5392_v62 = vpack.c.bf16 %v301_v61, %v299_v57  ;;  %v5394_v63 = vpack.c.bf16 %v300_v60, %v298_v54 }
  0xb5   : > { %v329_v11 = vpop.permute.xlu1 %328  ;;  %v327_v12 = vpop.permute.xlu0 %326  ;;  %5393 = vmatprep.subr.bf16.mxu1 %v5392_v62 }
  0xb6   : > { %v351_v14 = vsel %vm350_vm3, %v327_v12, %v329_v11  ;;  %5395 = vmatpush1.bf16.msra.mxu1 %v5394_v63 }
  0xb7   : > { %576 = vrot.lane.b32.xlu1 %v6258_v10, %s6127_s24  ;;  %574 = vrot.lane.b32.xlu0 %v6266_v13, %s6127_s24 }
  0xb9   : > { %v333_v15 = vpop.permute.xlu1 %332  ;;  %v331_v16 = vpop.permute.xlu0 %330 }
  0xba   : > { %v352_v17 = vsel %vm350_vm3, %v329_v11, %v331_v16  ;;  %373 = vst.msk [vmem:[#allocation2 + $0x130] sm:$0xff] %vm189_vm0, %v331_v16 }
  0xbb   : > { %613 = vrot.lane.b32.xlu1 %v6229_v3, %s6128_s25  ;;  %611 = vrot.lane.b32.xlu0 %v6217_v1, %s6128_s25 }
  0xbd   : > { %v337_v18 = vpop.permute.xlu1 %336  ;;  %v335_v19 = vpop.permute.xlu0 %334 }
  0xbe   : > { %376 = vst.msk [vmem:[#allocation2 + $0x148] sm:$0xff] %vm189_vm0, %v337_v18  ;;  %v353_v20 = vsel %vm350_vm3, %v333_v15, %v335_v19  ;;  %v354_v21 = vsel %vm350_vm3, %v335_v19, %v337_v18 }
  0xbf   : > { %617 = vrot.lane.b32.xlu1 %v6220_v2, %s6128_s25  ;;  %615 = vrot.lane.b32.xlu0 %v6214_v0, %s6128_s25  ;;  %v5396_v22 = vpack.c.bf16 %v354_v21, %v352_v17  ;;  %v5398_v23 = vpack.c.bf16 %v353_v20, %v351_v14 }
  0xc1   : > { %v341_v24 = vpop.permute.xlu1 %340  ;;  %v339_v25 = vpop.permute.xlu0 %338  ;;  %5397 = vmatprep.subr.bf16.mxu1 %v5396_v22 }
  0xc2   : > { %v355_v26 = vsel %vm350_vm3, %v339_v25, %v341_v24  ;;  %5399 = vmatpush1.bf16.msra.mxu1 %v5398_v23 }
  0xc3   : > { %621 = vrot.lane.b32.xlu1 %v6232_v4, %s6128_s25  ;;  %619 = vrot.lane.b32.xlu0 %v6238_v5, %s6128_s25 }
  0xc5   : > { %v345_v27 = vpop.permute.xlu1 %344  ;;  %v343_v28 = vpop.permute.xlu0 %342 }
  0xc6   : > { %v356_v29 = vsel %vm350_vm3, %v341_v24, %v343_v28  ;;  %379 = vst.msk [vmem:[#allocation2 + $0x160] sm:$0xff] %vm189_vm0, %v343_v28 }
  0xc7   : > { %625 = vrot.lane.b32.xlu1 %v6241_v6, %s6128_s25  ;;  %623 = vrot.lane.b32.xlu0 %v6244_v7, %s6128_s25 }
  0xc9   : > { %v349_v30 = vpop.permute.xlu1 %348  ;;  %v347_v31 = vpop.permute.xlu0 %346 }
  0xca   : > { %382 = vst.msk [vmem:[#allocation2 + $0x178] sm:$0xff] %vm189_vm0, %v349_v30  ;;  %v357_v32 = vsel %vm350_vm3, %v345_v27, %v347_v31  ;;  %v358_v33 = vsel %vm350_vm3, %v347_v31, %v349_v30  ;;  %vm1265_vm3 = vcmask 654336  }
  0xcb   : > { %629 = vrot.lane.b32.xlu1 %v6252_v8, %s6128_s25  ;;  %627 = vrot.lane.b32.xlu0 %v6255_v9, %s6128_s25  ;;  %v5400_v34 = vpack.c.bf16 %v358_v33, %v356_v29  ;;  %v5402_v35 = vpack.c.bf16 %v357_v32, %v355_v26 }
  0xcd   : > { %v386_v36 = vpop.permute.xlu1 %385  ;;  %v384_v37 = vpop.permute.xlu0 %383  ;;  %5401 = vmatprep.subr.bf16.mxu1 %v5400_v34 }
  0xce   : > { %v408_v38 = vsel %vm407_vm4, %v384_v37, %v386_v36  ;;  %5403 = vmatpush1.bf16.msra.mxu1 %v5402_v35 }
  0xcf   : > { %633 = vrot.lane.b32.xlu1 %v6258_v10, %s6128_s25  ;;  %631 = vrot.lane.b32.xlu0 %v6266_v13, %s6128_s25  ;;  %s6151_s25 = smov 118  }
  0xd1   : > { %v390_v39 = vpop.permute.xlu1 %389  ;;  %v6478_v40 = vpop.permute.xlu0 %387 }
  0xd2   : > { %v409_v41 = vsel %vm407_vm4, %v386_v36, %v6478_v40  ;;  %430 = vst.msk [vmem:[#allocation2 + $0x190] sm:$0xff] %vm189_vm0, %v6478_v40 }
  0xd3   : > { %2909 = vst [vmem:[#allocation2 + $0xfc0] sm:$0xff] %v409_v41  ;;  %670 = vrot.lane.b32.xlu1 %v6229_v3, %s6129_s26  ;;  %668 = vrot.lane.b32.xlu0 %v6217_v1, %s6129_s26 }
  0xd5   : > { %v6488_v42 = vpop.permute.xlu1 %393  ;;  %v392_v43 = vpop.permute.xlu0 %391 }
  0xd6   : > { %433 = vst.msk [vmem:[#allocation2 + $0x1a8] sm:$0xff] %vm189_vm0, %v6488_v42  ;;  %v410_v44 = vsel %vm407_vm4, %v390_v39, %v392_v43  ;;  %v411_v45 = vsel %vm407_vm4, %v392_v43, %v6488_v42 }
  0xd7   : > { %2912 = vst [vmem:[#allocation2 + $0xfd8] sm:$0xff] %v411_v45  ;;  %674 = vrot.lane.b32.xlu1 %v6220_v2, %s6129_s26  ;;  %672 = vrot.lane.b32.xlu0 %v6214_v0, %s6129_s26  ;;  %v5404_v46 = vpack.c.bf16 %v411_v45, %v409_v41  ;;  %v5406_v47 = vpack.c.bf16 %v410_v44, %v408_v38 }
  0xd9   : > { %v398_v48 = vpop.permute.xlu1 %397  ;;  %v396_v49 = vpop.permute.xlu0 %395  ;;  %5405 = vmatprep.subr.bf16.mxu1 %v5404_v46 }
  0xda   : > { %v412_v50 = vsel %vm407_vm4, %v396_v49, %v398_v48  ;;  %5407 = vmatpush1.bf16.msra.mxu1 %v5406_v47 }
  0xdb   : > { %678 = vrot.lane.b32.xlu1 %v6232_v4, %s6129_s26  ;;  %676 = vrot.lane.b32.xlu0 %v6238_v5, %s6129_s26 }
  0xdd   : > { %v402_v51 = vpop.permute.xlu1 %401  ;;  %v6504_v52 = vpop.permute.xlu0 %399 }
  0xde   : > { %v413_v53 = vsel %vm407_vm4, %v398_v48, %v6504_v52  ;;  %436 = vst.msk [vmem:[#allocation2 + $0x1c0] sm:$0xff] %vm189_vm0, %v6504_v52 }
  0xdf   : > { %2915 = vst [vmem:[#allocation2 + $0xff0] sm:$0xff] %v413_v53  ;;  %682 = vrot.lane.b32.xlu1 %v6241_v6, %s6129_s26  ;;  %680 = vrot.lane.b32.xlu0 %v6244_v7, %s6129_s26 }
  0xe1   : > { %v6514_v54 = vpop.permute.xlu1 %405  ;;  %v404_v55 = vpop.permute.xlu0 %403 }
  0xe2   : > { %439 = vst.msk [vmem:[#allocation2 + $0x1d8] sm:$0xff] %vm189_vm0, %v6514_v54  ;;  %v414_v56 = vsel %vm407_vm4, %v402_v51, %v404_v55  ;;  %v415_v57 = vsel %vm407_vm4, %v404_v55, %v6514_v54 }
  0xe3   : > { %2918 = vst [vmem:[#allocation2 + $0x1008] sm:$0xff] %v415_v57  ;;  %686 = vrot.lane.b32.xlu1 %v6252_v8, %s6129_s26  ;;  %684 = vrot.lane.b32.xlu0 %v6255_v9, %s6129_s26  ;;  %v5408_v58 = vpack.c.bf16 %v415_v57, %v413_v53  ;;  %v5410_v59 = vpack.c.bf16 %v414_v56, %v412_v50 }
  0xe5   : > { %v443_v60 = vpop.permute.xlu1 %442  ;;  %v441_v61 = vpop.permute.xlu0 %440  ;;  %5409 = vmatprep.subr.bf16.mxu1 %v5408_v58 }
  0xe6   : > { %v465_v62 = vsel %vm464_vm5, %v441_v61, %v443_v60  ;;  %5411 = vmatpush1.bf16.msra.mxu1 %v5410_v59 }
  0xe7   : > { %690 = vrot.lane.b32.xlu1 %v6258_v10, %s6129_s26  ;;  %688 = vrot.lane.b32.xlu0 %v6266_v13, %s6129_s26 }
  0xe9   : > { %v447_v63 = vpop.permute.xlu1 %446  ;;  %v6530_v11 = vpop.permute.xlu0 %444 }
  0xea   : > { %v466_v12 = vsel %vm464_vm5, %v443_v60, %v6530_v11  ;;  %487 = vst.msk [vmem:[#allocation2 + $0x1f0] sm:$0xff] %vm189_vm0, %v6530_v11 }
  0xeb   : > { %2941 = vst [vmem:[#allocation2 + $0x1020] sm:$0xff] %v466_v12  ;;  %727 = vrot.lane.b32.xlu1 %v6229_v3, %s6130_s27  ;;  %725 = vrot.lane.b32.xlu0 %v6217_v1, %s6130_s27 }
  0xed   : > { %v6540_v14 = vpop.permute.xlu1 %450  ;;  %v449_v15 = vpop.permute.xlu0 %448 }
  0xee   : > { %490 = vst.msk [vmem:[#allocation2 + $0x208] sm:$0xff] %vm189_vm0, %v6540_v14  ;;  %v467_v16 = vsel %vm464_vm5, %v447_v63, %v449_v15  ;;  %v468_v17 = vsel %vm464_vm5, %v449_v15, %v6540_v14 }
  0xef   : > { %2944 = vst [vmem:[#allocation2 + $0x1038] sm:$0xff] %v468_v17  ;;  %731 = vrot.lane.b32.xlu1 %v6220_v2, %s6130_s27  ;;  %729 = vrot.lane.b32.xlu0 %v6214_v0, %s6130_s27  ;;  %v5412_v18 = vpack.c.bf16 %v468_v17, %v466_v12  ;;  %v5414_v19 = vpack.c.bf16 %v467_v16, %v465_v62 }
  0xf1   : > { %v455_v20 = vpop.permute.xlu1 %454  ;;  %v453_v21 = vpop.permute.xlu0 %452  ;;  %5413 = vmatprep.subr.bf16.mxu1 %v5412_v18 }
  0xf2   : > { %v469_v22 = vsel %vm464_vm5, %v453_v21, %v455_v20  ;;  %5415 = vmatpush1.bf16.msra.mxu1 %v5414_v19 }
  0xf3   : > { %735 = vrot.lane.b32.xlu1 %v6232_v4, %s6130_s27  ;;  %733 = vrot.lane.b32.xlu0 %v6238_v5, %s6130_s27 }
  0xf5   : > { %v459_v23 = vpop.permute.xlu1 %458  ;;  %v6556_v24 = vpop.permute.xlu0 %456 }
  0xf6   : > { %v470_v25 = vsel %vm464_vm5, %v455_v20, %v6556_v24  ;;  %493 = vst.msk [vmem:[#allocation2 + $0x220] sm:$0xff] %vm189_vm0, %v6556_v24 }
  0xf7   : > { %2947 = vst [vmem:[#allocation2 + $0x1050] sm:$0xff] %v470_v25  ;;  %739 = vrot.lane.b32.xlu1 %v6241_v6, %s6130_s27  ;;  %737 = vrot.lane.b32.xlu0 %v6244_v7, %s6130_s27 }
  0xf9   : > { %v6566_v26 = vpop.permute.xlu1 %462  ;;  %v461_v27 = vpop.permute.xlu0 %460 }
  0xfa   : > { %496 = vst.msk [vmem:[#allocation2 + $0x238] sm:$0xff] %vm189_vm0, %v6566_v26  ;;  %v471_v28 = vsel %vm464_vm5, %v459_v23, %v461_v27  ;;  %v472_v29 = vsel %vm464_vm5, %v461_v27, %v6566_v26 }
  0xfb   : > { %2950 = vst [vmem:[#allocation2 + $0x1068] sm:$0xff] %v472_v29  ;;  %743 = vrot.lane.b32.xlu1 %v6252_v8, %s6130_s27  ;;  %741 = vrot.lane.b32.xlu0 %v6255_v9, %s6130_s27  ;;  %v5416_v30 = vpack.c.bf16 %v472_v29, %v470_v25  ;;  %v5418_v31 = vpack.c.bf16 %v471_v28, %v469_v22 }
  0xfd   : > { %v500_v32 = vpop.permute.xlu1 %499  ;;  %v498_v33 = vpop.permute.xlu0 %497  ;;  %5417 = vmatprep.subr.bf16.mxu1 %v5416_v30 }
  0xfe   : > { %v522_v34 = vsel %vm521_vm6, %v498_v33, %v500_v32  ;;  %5419 = vmatpush1.bf16.msra.mxu1 %v5418_v31 }
  0xff   : > { %747 = vrot.lane.b32.xlu1 %v6258_v10, %s6130_s27  ;;  %745 = vrot.lane.b32.xlu0 %v6266_v13, %s6130_s27 }
 0x101   : > { %v504_v35 = vpop.permute.xlu1 %503  ;;  %v6582_v36 = vpop.permute.xlu0 %501 }
 0x102   : > { %v523_v37 = vsel %vm521_vm6, %v500_v32, %v6582_v36  ;;  %544 = vst.msk [vmem:[#allocation2 + $0x250] sm:$0xff] %vm189_vm0, %v6582_v36 }
 0x103   : > { %2973 = vst [vmem:[#allocation2 + $0x1080] sm:$0xff] %v523_v37  ;;  %784 = vrot.lane.b32.xlu1 %v6229_v3, %s6131_s28  ;;  %782 = vrot.lane.b32.xlu0 %v6217_v1, %s6131_s28 }
 0x105   : > { %v6592_v38 = vpop.permute.xlu1 %507  ;;  %v506_v39 = vpop.permute.xlu0 %505 }
 0x106   : > { %547 = vst.msk [vmem:[#allocation2 + $0x268] sm:$0xff] %vm189_vm0, %v6592_v38  ;;  %v524_v41 = vsel %vm521_vm6, %v504_v35, %v506_v39  ;;  %v525_v43 = vsel %vm521_vm6, %v506_v39, %v6592_v38 }
 0x107   : > { %2976 = vst [vmem:[#allocation2 + $0x1098] sm:$0xff] %v525_v43  ;;  %788 = vrot.lane.b32.xlu1 %v6220_v2, %s6131_s28  ;;  %786 = vrot.lane.b32.xlu0 %v6214_v0, %s6131_s28  ;;  %v5420_v44 = vpack.c.bf16 %v525_v43, %v523_v37  ;;  %v5422_v45 = vpack.c.bf16 %v524_v41, %v522_v34 }
 0x109   : > { %v512_v46 = vpop.permute.xlu1 %511  ;;  %v510_v47 = vpop.permute.xlu0 %509  ;;  %5421 = vmatprep.subr.bf16.mxu1 %v5420_v44 }
 0x10a   : > { %v526_v48 = vsel %vm521_vm6, %v510_v47, %v512_v46  ;;  %5423 = vmatpush1.bf16.msra.mxu1 %v5422_v45 }
 0x10b   : > { %792 = vrot.lane.b32.xlu1 %v6232_v4, %s6131_s28  ;;  %790 = vrot.lane.b32.xlu0 %v6238_v5, %s6131_s28 }
 0x10d   : > { %v516_v49 = vpop.permute.xlu1 %515  ;;  %v6608_v50 = vpop.permute.xlu0 %513 }
 0x10e   : > { %8870 = vst [vmem:[#allocation3_spill] sm:$0xff] %v6608_v50  ;;  %v527_v51 = vsel %vm521_vm6, %v512_v46, %v6608_v50  ;;  %550 = vst.msk [vmem:[#allocation2 + $0x280] sm:$0xff] %vm189_vm0, %v6608_v50 }
 0x10f   : > { %2979 = vst [vmem:[#allocation2 + $0x10b0] sm:$0xff] %v527_v51  ;;  %796 = vrot.lane.b32.xlu1 %v6241_v6, %s6131_s28  ;;  %794 = vrot.lane.b32.xlu0 %v6244_v7, %s6131_s28 }
 0x111   : > { %v6618_v53 = vpop.permute.xlu1 %519  ;;  %v518_v55 = vpop.permute.xlu0 %517 }
 0x112   : > { %8871 = vst [vmem:[#allocation4_spill] sm:$0xff] %v6618_v53  ;;  %553 = vst.msk [vmem:[#allocation2 + $0x298] sm:$0xff] %vm189_vm0, %v6618_v53  ;;  %v528_v56 = vsel %vm521_vm6, %v516_v49, %v518_v55  ;;  %v529_v57 = vsel %vm521_vm6, %v518_v55, %v6618_v53 }
 0x113   : > { %2982 = vst [vmem:[#allocation2 + $0x10c8] sm:$0xff] %v529_v57  ;;  %800 = vrot.lane.b32.xlu1 %v6252_v8, %s6131_s28  ;;  %798 = vrot.lane.b32.xlu0 %v6255_v9, %s6131_s28  ;;  %v5424_v58 = vpack.c.bf16 %v529_v57, %v527_v51  ;;  %v5426_v59 = vpack.c.bf16 %v528_v56, %v526_v48 }
 0x115   : > { %v557_v60 = vpop.permute.xlu1 %556  ;;  %v555_v61 = vpop.permute.xlu0 %554  ;;  %5425 = vmatprep.subr.bf16.mxu1 %v5424_v58 }
 0x116   : > { %v579_v62 = vsel %vm578_vm7, %v555_v61, %v557_v60  ;;  %5427 = vmatpush1.bf16.msra.mxu1 %v5426_v59 }
 0x117   : > { %804 = vrot.lane.b32.xlu1 %v6258_v10, %s6131_s28  ;;  %802 = vrot.lane.b32.xlu0 %v6266_v13, %s6131_s28 }
 0x119   : > { %v561_v63 = vpop.permute.xlu1 %560  ;;  %v559_v12 = vpop.permute.xlu0 %558 }
 0x11a   : > { %v580_v15 = vsel %vm578_vm7, %v557_v60, %v559_v12  ;;  %601 = vst.msk [vmem:[#allocation2 + $0x2b0] sm:$0xff] %vm189_vm0, %v559_v12  ;;  %v6704_v12 = vld [vmem:[#allocation2 + $0x50] sm:$0xff] }
 0x11b   : > { %841 = vrot.lane.b32.xlu1 %v6229_v3, %s6132_s29  ;;  %839 = vrot.lane.b32.xlu0 %v6217_v1, %s6132_s29 }
 0x11d   : > { %v565_v16 = vpop.permute.xlu1 %564  ;;  %v563_v17 = vpop.permute.xlu0 %562 }
 0x11e   : > { %604 = vst.msk [vmem:[#allocation2 + $0x2c8] sm:$0xff] %vm189_vm0, %v565_v16  ;;  %v581_v18 = vsel %vm578_vm7, %v561_v63, %v563_v17  ;;  %v582_v19 = vsel %vm578_vm7, %v563_v17, %v565_v16  ;;  %v6710_v17 = vld [vmem:[#allocation2 + $0x8] sm:$0xff] }
 0x11f   : > { %845 = vrot.lane.b32.xlu1 %v6220_v2, %s6132_s29  ;;  %843 = vrot.lane.b32.xlu0 %v6214_v0, %s6132_s29  ;;  %v5428_v20 = vpack.c.bf16 %v582_v19, %v580_v15  ;;  %v5430_v21 = vpack.c.bf16 %v581_v18, %v579_v62  ;;  %v6714_v18 = vld [vmem:[#allocation2] sm:$0xff]  ;;  %v6719_v19 = vld [vmem:[%s6211_s17 + $0x18] sm:$0xff] }
 0x121   : > { %v569_v22 = vpop.permute.xlu1 %568  ;;  %v567_v23 = vpop.permute.xlu0 %566  ;;  %5429 = vmatprep.subr.bf16.mxu1 %v5428_v20 }
 0x122   : > { %v583_v25 = vsel %vm578_vm7, %v567_v23, %v569_v22  ;;  %5431 = vmatpush1.bf16.msra.mxu1 %v5430_v21 }
 0x123   : > { %849 = vrot.lane.b32.xlu1 %v6232_v4, %s6132_s29  ;;  %847 = vrot.lane.b32.xlu0 %v6238_v5, %s6132_s29 }
 0x125   : > { %v573_v27 = vpop.permute.xlu1 %572  ;;  %v571_v28 = vpop.permute.xlu0 %570 }
 0x126   : > { %v584_v29 = vsel %vm578_vm7, %v569_v22, %v571_v28  ;;  %607 = vst.msk [vmem:[#allocation2 + $0x2e0] sm:$0xff] %vm189_vm0, %v571_v28 }
 0x127   : > { %853 = vrot.lane.b32.xlu1 %v6241_v6, %s6132_s29  ;;  %851 = vrot.lane.b32.xlu0 %v6244_v7, %s6132_s29 }
 0x129   : > { %v577_v30 = vpop.permute.xlu1 %576  ;;  %v575_v31 = vpop.permute.xlu0 %574 }
 0x12a   : > { %610 = vst.msk [vmem:[#allocation2 + $0x2f8] sm:$0xff] %vm189_vm0, %v577_v30  ;;  %v585_v32 = vsel %vm578_vm7, %v573_v27, %v575_v31  ;;  %v586_v33 = vsel %vm578_vm7, %v575_v31, %v577_v30  ;;  %v6729_v31 = vld [vmem:[#allocation2 + $0x20] sm:$0xff]  ;;  %vm1334_vm7 = vcmask 646144  }
 0x12b   : > { %857 = vrot.lane.b32.xlu1 %v6252_v8, %s6132_s29  ;;  %855 = vrot.lane.b32.xlu0 %v6255_v9, %s6132_s29  ;;  %v5432_v34 = vpack.c.bf16 %v586_v33, %v584_v29  ;;  %v5434_v35 = vpack.c.bf16 %v585_v32, %v583_v25  ;;  %v6733_v32 = vld [vmem:[#allocation2 + $0x18] sm:$0xff] }
 0x12c   : > { %v6738_v33 = vld [vmem:[%s6211_s17 + $0x38] sm:$0xff] }
 0x12d   : > { %v614_v37 = vpop.permute.xlu1 %613  ;;  %v612_v39 = vpop.permute.xlu0 %611  ;;  %5433 = vmatprep.subr.bf16.mxu1 %v5432_v34 }
 0x12e   : > { %v636_v41 = vsel %vm635_vm8, %v612_v39, %v614_v37  ;;  %5435 = vmatpush1.bf16.msra.mxu1 %v5434_v35 }
 0x12f   : > { %861 = vrot.lane.b32.xlu1 %v6258_v10, %s6132_s29  ;;  %859 = vrot.lane.b32.xlu0 %v6266_v13, %s6132_s29  ;;  %s6144_s29 = smov 59  }
 0x131   : > { %v618_v43 = vpop.permute.xlu1 %617  ;;  %v616_v44 = vpop.permute.xlu0 %615 }
 0x132   : > { %v637_v45 = vsel %vm635_vm8, %v614_v37, %v616_v44  ;;  %658 = vst.msk [vmem:[#allocation2 + $0x310] sm:$0xff] %vm189_vm0, %v616_v44 }
 0x133   : > { %898 = vrot.lane.b32.xlu1 %v6229_v3, %s6133_s30  ;;  %896 = vrot.lane.b32.xlu0 %v6217_v1, %s6133_s30 }
 0x135   : > { %v622_v46 = vpop.permute.xlu1 %621  ;;  %v620_v47 = vpop.permute.xlu0 %619 }
 0x136   : > { %661 = vst.msk [vmem:[#allocation2 + $0x328] sm:$0xff] %vm189_vm0, %v622_v46  ;;  %v638_v48 = vsel %vm635_vm8, %v618_v43, %v620_v47  ;;  %v639_v13 = vsel %vm635_vm8, %v620_v47, %v622_v46  ;;  %v6753_v46 = vld [vmem:[#allocation2 + $0x30] sm:$0xff] }
 0x137   : > { %902 = vrot.lane.b32.xlu1 %v6220_v2, %s6133_s30  ;;  %900 = vrot.lane.b32.xlu0 %v6214_v0, %s6133_s30  ;;  %v5436_v49 = vpack.c.bf16 %v639_v13, %v637_v45  ;;  %v5438_v51 = vpack.c.bf16 %v638_v48, %v636_v41  ;;  %v6749_v45 = vld [vmem:[#allocation2 + $0x38] sm:$0xff] }
 0x138   : > { %v6758_v13 = vld [vmem:[%s6211_s17 + $0x58] sm:$0xff] }
 0x139   : > { %v626_v3 = vpop.permute.xlu1 %625  ;;  %v624_v55 = vpop.permute.xlu0 %623  ;;  %5437 = vmatprep.subr.bf16.mxu0 %v5436_v49 }
 0x13a   : > { %v640_v1 = vsel %vm635_vm8, %v624_v55, %v626_v3  ;;  %5439 = vmatpush1.bf16.msra.mxu0 %v5438_v51 }
 0x13b   : > { %906 = vrot.lane.b32.xlu1 %v6232_v4, %s6133_s30  ;;  %904 = vrot.lane.b32.xlu0 %v6238_v5, %s6133_s30 }
 0x13d   : > { %v630_v56 = vpop.permute.xlu1 %629  ;;  %v628_v57 = vpop.permute.xlu0 %627 }
 0x13e   : > { %v641_v2 = vsel %vm635_vm8, %v626_v3, %v628_v57  ;;  %664 = vst.msk [vmem:[#allocation2 + $0x340] sm:$0xff] %vm189_vm0, %v628_v57  ;;  %v6769_v57 = vld [vmem:[#allocation2 + $0x48] sm:$0xff] }
 0x13f   : > { %910 = vrot.lane.b32.xlu1 %v6241_v6, %s6133_s30  ;;  %908 = vrot.lane.b32.xlu0 %v6244_v7, %s6133_s30 }
 0x141   : > { %v634_v58 = vpop.permute.xlu1 %633  ;;  %v632_v59 = vpop.permute.xlu0 %631 }
 0x142   : > { %667 = vst.msk [vmem:[#allocation2 + $0x358] sm:$0xff] %vm189_vm0, %v634_v58  ;;  %v642_v60 = vsel %vm635_vm8, %v630_v56, %v632_v59  ;;  %v643_v5 = vsel %vm635_vm8, %v632_v59, %v634_v58  ;;  %vm1403_vm8 = vcmask 637952  }
 0x143   : > { %914 = vrot.lane.b32.xlu1 %v6252_v8, %s6133_s30  ;;  %912 = vrot.lane.b32.xlu0 %v6255_v9, %s6133_s30  ;;  %v5440_v61 = vpack.c.bf16 %v643_v5, %v641_v2  ;;  %v5442_v6 = vpack.c.bf16 %v642_v60, %v640_v1  ;;  %v6774_v2 = vld [vmem:[%s6211_s17 + $0x78] sm:$0xff] }
 0x145   : > { %v671_v62 = vpop.permute.xlu1 %670  ;;  %v669_v63 = vpop.permute.xlu0 %668  ;;  %5441 = vmatprep.subr.bf16.mxu0 %v5440_v61 }
 0x146   : > { %v693_v7 = vsel %vm692_vm9, %v669_v63, %v671_v62  ;;  %5443 = vmatpush1.bf16.msra.mxu0 %v5442_v6 }
 0x147   : > { %918 = vrot.lane.b32.xlu1 %v6258_v10, %s6133_s30  ;;  %916 = vrot.lane.b32.xlu0 %v6704_v12, %s6133_s30  ;;  %s6158_s30 = smov 17  }
 0x149   : > { %v675_v8 = vpop.permute.xlu1 %674  ;;  %v673_v15 = vpop.permute.xlu0 %672 }
 0x14a   : > { %v694_v16 = vsel %vm692_vm9, %v671_v62, %v673_v15  ;;  %715 = vst.msk [vmem:[#allocation2 + $0x370] sm:$0xff] %vm189_vm0, %v673_v15 }
 0x14b   : > { %959 = vrot.lane.b32.xlu1 %v6710_v17, %s6134_s4  ;;  %957 = vrot.lane.b32.xlu0 %v6714_v18, %s6134_s4 }
 0x14d   : > { %v679_v20 = vpop.permute.xlu1 %678  ;;  %v677_v21 = vpop.permute.xlu0 %676 }
 0x14e   : > { %718 = vst.msk [vmem:[#allocation2 + $0x388] sm:$0xff] %vm189_vm0, %v679_v20  ;;  %v695_v22 = vsel %vm692_vm9, %v675_v8, %v677_v21  ;;  %v696_v23 = vsel %vm692_vm9, %v677_v21, %v679_v20 }
 0x14f   : > { %963 = vrot.lane.b32.xlu1 %v6719_v19, %s6134_s4  ;;  %961 = vrot.lane.b32.xlu0 %v6214_v0, %s6134_s4  ;;  %v5444_v25 = vpack.c.bf16 %v696_v23, %v694_v16  ;;  %v5446_v27 = vpack.c.bf16 %v695_v22, %v693_v7 }
 0x151   : > { %v683_v28 = vpop.permute.xlu1 %682  ;;  %v681_v29 = vpop.permute.xlu0 %680  ;;  %5445 = vmatprep.subr.bf16.mxu0 %v5444_v25 }
 0x152   : > { %v697_v30 = vsel %vm692_vm9, %v681_v29, %v683_v28  ;;  %5447 = vmatpush1.bf16.msra.mxu0 %v5446_v27 }
 0x153   : > { %967 = vrot.lane.b32.xlu1 %v6729_v31, %s6134_s4  ;;  %965 = vrot.lane.b32.xlu0 %v6733_v32, %s6134_s4 }
 0x155   : > { %v687_v34 = vpop.permute.xlu1 %686  ;;  %v685_v35 = vpop.permute.xlu0 %684 }
 0x156   : > { %v698_v37 = vsel %vm692_vm9, %v683_v28, %v685_v35  ;;  %721 = vst.msk [vmem:[#allocation2 + $0x3a0] sm:$0xff] %vm189_vm0, %v685_v35 }
 0x157   : > { %971 = vrot.lane.b32.xlu1 %v6738_v33, %s6134_s4  ;;  %969 = vrot.lane.b32.xlu0 %v6232_v4, %s6134_s4 }
 0x159   : > { %v691_v39 = vpop.permute.xlu1 %690  ;;  %v689_v41 = vpop.permute.xlu0 %688 }
 0x15a   : > { %724 = vst.msk [vmem:[#allocation2 + $0x3b8] sm:$0xff] %vm189_vm0, %v691_v39  ;;  %v699_v43 = vsel %vm692_vm9, %v687_v34, %v689_v41  ;;  %v700_v44 = vsel %vm692_vm9, %v689_v41, %v691_v39  ;;  %vm1472_vm9 = vcmask 506880  }
 0x15b   : > { %975 = vrot.lane.b32.xlu1 %v6749_v45, %s6134_s4  ;;  %973 = vrot.lane.b32.xlu0 %v6753_v46, %s6134_s4  ;;  %v5448_v47 = vpack.c.bf16 %v700_v44, %v698_v37  ;;  %v5450_v48 = vpack.c.bf16 %v699_v43, %v697_v30 }
 0x15d   : > { %v728_v49 = vpop.permute.xlu1 %727  ;;  %v726_v51 = vpop.permute.xlu0 %725  ;;  %5449 = vmatprep.subr.bf16.mxu0 %v5448_v47 }
 0x15e   : > { %v750_v3 = vsel %vm749_vm10, %v726_v51, %v728_v49  ;;  %5451 = vmatpush1.bf16.msra.mxu0 %v5450_v48 }
 0x15f   : > { %979 = vrot.lane.b32.xlu1 %v6758_v13, %s6134_s4  ;;  %977 = vrot.lane.b32.xlu0 %v6255_v9, %s6134_s4 }
 0x161   : > { %v732_v55 = vpop.permute.xlu1 %731  ;;  %v730_v1 = vpop.permute.xlu0 %729 }
 0x162   : > { %v751_v56 = vsel %vm749_vm10, %v728_v49, %v730_v1  ;;  %772 = vst.msk [vmem:[#allocation2 + $0x3d0] sm:$0xff] %vm189_vm0, %v730_v1 }
 0x163   : > { %983 = vrot.lane.b32.xlu1 %v6704_v12, %s6134_s4  ;;  %981 = vrot.lane.b32.xlu0 %v6769_v57, %s6134_s4 }
 0x165   : > { %v736_v58 = vpop.permute.xlu1 %735  ;;  %v734_v59 = vpop.permute.xlu0 %733 }
 0x166   : > { %775 = vst.msk [vmem:[#allocation2 + $0x3e8] sm:$0xff] %vm189_vm0, %v736_v58  ;;  %v752_v60 = vsel %vm749_vm10, %v732_v55, %v734_v59  ;;  %v753_v5 = vsel %vm749_vm10, %v734_v59, %v736_v58 }
 0x167   : > { %987 = vrot.lane.b32.xlu1 %v6774_v2, %s6134_s4  ;;  %985 = vrot.lane.b32.xlu0 %v6258_v10, %s6134_s4  ;;  %v5452_v61 = vpack.c.bf16 %v753_v5, %v751_v56  ;;  %v5454_v6 = vpack.c.bf16 %v752_v60, %v750_v3  ;;  %s6153_s4 = smov 37  }
 0x169   : > { %v740_v62 = vpop.permute.xlu1 %739  ;;  %v738_v63 = vpop.permute.xlu0 %737  ;;  %5453 = vmatprep.subr.bf16.mxu0 %v5452_v61 }
 0x16a   : > { %v754_v7 = vsel %vm749_vm10, %v738_v63, %v740_v62  ;;  %5455 = vmatpush1.bf16.msra.mxu0 %v5454_v6 }
 0x16b   : > { %1028 = vrot.lane.b32.xlu1 %v6710_v17, %s6135_s5  ;;  %1026 = vrot.lane.b32.xlu0 %v6714_v18, %s6135_s5 }
 0x16d   : > { %v744_v8 = vpop.permute.xlu1 %743  ;;  %v742_v15 = vpop.permute.xlu0 %741 }
 0x16e   : > { %v755_v16 = vsel %vm749_vm10, %v740_v62, %v742_v15  ;;  %778 = vst.msk [vmem:[#allocation2 + $0x400] sm:$0xff] %vm189_vm0, %v742_v15  ;;  %v3216_v62 = vld [vmem:[%s8863_s1 + $0x18] sm:$0xff] }
 0x16f   : > { %1032 = vrot.lane.b32.xlu1 %v6719_v19, %s6135_s5  ;;  %1030 = vrot.lane.b32.xlu0 %v6214_v0, %s6135_s5 }
 0x170   : > { %3975 = vmatprep.mubr.f32.mxu0 %v3216_v62 }
 0x171   : > { %v748_v20 = vpop.permute.xlu1 %747  ;;  %v746_v21 = vpop.permute.xlu0 %745 }
 0x172   : > { %781 = vst.msk [vmem:[#allocation2 + $0x418] sm:$0xff] %vm189_vm0, %v748_v20  ;;  %v756_v22 = vsel %vm749_vm10, %v744_v8, %v746_v21  ;;  %v757_v23 = vsel %vm749_vm10, %v746_v21, %v748_v20  ;;  %vm1541_vm10 = vcmask 498688  }
 0x173   : > { %1036 = vrot.lane.b32.xlu1 %v6729_v31, %s6135_s5  ;;  %1034 = vrot.lane.b32.xlu0 %v6733_v32, %s6135_s5  ;;  %v5456_v25 = vpack.c.bf16 %v757_v23, %v755_v16  ;;  %v5458_v27 = vpack.c.bf16 %v756_v22, %v754_v7 }
 0x175   : > { %v785_v28 = vpop.permute.xlu1 %784  ;;  %v783_v29 = vpop.permute.xlu0 %782  ;;  %5457 = vmatprep.subr.bf16.mxu0 %v5456_v25 }
 0x176   : > { %v807_v30 = vsel %vm806_vm11, %v783_v29, %v785_v28  ;;  %5459 = vmatpush1.bf16.msra.mxu0 %v5458_v27 }
 0x177   : > { %1040 = vrot.lane.b32.xlu1 %v6738_v33, %s6135_s5  ;;  %1038 = vrot.lane.b32.xlu0 %v6232_v4, %s6135_s5 }
 0x179   : > { %v789_v34 = vpop.permute.xlu1 %788  ;;  %v787_v35 = vpop.permute.xlu0 %786 }
 0x17a   : > { %v808_v37 = vsel %vm806_vm11, %v785_v28, %v787_v35  ;;  %829 = vst.msk [vmem:[#allocation2 + $0x430] sm:$0xff] %vm189_vm0, %v787_v35 }
 0x17b   : > { %1044 = vrot.lane.b32.xlu1 %v6749_v45, %s6135_s5  ;;  %1042 = vrot.lane.b32.xlu0 %v6753_v46, %s6135_s5 }
 0x17d   : > { %v793_v39 = vpop.permute.xlu1 %792  ;;  %v791_v41 = vpop.permute.xlu0 %790 }
 0x17e   : > { %832 = vst.msk [vmem:[#allocation2 + $0x448] sm:$0xff] %vm189_vm0, %v793_v39  ;;  %v809_v43 = vsel %vm806_vm11, %v789_v34, %v791_v41  ;;  %v810_v44 = vsel %vm806_vm11, %v791_v41, %v793_v39 }
 0x17f   : > { %1048 = vrot.lane.b32.xlu1 %v6758_v13, %s6135_s5  ;;  %1046 = vrot.lane.b32.xlu0 %v6255_v9, %s6135_s5  ;;  %v5460_v47 = vpack.c.bf16 %v810_v44, %v808_v37  ;;  %v5462_v48 = vpack.c.bf16 %v809_v43, %v807_v30 }
 0x181   : > { %v797_v49 = vpop.permute.xlu1 %796  ;;  %v795_v51 = vpop.permute.xlu0 %794  ;;  %5461 = vmatprep.subr.bf16.mxu0 %v5460_v47 }
 0x182   : > { %v811_v3 = vsel %vm806_vm11, %v795_v51, %v797_v49  ;;  %5463 = vmatpush1.bf16.msra.mxu0 %v5462_v48 }
 0x183   : > { %1052 = vrot.lane.b32.xlu1 %v6704_v12, %s6135_s5  ;;  %1050 = vrot.lane.b32.xlu0 %v6769_v57, %s6135_s5 }
 0x185   : > { %v801_v55 = vpop.permute.xlu1 %800  ;;  %v799_v1 = vpop.permute.xlu0 %798 }
 0x186   : > { %v812_v56 = vsel %vm806_vm11, %v797_v49, %v799_v1  ;;  %835 = vst.msk [vmem:[#allocation2 + $0x460] sm:$0xff] %vm189_vm0, %v799_v1 }
 0x187   : > { %1056 = vrot.lane.b32.xlu1 %v6774_v2, %s6135_s5  ;;  %1054 = vrot.lane.b32.xlu0 %v6258_v10, %s6135_s5  ;;  %s6145_s5 = smov 58  }
 0x189   : > { %v805_v58 = vpop.permute.xlu1 %804  ;;  %v803_v59 = vpop.permute.xlu0 %802 }
 0x18a   : > { %838 = vst.msk [vmem:[#allocation2 + $0x478] sm:$0xff] %vm189_vm0, %v805_v58  ;;  %v813_v60 = vsel %vm806_vm11, %v801_v55, %v803_v59  ;;  %v814_v5 = vsel %vm806_vm11, %v803_v59, %v805_v58  ;;  %vm1610_vm11 = vcmask 490496  }
 0x18b   : > { %1097 = vrot.lane.b32.xlu1 %v6710_v17, %s6136_s6  ;;  %1095 = vrot.lane.b32.xlu0 %v6714_v18, %s6136_s6  ;;  %v5464_v61 = vpack.c.bf16 %v814_v5, %v812_v56  ;;  %v5466_v6 = vpack.c.bf16 %v813_v60, %v811_v3 }
 0x18d   : > { %v842_v63 = vpop.permute.xlu1 %841  ;;  %v840_v7 = vpop.permute.xlu0 %839  ;;  %5465 = vmatprep.subr.bf16.mxu0 %v5464_v61 }
 0x18e   : > { %v864_v8 = vsel %vm863_vm12, %v840_v7, %v842_v63  ;;  %5467 = vmatpush1.bf16.msra.mxu0 %v5466_v6 }
 0x18f   : > { %1101 = vrot.lane.b32.xlu1 %v6719_v19, %s6136_s6  ;;  %1099 = vrot.lane.b32.xlu0 %v6214_v0, %s6136_s6 }
 0x191   : > { %v846_v15 = vpop.permute.xlu1 %845  ;;  %v844_v16 = vpop.permute.xlu0 %843 }
 0x192   : > { %v865_v20 = vsel %vm863_vm12, %v842_v63, %v844_v16  ;;  %886 = vst.msk [vmem:[#allocation2 + $0x490] sm:$0xff] %vm189_vm0, %v844_v16 }
 0x193   : > { %1105 = vrot.lane.b32.xlu1 %v6729_v31, %s6136_s6  ;;  %1103 = vrot.lane.b32.xlu0 %v6733_v32, %s6136_s6 }
 0x195   : > { %v850_v21 = vpop.permute.xlu1 %849  ;;  %v848_v22 = vpop.permute.xlu0 %847 }
 0x196   : > { %889 = vst.msk [vmem:[#allocation2 + $0x4a8] sm:$0xff] %vm189_vm0, %v850_v21  ;;  %v866_v23 = vsel %vm863_vm12, %v846_v15, %v848_v22  ;;  %v867_v25 = vsel %vm863_vm12, %v848_v22, %v850_v21 }
 0x197   : > { %1109 = vrot.lane.b32.xlu1 %v6738_v33, %s6136_s6  ;;  %1107 = vrot.lane.b32.xlu0 %v6232_v4, %s6136_s6  ;;  %v5468_v27 = vpack.c.bf16 %v867_v25, %v865_v20  ;;  %v5470_v28 = vpack.c.bf16 %v866_v23, %v864_v8 }
 0x199   : > { %v854_v29 = vpop.permute.xlu1 %853  ;;  %v852_v30 = vpop.permute.xlu0 %851  ;;  %5469 = vmatprep.subr.bf16.mxu0 %v5468_v27 }
 0x19a   : > { %v868_v34 = vsel %vm863_vm12, %v852_v30, %v854_v29  ;;  %5471 = vmatpush1.bf16.msra.mxu0 %v5470_v28 }
 0x19b   : > { %1113 = vrot.lane.b32.xlu1 %v6749_v45, %s6136_s6  ;;  %1111 = vrot.lane.b32.xlu0 %v6753_v46, %s6136_s6 }
 0x19d   : > { %v858_v35 = vpop.permute.xlu1 %857  ;;  %v856_v37 = vpop.permute.xlu0 %855 }
 0x19e   : > { %v869_v39 = vsel %vm863_vm12, %v854_v29, %v856_v37  ;;  %892 = vst.msk [vmem:[#allocation2 + $0x4c0] sm:$0xff] %vm189_vm0, %v856_v37 }
 0x19f   : > { %1117 = vrot.lane.b32.xlu1 %v6758_v13, %s6136_s6  ;;  %1115 = vrot.lane.b32.xlu0 %v6255_v9, %s6136_s6 }
 0x1a1   : > { %v862_v41 = vpop.permute.xlu1 %861  ;;  %v860_v43 = vpop.permute.xlu0 %859 }
 0x1a2   : > { %895 = vst.msk [vmem:[#allocation2 + $0x4d8] sm:$0xff] %vm189_vm0, %v862_v41  ;;  %v870_v44 = vsel %vm863_vm12, %v858_v35, %v860_v43  ;;  %v871_v47 = vsel %vm863_vm12, %v860_v43, %v862_v41  ;;  %vm1679_vm12 = vcmask 482304  }
 0x1a3   : > { %1121 = vrot.lane.b32.xlu1 %v6704_v12, %s6136_s6  ;;  %1119 = vrot.lane.b32.xlu0 %v6769_v57, %s6136_s6  ;;  %v5472_v48 = vpack.c.bf16 %v871_v47, %v869_v39  ;;  %v5474_v49 = vpack.c.bf16 %v870_v44, %v868_v34 }
 0x1a5   : > { %v899_v51 = vpop.permute.xlu1 %898  ;;  %v897_v3 = vpop.permute.xlu0 %896  ;;  %5473 = vmatprep.subr.bf16.mxu0 %v5472_v48 }
 0x1a6   : > { %v921_v55 = vsel %vm920_vm13, %v897_v3, %v899_v51  ;;  %5475 = vmatpush1.bf16.msra.mxu0 %v5474_v49 }
 0x1a7   : > { %1125 = vrot.lane.b32.xlu1 %v6774_v2, %s6136_s6  ;;  %1123 = vrot.lane.b32.xlu0 %v6258_v10, %s6136_s6  ;;  %s6146_s6 = smov 57  }
 0x1a9   : > { %v903_v1 = vpop.permute.xlu1 %902  ;;  %v901_v56 = vpop.permute.xlu0 %900 }
 0x1aa   : > { %v922_v58 = vsel %vm920_vm13, %v899_v51, %v901_v56  ;;  %943 = vst.msk [vmem:[#allocation2 + $0x4f0] sm:$0xff] %vm189_vm0, %v901_v56 }
 0x1ab   : > { %1166 = vrot.lane.b32.xlu1 %v6710_v17, %s6137_s9  ;;  %1164 = vrot.lane.b32.xlu0 %v6714_v18, %s6137_s9 }
 0x1ad   : > { %v907_v59 = vpop.permute.xlu1 %906  ;;  %v905_v60 = vpop.permute.xlu0 %904 }
 0x1ae   : > { %946 = vst.msk [vmem:[#allocation2 + $0x508] sm:$0xff] %vm189_vm0, %v907_v59  ;;  %v923_v5 = vsel %vm920_vm13, %v903_v1, %v905_v60  ;;  %v924_v61 = vsel %vm920_vm13, %v905_v60, %v907_v59 }
 0x1af   : > { %1170 = vrot.lane.b32.xlu1 %v6719_v19, %s6137_s9  ;;  %1168 = vrot.lane.b32.xlu0 %v6214_v0, %s6137_s9  ;;  %v5476_v6 = vpack.c.bf16 %v924_v61, %v922_v58  ;;  %v5478_v62 = vpack.c.bf16 %v923_v5, %v921_v55 }
 0x1b1   : > { %v911_v63 = vpop.permute.xlu1 %910  ;;  %v909_v7 = vpop.permute.xlu0 %908  ;;  %5477 = vmatprep.subr.bf16.mxu0 %v5476_v6 }
 0x1b2   : > { %v925_v8 = vsel %vm920_vm13, %v909_v7, %v911_v63  ;;  %5479 = vmatpush1.bf16.msra.mxu0 %v5478_v62 }
 0x1b3   : > { %1174 = vrot.lane.b32.xlu1 %v6729_v31, %s6137_s9  ;;  %1172 = vrot.lane.b32.xlu0 %v6733_v32, %s6137_s9 }
 0x1b5   : > { %v915_v15 = vpop.permute.xlu1 %914  ;;  %v913_v16 = vpop.permute.xlu0 %912 }
 0x1b6   : > { %v926_v20 = vsel %vm920_vm13, %v911_v63, %v913_v16  ;;  %949 = vst.msk [vmem:[#allocation2 + $0x520] sm:$0xff] %vm189_vm0, %v913_v16 }
 0x1b7   : > { %1178 = vrot.lane.b32.xlu1 %v6738_v33, %s6137_s9  ;;  %1176 = vrot.lane.b32.xlu0 %v6232_v4, %s6137_s9 }
 0x1b9   : > { %v919_v21 = vpop.permute.xlu1 %918  ;;  %v917_v22 = vpop.permute.xlu0 %916 }
 0x1ba   : > { %952 = vst.msk [vmem:[#allocation2 + $0x538] sm:$0xff] %vm189_vm0, %v919_v21  ;;  %v927_v23 = vsel %vm920_vm13, %v915_v15, %v917_v22  ;;  %v928_v25 = vsel %vm920_vm13, %v917_v22, %v919_v21  ;;  %vm1748_vm13 = vcmask 474112  }
 0x1bb   : > { %1182 = vrot.lane.b32.xlu1 %v6749_v45, %s6137_s9  ;;  %1180 = vrot.lane.b32.xlu0 %v6753_v46, %s6137_s9  ;;  %v5480_v27 = vpack.c.bf16 %v928_v25, %v926_v20  ;;  %v5482_v28 = vpack.c.bf16 %v927_v23, %v925_v8 }
 0x1bd   : > { %v960_v29 = vpop.permute.xlu1 %959  ;;  %v958_v30 = vpop.permute.xlu0 %957  ;;  %5481 = vmatprep.subr.bf16.mxu0 %v5480_v27 }
 0x1be   : > { %v990_v34 = vsel %vm989_vm14, %v958_v30, %v960_v29  ;;  %5483 = vmatpush1.bf16.msra.mxu0 %v5482_v28 }
 0x1bf   : > { %1186 = vrot.lane.b32.xlu1 %v6758_v13, %s6137_s9  ;;  %1184 = vrot.lane.b32.xlu0 %v6255_v9, %s6137_s9 }
 0x1c1   : > { %v964_v35 = vpop.permute.xlu1 %963  ;;  %v962_v37 = vpop.permute.xlu0 %961 }
 0x1c2   : > { %v991_v39 = vsel %vm989_vm14, %v960_v29, %v962_v37  ;;  %v992_v41 = vsel %vm989_vm14, %v962_v37, %v964_v35 }
 0x1c3   : > { %1016 = vst.msk [vmem:[#allocation2 + $0x550] sm:$0xff] %vm189_vm0, %v992_v41  ;;  %1190 = vrot.lane.b32.xlu1 %v6704_v12, %s6137_s9  ;;  %1188 = vrot.lane.b32.xlu0 %v6769_v57, %s6137_s9 }
 0x1c5   : > { %v968_v43 = vpop.permute.xlu1 %967  ;;  %v966_v44 = vpop.permute.xlu0 %965 }
 0x1c6   : > { %v993_v47 = vsel %vm989_vm14, %v966_v44, %v968_v43 }
 0x1c7   : > { %1194 = vrot.lane.b32.xlu1 %v6774_v2, %s6137_s9  ;;  %1192 = vrot.lane.b32.xlu0 %v6258_v10, %s6137_s9  ;;  %v5486_v1 = vpack.c.bf16 %v993_v47, %v990_v34  ;;  %s6159_s9 = smov 16  }
 0x1c9   : > { %v972_v48 = vpop.permute.xlu1 %971  ;;  %v970_v49 = vpop.permute.xlu0 %969 }
 0x1ca   : > { %v994_v51 = vsel %vm989_vm14, %v968_v43, %v970_v49  ;;  %v995_v3 = vsel %vm989_vm14, %v970_v49, %v972_v48 }
 0x1cb   : > { %1019 = vst.msk [vmem:[#allocation2 + $0x568] sm:$0xff] %vm189_vm0, %v995_v3  ;;  %1235 = vrot.lane.b32.xlu1 %v6710_v17, %s6138_s10  ;;  %1233 = vrot.lane.b32.xlu0 %v6714_v18, %s6138_s10  ;;  %v5484_v55 = vpack.c.bf16 %v994_v51, %v991_v39 }
 0x1cd   : > { %v976_v56 = vpop.permute.xlu1 %975  ;;  %v974_v58 = vpop.permute.xlu0 %973  ;;  %5485 = vmatprep.subr.bf16.mxu0 %v5484_v55 }
 0x1ce   : > { %v996_v59 = vsel %vm989_vm14, %v974_v58, %v976_v56  ;;  %5487 = vmatpush1.bf16.msra.mxu0 %v5486_v1 }
 0x1cf   : > { %1239 = vrot.lane.b32.xlu1 %v6719_v19, %s6138_s10  ;;  %1237 = vrot.lane.b32.xlu0 %v6214_v0, %s6138_s10 }
 0x1d1   : > { %v980_v60 = vpop.permute.xlu1 %979  ;;  %v978_v5 = vpop.permute.xlu0 %977 }
 0x1d2   : > { %v997_v61 = vsel %vm989_vm14, %v976_v56, %v978_v5  ;;  %v998_v6 = vsel %vm989_vm14, %v978_v5, %v980_v60 }
 0x1d3   : > { %1022 = vst.msk [vmem:[#allocation2 + $0x580] sm:$0xff] %vm189_vm0, %v998_v6  ;;  %1243 = vrot.lane.b32.xlu1 %v6729_v31, %s6138_s10  ;;  %1241 = vrot.lane.b32.xlu0 %v6733_v32, %s6138_s10 }
 0x1d5   : > { %v984_v62 = vpop.permute.xlu1 %983  ;;  %v982_v63 = vpop.permute.xlu0 %981 }
 0x1d6   : > { %v999_v7 = vsel %vm989_vm14, %v982_v63, %v984_v62 }
 0x1d7   : > { %1247 = vrot.lane.b32.xlu1 %v6738_v33, %s6138_s10  ;;  %1245 = vrot.lane.b32.xlu0 %v6232_v4, %s6138_s10  ;;  %v5490_v22 = vpack.c.bf16 %v999_v7, %v996_v59 }
 0x1d9   : > { %v988_v8 = vpop.permute.xlu1 %987  ;;  %v986_v15 = vpop.permute.xlu0 %985 }
 0x1da   : > { %v1000_v16 = vsel %vm989_vm14, %v984_v62, %v986_v15  ;;  %v1001_v20 = vsel %vm989_vm14, %v986_v15, %v988_v8  ;;  %vm1817_vm14 = vcmask 465920  }
 0x1db   : > { %1025 = vst.msk [vmem:[#allocation2 + $0x598] sm:$0xff] %vm189_vm0, %v1001_v20  ;;  %1251 = vrot.lane.b32.xlu1 %v6749_v45, %s6138_s10  ;;  %1249 = vrot.lane.b32.xlu0 %v6753_v46, %s6138_s10  ;;  %v5488_v21 = vpack.c.bf16 %v1000_v16, %v997_v61 }
 0x1dd   : > { %v1029_v23 = vpop.permute.xlu1 %1028  ;;  %v1027_v25 = vpop.permute.xlu0 %1026  ;;  %5489 = vmatprep.subr.bf16.mxu0 %v5488_v21 }
 0x1de   : > { %v1059_v27 = vsel %vm1058_vm15, %v1027_v25, %v1029_v23  ;;  %5491 = vmatpush1.bf16.msra.mxu0 %v5490_v22  ;;  %v3215_v22 = vld [vmem:[%s8863_s1 + $0x10] sm:$0xff] }
 0x1df   : > { %1255 = vrot.lane.b32.xlu1 %v6758_v13, %s6138_s10  ;;  %1253 = vrot.lane.b32.xlu0 %v6255_v9, %s6138_s10 }
 0x1e1   : > { %v1033_v28 = vpop.permute.xlu1 %1032  ;;  %v1031_v29 = vpop.permute.xlu0 %1030 }
 0x1e2   : > { %v1060_v30 = vsel %vm1058_vm15, %v1029_v23, %v1031_v29  ;;  %v1061_v34 = vsel %vm1058_vm15, %v1031_v29, %v1033_v28 }
 0x1e3   : > { %1085 = vst.msk [vmem:[#allocation2 + $0x5b0] sm:$0xff] %vm189_vm0, %v1061_v34  ;;  %1259 = vrot.lane.b32.xlu1 %v6704_v12, %s6138_s10  ;;  %1257 = vrot.lane.b32.xlu0 %v6769_v57, %s6138_s10 }
 0x1e5   : > { %v1037_v35 = vpop.permute.xlu1 %1036  ;;  %v1035_v37 = vpop.permute.xlu0 %1034 }
 0x1e6   : > { %v1062_v39 = vsel %vm1058_vm15, %v1035_v37, %v1037_v35 }
 0x1e7   : > { %1263 = vrot.lane.b32.xlu1 %v6774_v2, %s6138_s10  ;;  %1261 = vrot.lane.b32.xlu0 %v6258_v10, %s6138_s10  ;;  %v5494_v49 = vpack.c.bf16 %v1062_v39, %v1059_v27 }
 0x1e9   : > { %v1041_v41 = vpop.permute.xlu1 %1040  ;;  %v1039_v43 = vpop.permute.xlu0 %1038 }
 0x1ea   : > { %v1063_v44 = vsel %vm1058_vm15, %v1037_v35, %v1039_v43  ;;  %v1064_v47 = vsel %vm1058_vm15, %v1039_v43, %v1041_v41 }
 0x1eb   : > { %1088 = vst.msk [vmem:[#allocation2 + $0x5c8] sm:$0xff] %vm189_vm0, %v1064_v47  ;;  %1304 = vrot.lane.b32.xlu1 %v6710_v17, %s6139_s11  ;;  %1302 = vrot.lane.b32.xlu0 %v6714_v18, %s6139_s11  ;;  %v5492_v48 = vpack.c.bf16 %v1063_v44, %v1060_v30 }
 0x1ed   : > { %v1045_v51 = vpop.permute.xlu1 %1044  ;;  %v1043_v3 = vpop.permute.xlu0 %1042  ;;  %5493 = vmatprep.subr.bf16.mxu0 %v5492_v48 }
 0x1ee   : > { %v1065_v55 = vsel %vm1058_vm15, %v1043_v3, %v1045_v51  ;;  %5495 = vmatpush1.bf16.msra.mxu0 %v5494_v49 }
 0x1ef   : > { %1308 = vrot.lane.b32.xlu1 %v6719_v19, %s6139_s11  ;;  %1306 = vrot.lane.b32.xlu0 %v6214_v0, %s6139_s11 }
 0x1f1   : > { %v1049_v1 = vpop.permute.xlu1 %1048  ;;  %v1047_v56 = vpop.permute.xlu0 %1046 }
 0x1f2   : > { %v1066_v58 = vsel %vm1058_vm15, %v1045_v51, %v1047_v56  ;;  %v1067_v59 = vsel %vm1058_vm15, %v1047_v56, %v1049_v1 }
 0x1f3   : > { %1091 = vst.msk [vmem:[#allocation2 + $0x5e0] sm:$0xff] %vm189_vm0, %v1067_v59  ;;  %1312 = vrot.lane.b32.xlu1 %v6729_v31, %s6139_s11  ;;  %1310 = vrot.lane.b32.xlu0 %v6733_v32, %s6139_s11 }
 0x1f5   : > { %v1053_v60 = vpop.permute.xlu1 %1052  ;;  %v1051_v5 = vpop.permute.xlu0 %1050 }
 0x1f6   : > { %v1068_v61 = vsel %vm1058_vm15, %v1051_v5, %v1053_v60 }
 0x1f7   : > { %1316 = vrot.lane.b32.xlu1 %v6738_v33, %s6139_s11  ;;  %1314 = vrot.lane.b32.xlu0 %v6232_v4, %s6139_s11  ;;  %v5498_v15 = vpack.c.bf16 %v1068_v61, %v1065_v55 }
 0x1f9   : > { %v1057_v6 = vpop.permute.xlu1 %1056  ;;  %v1055_v62 = vpop.permute.xlu0 %1054 }
 0x1fa   : > { %v1069_v63 = vsel %vm1058_vm15, %v1053_v60, %v1055_v62  ;;  %v1070_v7 = vsel %vm1058_vm15, %v1055_v62, %v1057_v6  ;;  %vm1886_vm15 = vcmask 457728  }
 0x1fb   : > { %1094 = vst.msk [vmem:[#allocation2 + $0x5f8] sm:$0xff] %vm189_vm0, %v1070_v7  ;;  %1320 = vrot.lane.b32.xlu1 %v6749_v45, %s6139_s11  ;;  %1318 = vrot.lane.b32.xlu0 %v6753_v46, %s6139_s11  ;;  %v5496_v8 = vpack.c.bf16 %v1069_v63, %v1066_v58 }
 0x1fd   : > { %v1098_v16 = vpop.permute.xlu1 %1097  ;;  %v1096_v20 = vpop.permute.xlu0 %1095  ;;  %5497 = vmatprep.subr.bf16.mxu0 %v5496_v8 }
 0x1fe   : > { %v1128_v21 = vsel %vm1127_vm1, %v1096_v20, %v1098_v16  ;;  %5499 = vmatpush1.bf16.msra.mxu0 %v5498_v15 }
 0x1ff   : > { %1324 = vrot.lane.b32.xlu1 %v6758_v13, %s6139_s11  ;;  %1322 = vrot.lane.b32.xlu0 %v6255_v9, %s6139_s11 }
 0x201   : > { %v1102_v23 = vpop.permute.xlu1 %1101  ;;  %v1100_v25 = vpop.permute.xlu0 %1099  ;;  %3976 = vmatmul.mubr.f32.vlgmr.msra.gmra.mrb[0].mxu0 %v3215_v22 }
 0x202   : > { %v1129_v27 = vsel %vm1127_vm1, %v1098_v16, %v1100_v25  ;;  %v1130_v28 = vsel %vm1127_vm1, %v1100_v25, %v1102_v23 }
 0x203   : > { %1154 = vst.msk [vmem:[#allocation2 + $0x610] sm:$0xff] %vm189_vm0, %v1130_v28  ;;  %1328 = vrot.lane.b32.xlu1 %v6704_v12, %s6139_s11  ;;  %1326 = vrot.lane.b32.xlu0 %v6769_v57, %s6139_s11 }
 0x205   : > { %v1106_v29 = vpop.permute.xlu1 %1105  ;;  %v1104_v30 = vpop.permute.xlu0 %1103 }
 0x206   : > { %v1131_v34 = vsel %vm1127_vm1, %v1104_v30, %v1106_v29 }
 0x207   : > { %1332 = vrot.lane.b32.xlu1 %v6774_v2, %s6139_s11  ;;  %1330 = vrot.lane.b32.xlu0 %v6258_v10, %s6139_s11  ;;  %v5502_v44 = vpack.c.bf16 %v1131_v34, %v1128_v21  ;;  %s6148_s11 = smov 40  }
 0x209   : > { %v1110_v35 = vpop.permute.xlu1 %1109  ;;  %v1108_v37 = vpop.permute.xlu0 %1107 }
 0x20a   : > { %v1132_v39 = vsel %vm1127_vm1, %v1106_v29, %v1108_v37  ;;  %v1133_v41 = vsel %vm1127_vm1, %v1108_v37, %v1110_v35 }
 0x20b   : > { %1157 = vst.msk [vmem:[#allocation2 + $0x628] sm:$0xff] %vm189_vm0, %v1133_v41  ;;  %1373 = vrot.lane.b32.xlu1 %v6710_v17, %s6140_s16  ;;  %1371 = vrot.lane.b32.xlu0 %v6714_v18, %s6140_s16  ;;  %v5500_v43 = vpack.c.bf16 %v1132_v39, %v1129_v27 }
 0x20d   : > { %v1114_v47 = vpop.permute.xlu1 %1113  ;;  %v1112_v48 = vpop.permute.xlu0 %1111  ;;  %5501 = vmatprep.subr.bf16.mxu0 %v5500_v43 }
 0x20e   : > { %v1134_v49 = vsel %vm1127_vm1, %v1112_v48, %v1114_v47  ;;  %5503 = vmatpush1.bf16.msra.mxu0 %v5502_v44 }
 0x20f   : > { %1377 = vrot.lane.b32.xlu1 %v6719_v19, %s6140_s16  ;;  %1375 = vrot.lane.b32.xlu0 %v6214_v0, %s6140_s16 }
 0x211   : > { %v1118_v51 = vpop.permute.xlu1 %1117  ;;  %v1116_v3 = vpop.permute.xlu0 %1115 }
 0x212   : > { %v1135_v55 = vsel %vm1127_vm1, %v1114_v47, %v1116_v3  ;;  %v1136_v1 = vsel %vm1127_vm1, %v1116_v3, %v1118_v51 }
 0x213   : > { %1160 = vst.msk [vmem:[#allocation2 + $0x640] sm:$0xff] %vm189_vm0, %v1136_v1  ;;  %1381 = vrot.lane.b32.xlu1 %v6729_v31, %s6140_s16  ;;  %1379 = vrot.lane.b32.xlu0 %v6733_v32, %s6140_s16 }
 0x215   : > { %v1122_v56 = vpop.permute.xlu1 %1121  ;;  %v1120_v58 = vpop.permute.xlu0 %1119 }
 0x216   : > { %v1137_v59 = vsel %vm1127_vm1, %v1120_v58, %v1122_v56 }
 0x217   : > { %1385 = vrot.lane.b32.xlu1 %v6738_v33, %s6140_s16  ;;  %1383 = vrot.lane.b32.xlu0 %v6232_v4, %s6140_s16  ;;  %v5506_v63 = vpack.c.bf16 %v1137_v59, %v1134_v49 }
 0x219   : > { %v1126_v60 = vpop.permute.xlu1 %1125  ;;  %v1124_v5 = vpop.permute.xlu0 %1123 }
 0x21a   : > { %v1138_v61 = vsel %vm1127_vm1, %v1122_v56, %v1124_v5  ;;  %v1139_v6 = vsel %vm1127_vm1, %v1124_v5, %v1126_v60  ;;  %v7115_v60 = vld [vmem:[#allocation2 + $0x50] sm:$0xff]  ;;  %vm1955_vm1 = vcmask 326656  }
 0x21b   : > { %1163 = vst.msk [vmem:[#allocation2 + $0x658] sm:$0xff] %vm189_vm0, %v1139_v6  ;;  %1389 = vrot.lane.b32.xlu1 %v6749_v45, %s6140_s16  ;;  %1387 = vrot.lane.b32.xlu0 %v6753_v46, %s6140_s16  ;;  %v5504_v62 = vpack.c.bf16 %v1138_v61, %v1135_v55 }
 0x21d   : > { %v1167_v7 = vpop.permute.xlu1 %1166  ;;  %v1165_v8 = vpop.permute.xlu0 %1164  ;;  %5505 = vmatprep.subr.bf16.mxu0 %v5504_v62 }
 0x21e   : > { %v1197_v15 = vsel %vm1196_vm2, %v1165_v8, %v1167_v7  ;;  %5507 = vmatpush1.bf16.msra.mxu0 %v5506_v63  ;;  %v7133_v8 = vld [vmem:[#allocation2] sm:$0xff] }
 0x21f   : > { %1393 = vrot.lane.b32.xlu1 %v6758_v13, %s6140_s16  ;;  %1391 = vrot.lane.b32.xlu0 %v6255_v9, %s6140_s16 }
 0x221   : > { %v1171_v16 = vpop.permute.xlu1 %1170  ;;  %v1169_v20 = vpop.permute.xlu0 %1168 }
 0x222   : > { %v1198_v21 = vsel %vm1196_vm2, %v1167_v7, %v1169_v20  ;;  %v1199_v22 = vsel %vm1196_vm2, %v1169_v20, %v1171_v16 }
 0x223   : > { %1223 = vst.msk [vmem:[#allocation2 + $0x670] sm:$0xff] %vm189_vm0, %v1199_v22  ;;  %1397 = vrot.lane.b32.xlu1 %v6704_v12, %s6140_s16  ;;  %1395 = vrot.lane.b32.xlu0 %v6769_v57, %s6140_s16  ;;  %v7139_v22 = vld [vmem:[%s6211_s17 + $0x18] sm:$0xff] }
 0x225   : > { %v1175_v23 = vpop.permute.xlu1 %1174  ;;  %v1173_v25 = vpop.permute.xlu0 %1172 }
 0x226   : > { %v1200_v27 = vsel %vm1196_vm2, %v1173_v25, %v1175_v23 }
 0x227   : > { %1401 = vrot.lane.b32.xlu1 %v6774_v2, %s6140_s16  ;;  %1399 = vrot.lane.b32.xlu0 %v6258_v10, %s6140_s16  ;;  %v5510_v35 = vpack.c.bf16 %v1200_v27, %v1197_v15  ;;  %s6154_s16 = smov 36  }
 0x229   : > { %v1179_v28 = vpop.permute.xlu1 %1178  ;;  %v1177_v29 = vpop.permute.xlu0 %1176 }
 0x22a   : > { %v1201_v30 = vsel %vm1196_vm2, %v1175_v23, %v1177_v29  ;;  %v1202_v34 = vsel %vm1196_vm2, %v1177_v29, %v1179_v28  ;;  %v7148_v29 = vld [vmem:[#allocation2 + $0x20] sm:$0xff] }
 0x22b   : > { %1226 = vst.msk [vmem:[#allocation2 + $0x688] sm:$0xff] %vm189_vm0, %v1202_v34  ;;  %1442 = vrot.lane.b32.xlu1 %v6710_v17, %s6141_s18  ;;  %1440 = vrot.lane.b32.xlu0 %v6714_v18, %s6141_s18  ;;  %v5508_v12 = vpack.c.bf16 %v1201_v30, %v1198_v21  ;;  %v7152_v30 = vld [vmem:[#allocation2 + $0x18] sm:$0xff] }
 0x22d   : > { %v1183_v37 = vpop.permute.xlu1 %1182  ;;  %v1181_v39 = vpop.permute.xlu0 %1180  ;;  %5509 = vmatprep.subr.bf16.mxu0 %v5508_v12 }
 0x22e   : > { %v1203_v41 = vsel %vm1196_vm2, %v1181_v39, %v1183_v37  ;;  %5511 = vmatpush1.bf16.msra.mxu0 %v5510_v35 }
 0x22f   : > { %1446 = vrot.lane.b32.xlu1 %v6719_v19, %s6141_s18  ;;  %1444 = vrot.lane.b32.xlu0 %v6214_v0, %s6141_s18 }
 0x231   : > { %v1187_v43 = vpop.permute.xlu1 %1186  ;;  %v1185_v44 = vpop.permute.xlu0 %1184 }
 0x232   : > { %v1204_v17 = vsel %vm1196_vm2, %v1183_v37, %v1185_v44  ;;  %v1205_v18 = vsel %vm1196_vm2, %v1185_v44, %v1187_v43  ;;  %v7158_v37 = vld [vmem:[%s6211_s17 + $0x38] sm:$0xff] }
 0x233   : > { %1229 = vst.msk [vmem:[#allocation2 + $0x6a0] sm:$0xff] %vm189_vm0, %v1205_v18  ;;  %1450 = vrot.lane.b32.xlu1 %v6729_v31, %s6141_s18  ;;  %1448 = vrot.lane.b32.xlu0 %v6733_v32, %s6141_s18  ;;  %v7171_v18 = vld [vmem:[#allocation2 + $0x30] sm:$0xff] }
 0x235   : > { %v1191_v47 = vpop.permute.xlu1 %1190  ;;  %v1189_v48 = vpop.permute.xlu0 %1188 }
 0x236   : > { %v1206_v19 = vsel %vm1196_vm2, %v1189_v48, %v1191_v47 }
 0x237   : > { %1454 = vrot.lane.b32.xlu1 %v6738_v33, %s6141_s18  ;;  %1452 = vrot.lane.b32.xlu0 %v6232_v4, %s6141_s18  ;;  %v5514_v32 = vpack.c.bf16 %v1206_v19, %v1203_v41 }
 0x239   : > { %v1195_v49 = vpop.permute.xlu1 %1194  ;;  %v1193_v51 = vpop.permute.xlu0 %1192 }
 0x23a   : > { %v1207_v3 = vsel %vm1196_vm2, %v1191_v47, %v1193_v51  ;;  %v1208_v55 = vsel %vm1196_vm2, %v1193_v51, %v1195_v49  ;;  %vm2024_vm2 = vcmask 318464  }
 0x23b   : > { %1232 = vst.msk [vmem:[#allocation2 + $0x6b8] sm:$0xff] %vm189_vm0, %v1208_v55  ;;  %1458 = vrot.lane.b32.xlu1 %v6749_v45, %s6141_s18  ;;  %1456 = vrot.lane.b32.xlu0 %v6753_v46, %s6141_s18  ;;  %v5512_v31 = vpack.c.bf16 %v1207_v3, %v1204_v17  ;;  %v7167_v17 = vld [vmem:[#allocation2 + $0x38] sm:$0xff] }
 0x23c   : > { %v7177_v3 = vld [vmem:[%s6211_s17 + $0x58] sm:$0xff] }
 0x23d   : > { %v1236_v33 = vpop.permute.xlu1 %1235  ;;  %v1234_v1 = vpop.permute.xlu0 %1233  ;;  %5513 = vmatprep.subr.bf16.mxu0 %v5512_v31 }
 0x23e   : > { %v1266_v56 = vsel %vm1265_vm3, %v1234_v1, %v1236_v33  ;;  %5515 = vmatpush1.bf16.msra.mxu0 %v5514_v32  ;;  %v7188_v1 = vld [vmem:[#allocation2 + $0x48] sm:$0xff] }
 0x23f   : > { %1462 = vrot.lane.b32.xlu1 %v6758_v13, %s6141_s18  ;;  %1460 = vrot.lane.b32.xlu0 %v6255_v9, %s6141_s18 }
 0x241   : > { %v1240_v58 = vpop.permute.xlu1 %1239  ;;  %v1238_v45 = vpop.permute.xlu0 %1237 }
 0x242   : > { %v1267_v59 = vsel %vm1265_vm3, %v1236_v33, %v1238_v45  ;;  %v1268_v46 = vsel %vm1265_vm3, %v1238_v45, %v1240_v58 }
 0x243   : > { %1292 = vst.msk [vmem:[#allocation2 + $0x6d0] sm:$0xff] %vm189_vm0, %v1268_v46  ;;  %1466 = vrot.lane.b32.xlu1 %v7115_v60, %s6141_s18  ;;  %1464 = vrot.lane.b32.xlu0 %v6769_v57, %s6141_s18  ;;  %v7129_v57 = vld [vmem:[#allocation2 + $0x8] sm:$0xff] }
 0x245   : > { %v1244_v13 = vpop.permute.xlu1 %1243  ;;  %v1242_v5 = vpop.permute.xlu0 %1241 }
 0x246   : > { %v1269_v61 = vsel %vm1265_vm3, %v1242_v5, %v1244_v13 }
 0x247   : > { %1470 = vrot.lane.b32.xlu1 %v6774_v2, %s6141_s18  ;;  %1468 = vrot.lane.b32.xlu0 %v6258_v10, %s6141_s18  ;;  %v5518_v15 = vpack.c.bf16 %v1269_v61, %v1266_v56 }
 0x249   : > { %v1248_v6 = vpop.permute.xlu1 %1247  ;;  %v1246_v62 = vpop.permute.xlu0 %1245 }
 0x24a   : > { %v1270_v63 = vsel %vm1265_vm3, %v1244_v13, %v1246_v62  ;;  %v1271_v7 = vsel %vm1265_vm3, %v1246_v62, %v1248_v6 }
 0x24b   : > { %1295 = vst.msk [vmem:[#allocation2 + $0x6e8] sm:$0xff] %vm189_vm0, %v1271_v7  ;;  %1511 = vrot.lane.b32.xlu1 %v7129_v57, %s6142_s19  ;;  %1509 = vrot.lane.b32.xlu0 %v7133_v8, %s6142_s19  ;;  %v5516_v2 = vpack.c.bf16 %v1270_v63, %v1267_v59  ;;  %v7194_v59 = vld [vmem:[%s6211_s17 + $0x78] sm:$0xff] }
 0x24d   : > { %v1252_v16 = vpop.permute.xlu1 %1251  ;;  %v1250_v20 = vpop.permute.xlu0 %1249  ;;  %5517 = vmatprep.subr.bf16.mxu0 %v5516_v2 }
 0x24e   : > { %v1272_v21 = vsel %vm1265_vm3, %v1250_v20, %v1252_v16  ;;  %5519 = vmatpush1.bf16.msra.mxu0 %v5518_v15 }
 0x24f   : > { %1515 = vrot.lane.b32.xlu1 %v7139_v22, %s6142_s19  ;;  %1513 = vrot.lane.b32.xlu0 %v6214_v0, %s6142_s19 }
 0x251   : > { %v1256_v23 = vpop.permute.xlu1 %1255  ;;  %v1254_v25 = vpop.permute.xlu0 %1253 }
 0x252   : > { %v1273_v27 = vsel %vm1265_vm3, %v1252_v16, %v1254_v25  ;;  %v1274_v28 = vsel %vm1265_vm3, %v1254_v25, %v1256_v23 }
 0x253   : > { %1298 = vst.msk [vmem:[#allocation2 + $0x700] sm:$0xff] %vm189_vm0, %v1274_v28  ;;  %1519 = vrot.lane.b32.xlu1 %v7148_v29, %s6142_s19  ;;  %1517 = vrot.lane.b32.xlu0 %v7152_v30, %s6142_s19 }
 0x255   : > { %v1260_v34 = vpop.permute.xlu1 %1259  ;;  %v1258_v12 = vpop.permute.xlu0 %1257 }
 0x256   : > { %v1275_v35 = vsel %vm1265_vm3, %v1258_v12, %v1260_v34 }
 0x257   : > { %1523 = vrot.lane.b32.xlu1 %v7158_v37, %s6142_s19  ;;  %1521 = vrot.lane.b32.xlu0 %v6232_v4, %s6142_s19  ;;  %v5522_v48 = vpack.c.bf16 %v1275_v35, %v1272_v21 }
 0x259   : > { %v1264_v39 = vpop.permute.xlu1 %1263  ;;  %v1262_v41 = vpop.permute.xlu0 %1261 }
 0x25a   : > { %v1276_v43 = vsel %vm1265_vm3, %v1260_v34, %v1262_v41  ;;  %v1277_v44 = vsel %vm1265_vm3, %v1262_v41, %v1264_v39 }
 0x25b   : > { %1301 = vst.msk [vmem:[#allocation2 + $0x718] sm:$0xff] %vm189_vm0, %v1277_v44  ;;  %1527 = vrot.lane.b32.xlu1 %v7167_v17, %s6142_s19  ;;  %1525 = vrot.lane.b32.xlu0 %v7171_v18, %s6142_s19  ;;  %v5520_v47 = vpack.c.bf16 %v1276_v43, %v1273_v27 }
 0x25d   : > { %v1305_v19 = vpop.permute.xlu1 %1304  ;;  %v1303_v49 = vpop.permute.xlu0 %1302  ;;  %5521 = vmatprep.subr.bf16.mxu0 %v5520_v47 }
 0x25e   : > { %v1335_v51 = vsel %vm1334_vm7, %v1303_v49, %v1305_v19  ;;  %5523 = vmatpush1.bf16.msra.mxu0 %v5522_v48 }
 0x25f   : > { %1531 = vrot.lane.b32.xlu1 %v7177_v3, %s6142_s19  ;;  %1529 = vrot.lane.b32.xlu0 %v6255_v9, %s6142_s19 }
 0x261   : > { %v1309_v55 = vpop.permute.xlu1 %1308  ;;  %v1307_v31 = vpop.permute.xlu0 %1306 }
 0x262   : > { %v1336_v32 = vsel %vm1334_vm7, %v1305_v19, %v1307_v31  ;;  %v1337_v33 = vsel %vm1334_vm7, %v1307_v31, %v1309_v55 }
 0x263   : > { %1361 = vst.msk [vmem:[#allocation2 + $0x730] sm:$0xff] %vm189_vm0, %v1337_v33  ;;  %1535 = vrot.lane.b32.xlu1 %v7115_v60, %s6142_s19  ;;  %1533 = vrot.lane.b32.xlu0 %v7188_v1, %s6142_s19  ;;  %v3229_v33 = vld [vmem:[%s8863_s1 + $0x80] sm:$0xf] }
 0x264   : > { %3981 = vmatprep.mubr.f32.mxu0 %v3229_v33 }
 0x265   : > { %v1313_v56 = vpop.permute.xlu1 %1312  ;;  %v1311_v58 = vpop.permute.xlu0 %1310 }
 0x266   : > { %v1338_v45 = vsel %vm1334_vm7, %v1311_v58, %v1313_v56 }
 0x267   : > { %1539 = vrot.lane.b32.xlu1 %v7194_v59, %s6142_s19  ;;  %1537 = vrot.lane.b32.xlu0 %v6258_v10, %s6142_s19  ;;  %v5526_v62 = vpack.c.bf16 %v1338_v45, %v1335_v51  ;;  %v3228_v45 = vld [vmem:[%s8863_s1 + $0x78] sm:$0xf]  ;;  %s6155_s19 = smov 35  }
 0x268   : > { %3982 = vmatmul.mubr.f32.gmra.mrb[2].mxu0 %v3228_v45 }
 0x269   : > { %v1317_v46 = vpop.permute.xlu1 %1316  ;;  %v1315_v13 = vpop.permute.xlu0 %1314 }
 0x26a   : > { %v1339_v5 = vsel %vm1334_vm7, %v1313_v56, %v1315_v13  ;;  %v1340_v61 = vsel %vm1334_vm7, %v1315_v13, %v1317_v46 }
 0x26b   : > { %1364 = vst.msk [vmem:[#allocation2 + $0x748] sm:$0xff] %vm189_vm0, %v1340_v61  ;;  %1580 = vrot.lane.b32.xlu1 %v7129_v57, %s6143_s20  ;;  %1578 = vrot.lane.b32.xlu0 %v7133_v8, %s6143_s20  ;;  %v5524_v6 = vpack.c.bf16 %v1339_v5, %v1336_v32 }
 0x26d   : > { %v1321_v63 = vpop.permute.xlu1 %1320  ;;  %v1319_v7 = vpop.permute.xlu0 %1318  ;;  %5525 = vmatprep.subr.bf16.mxu0 %v5524_v6  ;;  %v3218_v6 = vld [vmem:[%s8863_s1 + $0x28] sm:$0xff] }
 0x26e   : > { %v1341_v2 = vsel %vm1334_vm7, %v1319_v7, %v1321_v63  ;;  %5527 = vmatpush1.bf16.msra.mxu0 %v5526_v62  ;;  %4052 = vmatprep.mubr.f32.mxu0 %v3218_v6 }
 0x26f   : > { %1584 = vrot.lane.b32.xlu1 %v7139_v22, %s6143_s20  ;;  %1582 = vrot.lane.b32.xlu0 %v6214_v0, %s6143_s20 }
 0x271   : > { %v1325_v15 = vpop.permute.xlu1 %1324  ;;  %v1323_v16 = vpop.permute.xlu0 %1322 }
 0x272   : > { %v1342_v20 = vsel %vm1334_vm7, %v1321_v63, %v1323_v16  ;;  %v1343_v21 = vsel %vm1334_vm7, %v1323_v16, %v1325_v15 }
 0x273   : > { %1367 = vst.msk [vmem:[#allocation2 + $0x760] sm:$0xff] %vm189_vm0, %v1343_v21  ;;  %1588 = vrot.lane.b32.xlu1 %v7148_v29, %s6143_s20  ;;  %1586 = vrot.lane.b32.xlu0 %v7152_v30, %s6143_s20 }
 0x275   : > { %v1329_v23 = vpop.permute.xlu1 %1328  ;;  %v1327_v25 = vpop.permute.xlu0 %1326 }
 0x276   : > { %v1344_v27 = vsel %vm1334_vm7, %v1327_v25, %v1329_v23 }
 0x277   : > { %1592 = vrot.lane.b32.xlu1 %v7158_v37, %s6143_s20  ;;  %1590 = vrot.lane.b32.xlu0 %v6232_v4, %s6143_s20  ;;  %v5530_v41 = vpack.c.bf16 %v1344_v27, %v1341_v2 }
 0x279   : > { %v1333_v28 = vpop.permute.xlu1 %1332  ;;  %v1331_v34 = vpop.permute.xlu0 %1330 }
 0x27a   : > { %v1345_v12 = vsel %vm1334_vm7, %v1329_v23, %v1331_v34  ;;  %v1346_v35 = vsel %vm1334_vm7, %v1331_v34, %v1333_v28  ;;  %vm2093_vm7 = vcmask 310272  }
 0x27b   : > { %1370 = vst.msk [vmem:[#allocation2 + $0x778] sm:$0xff] %vm189_vm0, %v1346_v35  ;;  %1596 = vrot.lane.b32.xlu1 %v7167_v17, %s6143_s20  ;;  %1594 = vrot.lane.b32.xlu0 %v7171_v18, %s6143_s20  ;;  %v5528_v39 = vpack.c.bf16 %v1345_v12, %v1342_v20 }
 0x27d   : > { %v1374_v43 = vpop.permute.xlu1 %1373  ;;  %v1372_v44 = vpop.permute.xlu0 %1371  ;;  %5529 = vmatprep.subr.bf16.mxu0 %v5528_v39 }
 0x27e   : > { %v1404_v47 = vsel %vm1403_vm8, %v1372_v44, %v1374_v43  ;;  %5531 = vmatpush1.bf16.msra.mxu0 %v5530_v41 }
 0x27f   : > { %1600 = vrot.lane.b32.xlu1 %v7177_v3, %s6143_s20  ;;  %1598 = vrot.lane.b32.xlu0 %v6255_v9, %s6143_s20 }
 0x281   : > { %v1378_v48 = vpop.permute.xlu1 %1377  ;;  %v1376_v19 = vpop.permute.xlu0 %1375 }
 0x282   : > { %v1405_v49 = vsel %vm1403_vm8, %v1374_v43, %v1376_v19  ;;  %v1406_v51 = vsel %vm1403_vm8, %v1376_v19, %v1378_v48 }
 0x283   : > { %1430 = vst.msk [vmem:[#allocation2 + $0x790] sm:$0xff] %vm189_vm0, %v1406_v51  ;;  %1604 = vrot.lane.b32.xlu1 %v7115_v60, %s6143_s20  ;;  %1602 = vrot.lane.b32.xlu0 %v7188_v1, %s6143_s20 }
 0x285   : > { %v1382_v55 = vpop.permute.xlu1 %1381  ;;  %v1380_v31 = vpop.permute.xlu0 %1379 }
 0x286   : > { %v1407_v32 = vsel %vm1403_vm8, %v1380_v31, %v1382_v55 }
 0x287   : > { %1608 = vrot.lane.b32.xlu1 %v7194_v59, %s6143_s20  ;;  %1606 = vrot.lane.b32.xlu0 %v6258_v10, %s6143_s20  ;;  %v5534_v61 = vpack.c.bf16 %v1407_v32, %v1404_v47  ;;  %s6156_s20 = smov 34  }
 0x289   : > { %v1386_v56 = vpop.permute.xlu1 %1385  ;;  %v1384_v58 = vpop.permute.xlu0 %1383 }
 0x28a   : > { %v1408_v46 = vsel %vm1403_vm8, %v1382_v55, %v1384_v58  ;;  %v1409_v13 = vsel %vm1403_vm8, %v1384_v58, %v1386_v56 }
 0x28b   : > { %1433 = vst.msk [vmem:[#allocation2 + $0x7a8] sm:$0xff] %vm189_vm0, %v1409_v13  ;;  %1649 = vrot.lane.b32.xlu1 %v7129_v57, %s6144_s29  ;;  %1647 = vrot.lane.b32.xlu0 %v7133_v8, %s6144_s29  ;;  %v5532_v5 = vpack.c.bf16 %v1408_v46, %v1405_v49 }
 0x28d   : > { %v1390_v62 = vpop.permute.xlu1 %1389  ;;  %v1388_v63 = vpop.permute.xlu0 %1387  ;;  %5533 = vmatprep.subr.bf16.mxu0 %v5532_v5 }
 0x28e   : > { %v1410_v7 = vsel %vm1403_vm8, %v1388_v63, %v1390_v62  ;;  %5535 = vmatpush1.bf16.msra.mxu0 %v5534_v61 }
 0x28f   : > { %1653 = vrot.lane.b32.xlu1 %v7139_v22, %s6144_s29  ;;  %1651 = vrot.lane.b32.xlu0 %v6214_v0, %s6144_s29 }
 0x291   : > { %v1394_v2 = vpop.permute.xlu1 %1393  ;;  %v1392_v15 = vpop.permute.xlu0 %1391 }
 0x292   : > { %v1411_v16 = vsel %vm1403_vm8, %v1390_v62, %v1392_v15  ;;  %v1412_v20 = vsel %vm1403_vm8, %v1392_v15, %v1394_v2 }
 0x293   : > { %1436 = vst.msk [vmem:[#allocation2 + $0x7c0] sm:$0xff] %vm189_vm0, %v1412_v20  ;;  %1657 = vrot.lane.b32.xlu1 %v7148_v29, %s6144_s29  ;;  %1655 = vrot.lane.b32.xlu0 %v7152_v30, %s6144_s29 }
 0x295   : > { %v1398_v21 = vpop.permute.xlu1 %1397  ;;  %v1396_v23 = vpop.permute.xlu0 %1395 }
 0x296   : > { %v1413_v25 = vsel %vm1403_vm8, %v1396_v23, %v1398_v21 }
 0x297   : > { %1661 = vrot.lane.b32.xlu1 %v7158_v37, %s6144_s29  ;;  %1659 = vrot.lane.b32.xlu0 %v6232_v4, %s6144_s29  ;;  %v5538_v39 = vpack.c.bf16 %v1413_v25, %v1410_v7 }
 0x299   : > { %v1402_v27 = vpop.permute.xlu1 %1401  ;;  %v1400_v28 = vpop.permute.xlu0 %1399 }
 0x29a   : > { %v1414_v34 = vsel %vm1403_vm8, %v1398_v21, %v1400_v28  ;;  %v1415_v12 = vsel %vm1403_vm8, %v1400_v28, %v1402_v27  ;;  %vm3180_vm8 = vcmask 965632  }
 0x29b   : > { %1439 = vst.msk [vmem:[#allocation2 + $0x7d8] sm:$0xff] %vm189_vm0, %v1415_v12  ;;  %1665 = vrot.lane.b32.xlu1 %v7167_v17, %s6144_s29  ;;  %1663 = vrot.lane.b32.xlu0 %v7171_v18, %s6144_s29  ;;  %v5536_v35 = vpack.c.bf16 %v1414_v34, %v1411_v16 }
 0x29d   : > { %v1443_v41 = vpop.permute.xlu1 %1442  ;;  %v1441_v43 = vpop.permute.xlu0 %1440  ;;  %5537 = vmatprep.subr.bf16.mxu0 %v5536_v35 }
 0x29e   : > { %v1473_v44 = vsel %vm1472_vm9, %v1441_v43, %v1443_v41  ;;  %5539 = vmatpush1.bf16.msra.mxu0 %v5538_v39 }
 0x29f   : > { %1669 = vrot.lane.b32.xlu1 %v7177_v3, %s6144_s29  ;;  %1667 = vrot.lane.b32.xlu0 %v6255_v9, %s6144_s29 }
 0x2a1   : > { %v1447_v47 = vpop.permute.xlu1 %1446  ;;  %v1445_v48 = vpop.permute.xlu0 %1444 }
 0x2a2   : > { %v1474_v19 = vsel %vm1472_vm9, %v1443_v41, %v1445_v48  ;;  %v1475_v49 = vsel %vm1472_vm9, %v1445_v48, %v1447_v47 }
 0x2a3   : > { %1499 = vst.msk [vmem:[#allocation2 + $0x7f0] sm:$0xff] %vm189_vm0, %v1475_v49  ;;  %1673 = vrot.lane.b32.xlu1 %v7115_v60, %s6144_s29  ;;  %1671 = vrot.lane.b32.xlu0 %v7188_v1, %s6144_s29 }
 0x2a5   : > { %v1451_v51 = vpop.permute.xlu1 %1450  ;;  %v1449_v55 = vpop.permute.xlu0 %1448 }
 0x2a6   : > { %v1476_v31 = vsel %vm1472_vm9, %v1449_v55, %v1451_v51 }
 0x2a7   : > { %1677 = vrot.lane.b32.xlu1 %v7194_v59, %s6144_s29  ;;  %1675 = vrot.lane.b32.xlu0 %v6258_v10, %s6144_s29  ;;  %v5542_v46 = vpack.c.bf16 %v1476_v31, %v1473_v44  ;;  %s6157_s29 = smov 18  }
 0x2a9   : > { %v1455_v32 = vpop.permute.xlu1 %1454  ;;  %v1453_v33 = vpop.permute.xlu0 %1452 }
 0x2aa   : > { %v1477_v56 = vsel %vm1472_vm9, %v1451_v51, %v1453_v33  ;;  %v1478_v58 = vsel %vm1472_vm9, %v1453_v33, %v1455_v32 }
 0x2ab   : > { %1502 = vst.msk [vmem:[#allocation2 + $0x808] sm:$0xff] %vm189_vm0, %v1478_v58  ;;  %1718 = vrot.lane.b32.xlu1 %v7129_v57, %s6145_s5  ;;  %1716 = vrot.lane.b32.xlu0 %v7133_v8, %s6145_s5  ;;  %v5540_v45 = vpack.c.bf16 %v1477_v56, %v1474_v19 }
 0x2ad   : > { %v1459_v13 = vpop.permute.xlu1 %1458  ;;  %v1457_v5 = vpop.permute.xlu0 %1456  ;;  %5541 = vmatprep.subr.bf16.mxu0 %v5540_v45 }
 0x2ae   : > { %v1479_v61 = vsel %vm1472_vm9, %v1457_v5, %v1459_v13  ;;  %5543 = vmatpush1.bf16.msra.mxu0 %v5542_v46 }
 0x2af   : > { %1722 = vrot.lane.b32.xlu1 %v7139_v22, %s6145_s5  ;;  %1720 = vrot.lane.b32.xlu0 %v6214_v0, %s6145_s5 }
 0x2b1   : > { %v1463_v6 = vpop.permute.xlu1 %1462  ;;  %v1461_v62 = vpop.permute.xlu0 %1460 }
 0x2b2   : > { %v1480_v63 = vsel %vm1472_vm9, %v1459_v13, %v1461_v62  ;;  %v1481_v7 = vsel %vm1472_vm9, %v1461_v62, %v1463_v6 }
 0x2b3   : > { %1505 = vst.msk [vmem:[#allocation2 + $0x820] sm:$0xff] %vm189_vm0, %v1481_v7  ;;  %1726 = vrot.lane.b32.xlu1 %v7148_v29, %s6145_s5  ;;  %1724 = vrot.lane.b32.xlu0 %v7152_v30, %s6145_s5 }
 0x2b5   : > { %v1467_v2 = vpop.permute.xlu1 %1466  ;;  %v1465_v15 = vpop.permute.xlu0 %1464 }
 0x2b6   : > { %v1482_v16 = vsel %vm1472_vm9, %v1465_v15, %v1467_v2 }
 0x2b7   : > { %1730 = vrot.lane.b32.xlu1 %v7158_v37, %s6145_s5  ;;  %1728 = vrot.lane.b32.xlu0 %v6232_v4, %s6145_s5  ;;  %v5546_v28 = vpack.c.bf16 %v1482_v16, %v1479_v61 }
 0x2b9   : > { %v1471_v20 = vpop.permute.xlu1 %1470  ;;  %v1469_v21 = vpop.permute.xlu0 %1468 }
 0x2ba   : > { %v1483_v23 = vsel %vm1472_vm9, %v1467_v2, %v1469_v21  ;;  %v1484_v25 = vsel %vm1472_vm9, %v1469_v21, %v1471_v20 }
 0x2bb   : > { %1508 = vst.msk [vmem:[#allocation2 + $0x838] sm:$0xff] %vm189_vm0, %v1484_v25  ;;  %1734 = vrot.lane.b32.xlu1 %v7167_v17, %s6145_s5  ;;  %1732 = vrot.lane.b32.xlu0 %v7171_v18, %s6145_s5  ;;  %v5544_v27 = vpack.c.bf16 %v1483_v23, %v1480_v63 }
 0x2bd   : > { %v1512_v34 = vpop.permute.xlu1 %1511  ;;  %v1510_v12 = vpop.permute.xlu0 %1509  ;;  %5545 = vmatprep.subr.bf16.mxu0 %v5544_v27 }
 0x2be   : > { %v1542_v35 = vsel %vm1541_vm10, %v1510_v12, %v1512_v34  ;;  %5547 = vmatpush1.bf16.msra.mxu0 %v5546_v28 }
 0x2bf   : > { %1738 = vrot.lane.b32.xlu1 %v7177_v3, %s6145_s5  ;;  %1736 = vrot.lane.b32.xlu0 %v6255_v9, %s6145_s5 }
 0x2c1   : > { %v1516_v39 = vpop.permute.xlu1 %1515  ;;  %v1514_v41 = vpop.permute.xlu0 %1513 }
 0x2c2   : > { %v1543_v43 = vsel %vm1541_vm10, %v1512_v34, %v1514_v41  ;;  %v1544_v44 = vsel %vm1541_vm10, %v1514_v41, %v1516_v39 }
 0x2c3   : > { %1568 = vst.msk [vmem:[#allocation2 + $0x850] sm:$0xff] %vm189_vm0, %v1544_v44  ;;  %1742 = vrot.lane.b32.xlu1 %v7115_v60, %s6145_s5  ;;  %1740 = vrot.lane.b32.xlu0 %v7188_v1, %s6145_s5 }
 0x2c5   : > { %v1520_v47 = vpop.permute.xlu1 %1519  ;;  %v1518_v48 = vpop.permute.xlu0 %1517 }
 0x2c6   : > { %v1545_v19 = vsel %vm1541_vm10, %v1518_v48, %v1520_v47 }
 0x2c7   : > { %1746 = vrot.lane.b32.xlu1 %v7194_v59, %s6145_s5  ;;  %1744 = vrot.lane.b32.xlu0 %v6258_v10, %s6145_s5  ;;  %v5550_v33 = vpack.c.bf16 %v1545_v19, %v1542_v35  ;;  %s6175_s5 = smov 44  }
 0x2c9   : > { %v1524_v49 = vpop.permute.xlu1 %1523  ;;  %v1522_v51 = vpop.permute.xlu0 %1521 }
 0x2ca   : > { %v1546_v55 = vsel %vm1541_vm10, %v1520_v47, %v1522_v51  ;;  %v1547_v31 = vsel %vm1541_vm10, %v1522_v51, %v1524_v49 }
 0x2cb   : > { %1571 = vst.msk [vmem:[#allocation2 + $0x868] sm:$0xff] %vm189_vm0, %v1547_v31  ;;  %1787 = vrot.lane.b32.xlu1 %v7129_v57, %s6146_s6  ;;  %1785 = vrot.lane.b32.xlu0 %v7133_v8, %s6146_s6  ;;  %v5548_v32 = vpack.c.bf16 %v1546_v55, %v1543_v43 }
 0x2cd   : > { %v1528_v56 = vpop.permute.xlu1 %1527  ;;  %v1526_v58 = vpop.permute.xlu0 %1525  ;;  %5549 = vmatprep.subr.bf16.mxu0 %v5548_v32 }
 0x2ce   : > { %v1548_v45 = vsel %vm1541_vm10, %v1526_v58, %v1528_v56  ;;  %5551 = vmatpush1.bf16.msra.mxu0 %v5550_v33 }
 0x2cf   : > { %1791 = vrot.lane.b32.xlu1 %v7139_v22, %s6146_s6  ;;  %1789 = vrot.lane.b32.xlu0 %v6214_v0, %s6146_s6 }
 0x2d1   : > { %v1532_v46 = vpop.permute.xlu1 %1531  ;;  %v1530_v13 = vpop.permute.xlu0 %1529 }
 0x2d2   : > { %v1549_v5 = vsel %vm1541_vm10, %v1528_v56, %v1530_v13  ;;  %v1550_v61 = vsel %vm1541_vm10, %v1530_v13, %v1532_v46 }
 0x2d3   : > { %1574 = vst.msk [vmem:[#allocation2 + $0x880] sm:$0xff] %vm189_vm0, %v1550_v61  ;;  %1795 = vrot.lane.b32.xlu1 %v7148_v29, %s6146_s6  ;;  %1793 = vrot.lane.b32.xlu0 %v7152_v30, %s6146_s6 }
 0x2d5   : > { %v1536_v6 = vpop.permute.xlu1 %1535  ;;  %v1534_v62 = vpop.permute.xlu0 %1533 }
 0x2d6   : > { %v1551_v63 = vsel %vm1541_vm10, %v1534_v62, %v1536_v6 }
 0x2d7   : > { %1799 = vrot.lane.b32.xlu1 %v7158_v37, %s6146_s6  ;;  %1797 = vrot.lane.b32.xlu0 %v6232_v4, %s6146_s6  ;;  %v5554_v21 = vpack.c.bf16 %v1551_v63, %v1548_v45 }
 0x2d9   : > { %v1540_v7 = vpop.permute.xlu1 %1539  ;;  %v1538_v2 = vpop.permute.xlu0 %1537 }
 0x2da   : > { %v1552_v15 = vsel %vm1541_vm10, %v1536_v6, %v1538_v2  ;;  %v1553_v16 = vsel %vm1541_vm10, %v1538_v2, %v1540_v7  ;;  %vm3827_vm10 = vcmask 261120  }
 0x2db   : > { %1577 = vst.msk [vmem:[#allocation2 + $0x898] sm:$0xff] %vm189_vm0, %v1553_v16  ;;  %1803 = vrot.lane.b32.xlu1 %v7167_v17, %s6146_s6  ;;  %1801 = vrot.lane.b32.xlu0 %v7171_v18, %s6146_s6  ;;  %v5552_v20 = vpack.c.bf16 %v1552_v15, %v1549_v5 }
 0x2dd   : > { %v1581_v23 = vpop.permute.xlu1 %1580  ;;  %v1579_v25 = vpop.permute.xlu0 %1578  ;;  %5553 = vmatprep.subr.bf16.mxu0 %v5552_v20 }
 0x2de   : > { %v1611_v27 = vsel %vm1610_vm11, %v1579_v25, %v1581_v23  ;;  %5555 = vmatpush1.bf16.msra.mxu0 %v5554_v21  ;;  %v3217_v21 = vld [vmem:[%s8863_s1 + $0x20] sm:$0xff] }
 0x2df   : > { %1807 = vrot.lane.b32.xlu1 %v7177_v3, %s6146_s6  ;;  %1805 = vrot.lane.b32.xlu0 %v6255_v9, %s6146_s6 }
 0x2e1   : > { %v1585_v28 = vpop.permute.xlu1 %1584  ;;  %v1583_v34 = vpop.permute.xlu0 %1582 }
 0x2e2   : > { %v1612_v12 = vsel %vm1610_vm11, %v1581_v23, %v1583_v34  ;;  %v1613_v35 = vsel %vm1610_vm11, %v1583_v34, %v1585_v28 }
 0x2e3   : > { %1637 = vst.msk [vmem:[#allocation2 + $0x8b0] sm:$0xff] %vm189_vm0, %v1613_v35  ;;  %1811 = vrot.lane.b32.xlu1 %v7115_v60, %s6146_s6  ;;  %1809 = vrot.lane.b32.xlu0 %v7188_v1, %s6146_s6 }
 0x2e5   : > { %v1589_v39 = vpop.permute.xlu1 %1588  ;;  %v1587_v41 = vpop.permute.xlu0 %1586 }
 0x2e6   : > { %v1614_v43 = vsel %vm1610_vm11, %v1587_v41, %v1589_v39 }
 0x2e7   : > { %1815 = vrot.lane.b32.xlu1 %v7194_v59, %s6146_s6  ;;  %1813 = vrot.lane.b32.xlu0 %v6258_v10, %s6146_s6  ;;  %v5558_v51 = vpack.c.bf16 %v1614_v43, %v1611_v27  ;;  %s6160_s6 = smov 15  }
 0x2e9   : > { %v1593_v44 = vpop.permute.xlu1 %1592  ;;  %v1591_v47 = vpop.permute.xlu0 %1590 }
 0x2ea   : > { %v1615_v48 = vsel %vm1610_vm11, %v1589_v39, %v1591_v47  ;;  %v1616_v19 = vsel %vm1610_vm11, %v1591_v47, %v1593_v44 }
 0x2eb   : > { %1640 = vst.msk [vmem:[#allocation2 + $0x8c8] sm:$0xff] %vm189_vm0, %v1616_v19  ;;  %1856 = vrot.lane.b32.xlu1 %v7129_v57, %s6147_s7  ;;  %1854 = vrot.lane.b32.xlu0 %v7133_v8, %s6147_s7  ;;  %v5556_v49 = vpack.c.bf16 %v1615_v48, %v1612_v12 }
 0x2ed   : > { %v1597_v55 = vpop.permute.xlu1 %1596  ;;  %v1595_v31 = vpop.permute.xlu0 %1594  ;;  %5557 = vmatprep.subr.bf16.mxu0 %v5556_v49 }
 0x2ee   : > { %v1617_v32 = vsel %vm1610_vm11, %v1595_v31, %v1597_v55  ;;  %5559 = vmatpush1.bf16.msra.mxu0 %v5558_v51 }
 0x2ef   : > { %1860 = vrot.lane.b32.xlu1 %v7139_v22, %s6147_s7  ;;  %1858 = vrot.lane.b32.xlu0 %v6214_v0, %s6147_s7 }
 0x2f1   : > { %v1601_v33 = vpop.permute.xlu1 %1600  ;;  %v1599_v56 = vpop.permute.xlu0 %1598 }
 0x2f2   : > { %v1618_v58 = vsel %vm1610_vm11, %v1597_v55, %v1599_v56  ;;  %v1619_v45 = vsel %vm1610_vm11, %v1599_v56, %v1601_v33 }
 0x2f3   : > { %1643 = vst.msk [vmem:[#allocation2 + $0x8e0] sm:$0xff] %vm189_vm0, %v1619_v45  ;;  %1864 = vrot.lane.b32.xlu1 %v7148_v29, %s6147_s7  ;;  %1862 = vrot.lane.b32.xlu0 %v7152_v30, %s6147_s7 }
 0x2f5   : > { %v1605_v46 = vpop.permute.xlu1 %1604  ;;  %v1603_v13 = vpop.permute.xlu0 %1602 }
 0x2f6   : > { %v1620_v5 = vsel %vm1610_vm11, %v1603_v13, %v1605_v46 }
 0x2f7   : > { %1868 = vrot.lane.b32.xlu1 %v7158_v37, %s6147_s7  ;;  %1866 = vrot.lane.b32.xlu0 %v6232_v4, %s6147_s7  ;;  %v5562_v2 = vpack.c.bf16 %v1620_v5, %v1617_v32 }
 0x2f9   : > { %v1609_v61 = vpop.permute.xlu1 %1608  ;;  %v1607_v6 = vpop.permute.xlu0 %1606 }
 0x2fa   : > { %v1621_v62 = vsel %vm1610_vm11, %v1605_v46, %v1607_v6  ;;  %v1622_v63 = vsel %vm1610_vm11, %v1607_v6, %v1609_v61  ;;  %vm2162_vm11 = vcmask 302080  }
 0x2fb   : > { %1646 = vst.msk [vmem:[#allocation2 + $0x8f8] sm:$0xff] %vm189_vm0, %v1622_v63  ;;  %1872 = vrot.lane.b32.xlu1 %v7167_v17, %s6147_s7  ;;  %1870 = vrot.lane.b32.xlu0 %v7171_v18, %s6147_s7  ;;  %v5560_v7 = vpack.c.bf16 %v1621_v62, %v1618_v58 }
 0x2fd   : > { %v1650_v15 = vpop.permute.xlu1 %1649  ;;  %v1648_v16 = vpop.permute.xlu0 %1647  ;;  %5561 = vmatprep.subr.bf16.mxu0 %v5560_v7 }
 0x2fe   : > { %v1680_v20 = vsel %vm1679_vm12, %v1648_v16, %v1650_v15  ;;  %5563 = vmatpush1.bf16.msra.mxu0 %v5562_v2 }
 0x2ff   : > { %1876 = vrot.lane.b32.xlu1 %v7177_v3, %s6147_s7  ;;  %1874 = vrot.lane.b32.xlu0 %v6255_v9, %s6147_s7 }
 0x301   : > { %v1654_v23 = vpop.permute.xlu1 %1653  ;;  %v1652_v25 = vpop.permute.xlu0 %1651  ;;  %4053 = vmatmul.mubr.f32.vlgmr.msra.gmra.mrb[0].mxu0 %v3217_v21 }
 0x302   : > { %v1681_v27 = vsel %vm1679_vm12, %v1650_v15, %v1652_v25  ;;  %v1682_v28 = vsel %vm1679_vm12, %v1652_v25, %v1654_v23 }
 0x303   : > { %1706 = vst.msk [vmem:[#allocation2 + $0x910] sm:$0xff] %vm189_vm0, %v1682_v28  ;;  %1880 = vrot.lane.b32.xlu1 %v7115_v60, %s6147_s7  ;;  %1878 = vrot.lane.b32.xlu0 %v7188_v1, %s6147_s7 }
 0x305   : > { %v1658_v34 = vpop.permute.xlu1 %1657  ;;  %v1656_v12 = vpop.permute.xlu0 %1655 }
 0x306   : > { %v1683_v35 = vsel %vm1679_vm12, %v1656_v12, %v1658_v34 }
 0x307   : > { %1884 = vrot.lane.b32.xlu1 %v7194_v59, %s6147_s7  ;;  %1882 = vrot.lane.b32.xlu0 %v6258_v10, %s6147_s7  ;;  %v5566_v48 = vpack.c.bf16 %v1683_v35, %v1680_v20 }
 0x309   : > { %v1662_v39 = vpop.permute.xlu1 %1661  ;;  %v1660_v41 = vpop.permute.xlu0 %1659 }
 0x30a   : > { %v1684_v43 = vsel %vm1679_vm12, %v1658_v34, %v1660_v41  ;;  %v1685_v44 = vsel %vm1679_vm12, %v1660_v41, %v1662_v39 }
 0x30b   : > { %1709 = vst.msk [vmem:[#allocation2 + $0x928] sm:$0xff] %vm189_vm0, %v1685_v44  ;;  %1925 = vrot.lane.b32.xlu1 %v7129_v57, %s6148_s11  ;;  %1923 = vrot.lane.b32.xlu0 %v7133_v8, %s6148_s11  ;;  %v5564_v47 = vpack.c.bf16 %v1684_v43, %v1681_v27 }
 0x30d   : > { %v1666_v19 = vpop.permute.xlu1 %1665  ;;  %v1664_v49 = vpop.permute.xlu0 %1663  ;;  %5565 = vmatprep.subr.bf16.mxu0 %v5564_v47 }
 0x30e   : > { %v1686_v51 = vsel %vm1679_vm12, %v1664_v49, %v1666_v19  ;;  %5567 = vmatpush1.bf16.msra.mxu0 %v5566_v48 }
 0x30f   : > { %1929 = vrot.lane.b32.xlu1 %v7139_v22, %s6148_s11  ;;  %1927 = vrot.lane.b32.xlu0 %v6214_v0, %s6148_s11 }
 0x311   : > { %v1670_v55 = vpop.permute.xlu1 %1669  ;;  %v1668_v31 = vpop.permute.xlu0 %1667 }
 0x312   : > { %v1687_v32 = vsel %vm1679_vm12, %v1666_v19, %v1668_v31  ;;  %v1688_v33 = vsel %vm1679_vm12, %v1668_v31, %v1670_v55 }
 0x313   : > { %1712 = vst.msk [vmem:[#allocation2 + $0x940] sm:$0xff] %vm189_vm0, %v1688_v33  ;;  %1933 = vrot.lane.b32.xlu1 %v7148_v29, %s6148_s11  ;;  %1931 = vrot.lane.b32.xlu0 %v7152_v30, %s6148_s11 }
 0x315   : > { %v1674_v56 = vpop.permute.xlu1 %1673  ;;  %v1672_v58 = vpop.permute.xlu0 %1671 }
 0x316   : > { %v1689_v45 = vsel %vm1679_vm12, %v1672_v58, %v1674_v56 }
 0x317   : > { %1937 = vrot.lane.b32.xlu1 %v7158_v37, %s6148_s11  ;;  %1935 = vrot.lane.b32.xlu0 %v6232_v4, %s6148_s11  ;;  %v5570_v62 = vpack.c.bf16 %v1689_v45, %v1686_v51 }
 0x319   : > { %v1678_v46 = vpop.permute.xlu1 %1677  ;;  %v1676_v13 = vpop.permute.xlu0 %1675 }
 0x31a   : > { %v1690_v5 = vsel %vm1679_vm12, %v1674_v56, %v1676_v13  ;;  %v1691_v61 = vsel %vm1679_vm12, %v1676_v13, %v1678_v46  ;;  %v7539_v46 = vld [vmem:[#allocation2 + $0x50] sm:$0xff]  ;;  %vm2231_vm12 = vcmask 293888  }
 0x31b   : > { %1715 = vst.msk [vmem:[#allocation2 + $0x958] sm:$0xff] %vm189_vm0, %v1691_v61  ;;  %1941 = vrot.lane.b32.xlu1 %v7167_v17, %s6148_s11  ;;  %1939 = vrot.lane.b32.xlu0 %v7171_v18, %s6148_s11  ;;  %v5568_v6 = vpack.c.bf16 %v1690_v5, %v1687_v32 }
 0x31d   : > { %v1719_v63 = vpop.permute.xlu1 %1718  ;;  %v1717_v7 = vpop.permute.xlu0 %1716  ;;  %5569 = vmatprep.subr.bf16.mxu0 %v5568_v6 }
 0x31e   : > { %v1749_v2 = vsel %vm1748_vm13, %v1717_v7, %v1719_v63  ;;  %5571 = vmatpush1.bf16.msra.mxu0 %v5570_v62  ;;  %v7557_v7 = vld [vmem:[#allocation2] sm:$0xff] }
 0x31f   : > { %1945 = vrot.lane.b32.xlu1 %v7177_v3, %s6148_s11  ;;  %1943 = vrot.lane.b32.xlu0 %v6255_v9, %s6148_s11 }
 0x321   : > { %v1723_v15 = vpop.permute.xlu1 %1722  ;;  %v1721_v16 = vpop.permute.xlu0 %1720 }
 0x322   : > { %v1750_v20 = vsel %vm1748_vm13, %v1719_v63, %v1721_v16  ;;  %v1751_v21 = vsel %vm1748_vm13, %v1721_v16, %v1723_v15 }
 0x323   : > { %1775 = vst.msk [vmem:[#allocation2 + $0x970] sm:$0xff] %vm189_vm0, %v1751_v21  ;;  %1949 = vrot.lane.b32.xlu1 %v7115_v60, %s6148_s11  ;;  %1947 = vrot.lane.b32.xlu0 %v7188_v1, %s6148_s11  ;;  %v7563_v21 = vld [vmem:[%s6211_s17 + $0x18] sm:$0xff] }
 0x325   : > { %v1727_v23 = vpop.permute.xlu1 %1726  ;;  %v1725_v25 = vpop.permute.xlu0 %1724 }
 0x326   : > { %v1752_v27 = vsel %vm1748_vm13, %v1725_v25, %v1727_v23 }
 0x327   : > { %1953 = vrot.lane.b32.xlu1 %v7194_v59, %s6148_s11  ;;  %1951 = vrot.lane.b32.xlu0 %v6258_v10, %s6148_s11  ;;  %v5574_v39 = vpack.c.bf16 %v1752_v27, %v1749_v2 }
 0x329   : > { %v1731_v28 = vpop.permute.xlu1 %1730  ;;  %v1729_v34 = vpop.permute.xlu0 %1728 }
 0x32a   : > { %v1753_v12 = vsel %vm1748_vm13, %v1727_v23, %v1729_v34  ;;  %v1754_v35 = vsel %vm1748_vm13, %v1729_v34, %v1731_v28  ;;  %v7572_v34 = vld [vmem:[#allocation2 + $0x20] sm:$0xff] }
 0x32b   : > { %1778 = vst.msk [vmem:[#allocation2 + $0x988] sm:$0xff] %vm189_vm0, %v1754_v35  ;;  %1994 = vrot.lane.b32.xlu1 %v7129_v57, %s6149_s14  ;;  %1992 = vrot.lane.b32.xlu0 %v7133_v8, %s6149_s14  ;;  %v5572_v60 = vpack.c.bf16 %v1753_v12, %v1750_v20  ;;  %v7576_v12 = vld [vmem:[#allocation2 + $0x18] sm:$0xff] }
 0x32d   : > { %v1735_v41 = vpop.permute.xlu1 %1734  ;;  %v1733_v43 = vpop.permute.xlu0 %1732  ;;  %5573 = vmatprep.subr.bf16.mxu0 %v5572_v60 }
 0x32e   : > { %v1755_v44 = vsel %vm1748_vm13, %v1733_v43, %v1735_v41  ;;  %5575 = vmatpush1.bf16.msra.mxu0 %v5574_v39  ;;  %v7591_v43 = vld [vmem:[%s8863_s1 + $0x8] sm:$0xff] }
 0x32f   : > { %1998 = vrot.lane.b32.xlu1 %v7139_v22, %s6149_s14  ;;  %1996 = vrot.lane.b32.xlu0 %v6214_v0, %s6149_s14 }
 0x330   : > { %3898 = vmatprep.mubr.f32.mxu1 %v7591_v43 }
 0x331   : > { %v1739_v47 = vpop.permute.xlu1 %1738  ;;  %v1737_v48 = vpop.permute.xlu0 %1736 }
 0x332   : > { %v1756_v57 = vsel %vm1748_vm13, %v1735_v41, %v1737_v48  ;;  %v1757_v8 = vsel %vm1748_vm13, %v1737_v48, %v1739_v47  ;;  %v7582_v41 = vld [vmem:[%s6211_s17 + $0x38] sm:$0xff] }
 0x333   : > { %1781 = vst.msk [vmem:[#allocation2 + $0x9a0] sm:$0xff] %vm189_vm0, %v1757_v8  ;;  %2002 = vrot.lane.b32.xlu1 %v7148_v29, %s6149_s14  ;;  %2000 = vrot.lane.b32.xlu0 %v7152_v30, %s6149_s14 }
 0x335   : > { %v1743_v19 = vpop.permute.xlu1 %1742  ;;  %v1741_v49 = vpop.permute.xlu0 %1740 }
 0x336   : > { %v1758_v22 = vsel %vm1748_vm13, %v1741_v49, %v1743_v19 }
 0x337   : > { %2006 = vrot.lane.b32.xlu1 %v7158_v37, %s6149_s14  ;;  %2004 = vrot.lane.b32.xlu0 %v6232_v4, %s6149_s14  ;;  %v5578_v30 = vpack.c.bf16 %v1758_v22, %v1755_v44  ;;  %v7597_v44 = vld [vmem:[%s8863_s1] sm:$0xff] }
 0x338   : > { %3899 = vmatmul.mubr.f32.vlgmr.msra.gmra.mrb[0].mxu1 %v7597_v44 }
 0x339   : > { %v1747_v51 = vpop.permute.xlu1 %1746  ;;  %v1745_v55 = vpop.permute.xlu0 %1744 }
 0x33a   : > { %v1759_v31 = vsel %vm1748_vm13, %v1743_v19, %v1745_v55  ;;  %v1760_v32 = vsel %vm1748_vm13, %v1745_v55, %v1747_v51  ;;  %vm2300_vm13 = vcmask 285696  }
 0x33b   : > { %1784 = vst.msk [vmem:[#allocation2 + $0x9b8] sm:$0xff] %vm189_vm0, %v1760_v32  ;;  %2010 = vrot.lane.b32.xlu1 %v7167_v17, %s6149_s14  ;;  %2008 = vrot.lane.b32.xlu0 %v7171_v18, %s6149_s14  ;;  %v5576_v29 = vpack.c.bf16 %v1759_v31, %v1756_v57 }
 0x33d   : > { %v1788_v37 = vpop.permute.xlu1 %1787  ;;  %v1786_v33 = vpop.permute.xlu0 %1785  ;;  %5577 = vmatprep.subr.bf16.mxu0 %v5576_v29 }
 0x33e   : > { %v1818_v56 = vsel %vm1817_vm14, %v1786_v33, %v1788_v37  ;;  %5579 = vmatpush1.bf16.msra.mxu0 %v5578_v30  ;;  %v7628_v33 = vld [vmem:[%s8863_s1 + $0x68] sm:$0xf] }
 0x33f   : > { %2014 = vrot.lane.b32.xlu1 %v7177_v3, %s6149_s14  ;;  %2012 = vrot.lane.b32.xlu0 %v6255_v9, %s6149_s14 }
 0x341   : > { %v1792_v58 = vpop.permute.xlu1 %1791  ;;  %v1790_v17 = vpop.permute.xlu0 %1789 }
 0x342   : > { %v1819_v45 = vsel %vm1817_vm14, %v1788_v37, %v1790_v17  ;;  %v1820_v18 = vsel %vm1817_vm14, %v1790_v17, %v1792_v58  ;;  %v7622_v37 = vld [vmem:[%s8863_s1 + $0x70] sm:$0xf] }
 0x343   : > { %1844 = vst.msk [vmem:[#allocation2 + $0x9d0] sm:$0xff] %vm189_vm0, %v1820_v18  ;;  %2018 = vrot.lane.b32.xlu1 %v7539_v46, %s6149_s14  ;;  %2016 = vrot.lane.b32.xlu0 %v7188_v1, %s6149_s14  ;;  %v7553_v1 = vld [vmem:[#allocation2 + $0x8] sm:$0xff]  ;;  %v6152_v18 = vmov 0.0  }
 0x344   : > { %3904 = vmatprep.mubr.f32.mxu1 %v7622_v37 }
 0x345   : > { %v1796_v3 = vpop.permute.xlu1 %1795  ;;  %v1794_v13 = vpop.permute.xlu0 %1793  ;;  %3905 = vmatmul.mubr.f32.gmra.mrb[2].mxu1 %v7628_v33 }
 0x346   : > { %v1821_v5 = vsel %vm1817_vm14, %v1794_v13, %v1796_v3  ;;  %4360 = vmatprep.mubr.f32.mxu1 %v6152_v18 }
 0x347   : > { %2022 = vrot.lane.b32.xlu1 %v7194_v59, %s6149_s14  ;;  %2020 = vrot.lane.b32.xlu0 %v6258_v10, %s6149_s14  ;;  %v5582_v2 = vpack.c.bf16 %v1821_v5, %v1818_v56 }
 0x349   : > { %v1800_v61 = vpop.permute.xlu1 %1799  ;;  %v1798_v6 = vpop.permute.xlu0 %1797 }
 0x34a   : > { %v1822_v62 = vsel %vm1817_vm14, %v1796_v3, %v1798_v6  ;;  %v1823_v63 = vsel %vm1817_vm14, %v1798_v6, %v1800_v61  ;;  %v7644_v6 = vld [vmem:[%s6211_s17 + $0x78] sm:$0xff] }
 0x34b   : > { %1847 = vst.msk [vmem:[#allocation2 + $0x9e8] sm:$0xff] %vm189_vm0, %v1823_v63  ;;  %2063 = vrot.lane.b32.xlu1 %v7553_v1, %s6150_s15  ;;  %2061 = vrot.lane.b32.xlu0 %v7557_v7, %s6150_s15  ;;  %v5580_v59 = vpack.c.bf16 %v1822_v62, %v1819_v45  ;;  %v7633_v45 = vld [vmem:[%s6211_s17 + $0x58] sm:$0xff] }
 0x34d   : > { %v1804_v15 = vpop.permute.xlu1 %1803  ;;  %v1802_v16 = vpop.permute.xlu0 %1801  ;;  %5581 = vmatprep.subr.bf16.mxu0 %v5580_v59 }
 0x34e   : > { %v1824_v20 = vsel %vm1817_vm14, %v1802_v16, %v1804_v15  ;;  %5583 = vmatpush1.bf16.msra.mxu0 %v5582_v2  ;;  %v7653_v16 = vld [vmem:[#allocation2 + $0x38] sm:$0xff] }
 0x34f   : > { %2067 = vrot.lane.b32.xlu1 %v7563_v21, %s6150_s15  ;;  %2065 = vrot.lane.b32.xlu0 %v6214_v0, %s6150_s15 }
 0x351   : > { %v1808_v23 = vpop.permute.xlu1 %1807  ;;  %v1806_v25 = vpop.permute.xlu0 %1805 }
 0x352   : > { %v1825_v27 = vsel %vm1817_vm14, %v1804_v15, %v1806_v25  ;;  %v1826_v28 = vsel %vm1817_vm14, %v1806_v25, %v1808_v23 }
 0x353   : > { %1850 = vst.msk [vmem:[#allocation2 + $0xa00] sm:$0xff] %vm189_vm0, %v1826_v28  ;;  %2071 = vrot.lane.b32.xlu1 %v7572_v34, %s6150_s15  ;;  %2069 = vrot.lane.b32.xlu0 %v7576_v12, %s6150_s15  ;;  %v7662_v28 = vld [vmem:[#allocation2 + $0x30] sm:$0xff] }
 0x355   : > { %v1812_v35 = vpop.permute.xlu1 %1811  ;;  %v1810_v60 = vpop.permute.xlu0 %1809 }
 0x356   : > { %v1827_v39 = vsel %vm1817_vm14, %v1810_v60, %v1812_v35 }
 0x357   : > { %2075 = vrot.lane.b32.xlu1 %v7582_v41, %s6150_s15  ;;  %2073 = vrot.lane.b32.xlu0 %v6232_v4, %s6150_s15  ;;  %v5586_v49 = vpack.c.bf16 %v1827_v39, %v1824_v20 }
 0x359   : > { %v1816_v47 = vpop.permute.xlu1 %1815  ;;  %v1814_v48 = vpop.permute.xlu0 %1813 }
 0x35a   : > { %v1828_v57 = vsel %vm1817_vm14, %v1812_v35, %v1814_v48  ;;  %v1829_v8 = vsel %vm1817_vm14, %v1814_v48, %v1816_v47  ;;  %vm2369_vm14 = vcmask 277504  }
 0x35b   : > { %1853 = vst.msk [vmem:[#allocation2 + $0xa18] sm:$0xff] %vm189_vm0, %v1829_v8  ;;  %3160 = vrot.lane.b32.xlu1 %v7563_v21, %s6151_s25  ;;  %3158 = vrot.lane.b32.xlu0 %v6214_v0, %s6151_s25  ;;  %v5584_v19 = vpack.c.bf16 %v1828_v57, %v1825_v27 }
 0x35d   : > { %v1857_v22 = vpop.permute.xlu1 %1856  ;;  %v1855_v51 = vpop.permute.xlu0 %1854  ;;  %5585 = vmatprep.subr.bf16.mxu0 %v5584_v19  ;;  %v7676_v19 = vld [vmem:[#allocation2 + $0x48] sm:$0xff] }
 0x35e   : > { %v1887_v55 = vsel %vm1886_vm15, %v1855_v51, %v1857_v22  ;;  %5587 = vmatpush1.bf16.msra.mxu0 %v5586_v49 }
 0x35f   : > { %3166 = vrot.lane.b32.xlu1 %v7582_v41, %s6151_s25  ;;  %3164 = vrot.lane.b32.xlu0 %v6232_v4, %s6151_s25 }
 0x361   : > { %v1861_v31 = vpop.permute.xlu1 %1860  ;;  %v1859_v32 = vpop.permute.xlu0 %1858 }
 0x362   : > { %v1888_v29 = vsel %vm1886_vm15, %v1857_v22, %v1859_v32  ;;  %v1889_v30 = vsel %vm1886_vm15, %v1859_v32, %v1861_v31 }
 0x363   : > { %1913 = vst.msk [vmem:[#allocation2 + $0xa30] sm:$0xff] %vm189_vm0, %v1889_v30  ;;  %3162 = vrot.lane.b32.xlu1 %v7572_v34, %s6151_s25  ;;  %3156 = vrot.lane.b32.xlu0 %v7553_v1, %s6151_s25 }
 0x365   : > { %v1865_v56 = vpop.permute.xlu1 %1864  ;;  %v1863_v58 = vpop.permute.xlu0 %1862 }
 0x366   : > { %v1890_v17 = vsel %vm1886_vm15, %v1863_v58, %v1865_v56 }
 0x367   : > { %3172 = vrot.lane.b32.xlu1 %v7633_v45, %s6151_s25  ;;  %3170 = vrot.lane.b32.xlu0 %v6255_v9, %s6151_s25  ;;  %v5590_v63 = vpack.c.bf16 %v1890_v17, %v1887_v55 }
 0x369   : > { %v1869_v3 = vpop.permute.xlu1 %1868  ;;  %v1867_v13 = vpop.permute.xlu0 %1866 }
 0x36a   : > { %v1891_v5 = vsel %vm1886_vm15, %v1865_v56, %v1867_v13  ;;  %v1892_v61 = vsel %vm1886_vm15, %v1867_v13, %v1869_v3 }
 0x36b   : > { %1916 = vst.msk [vmem:[#allocation2 + $0xa48] sm:$0xff] %vm189_vm0, %v1892_v61  ;;  %3178 = vrot.lane.b32.xlu1 %v7644_v6, %s6151_s25  ;;  %3176 = vrot.lane.b32.xlu0 %v6258_v10, %s6151_s25  ;;  %v5588_v62 = vpack.c.bf16 %v1891_v5, %v1888_v29 }
 0x36d   : > { %v1873_v59 = vpop.permute.xlu1 %1872  ;;  %v1871_v2 = vpop.permute.xlu0 %1870  ;;  %5589 = vmatprep.subr.bf16.mxu0 %v5588_v62 }
 0x36e   : > { %v1893_v15 = vsel %vm1886_vm15, %v1871_v2, %v1873_v59  ;;  %5591 = vmatpush1.bf16.msra.mxu0 %v5590_v63 }
 0x36f   : > { %3174 = vrot.lane.b32.xlu1 %v7539_v46, %s6151_s25  ;;  %3168 = vrot.lane.b32.xlu0 %v7653_v16, %s6151_s25  ;;  %s6161_s25 = smov 14  }
 0x371   : > { %v1877_v20 = vpop.permute.xlu1 %1876  ;;  %v1875_v23 = vpop.permute.xlu0 %1874 }
 0x372   : > { %v1894_v25 = vsel %vm1886_vm15, %v1873_v59, %v1875_v23  ;;  %v1895_v27 = vsel %vm1886_vm15, %v1875_v23, %v1877_v20 }
 0x373   : > { %1919 = vst.msk [vmem:[#allocation2 + $0xa60] sm:$0xff] %vm189_vm0, %v1895_v27  ;;  %2079 = vrot.lane.b32.xlu1 %v7653_v16, %s6150_s15  ;;  %2077 = vrot.lane.b32.xlu0 %v7662_v28, %s6150_s15 }
 0x375   : > { %v1881_v35 = vpop.permute.xlu1 %1880  ;;  %v1879_v60 = vpop.permute.xlu0 %1878 }
 0x376   : > { %v1896_v39 = vsel %vm1886_vm15, %v1879_v60, %v1881_v35 }
 0x377   : > { %2083 = vrot.lane.b32.xlu1 %v7633_v45, %s6150_s15  ;;  %2081 = vrot.lane.b32.xlu0 %v6255_v9, %s6150_s15  ;;  %v5594_v22 = vpack.c.bf16 %v1896_v39, %v1893_v15 }
 0x379   : > { %v1885_v47 = vpop.permute.xlu1 %1884  ;;  %v1883_v48 = vpop.permute.xlu0 %1882 }
 0x37a   : > { %v1897_v57 = vsel %vm1886_vm15, %v1881_v35, %v1883_v48  ;;  %v1898_v8 = vsel %vm1886_vm15, %v1883_v48, %v1885_v47  ;;  %vm2438_vm15 = vcmask 146432  }
 0x37b   : > { %1922 = vst.msk [vmem:[#allocation2 + $0xa78] sm:$0xff] %vm189_vm0, %v1898_v8  ;;  %2087 = vrot.lane.b32.xlu1 %v7539_v46, %s6150_s15  ;;  %2085 = vrot.lane.b32.xlu0 %v7676_v19, %s6150_s15  ;;  %v5592_v49 = vpack.c.bf16 %v1897_v57, %v1894_v25 }
 0x37d   : > { %v1926_v51 = vpop.permute.xlu1 %1925  ;;  %v1924_v55 = vpop.permute.xlu0 %1923  ;;  %5593 = vmatprep.subr.bf16.mxu0 %v5592_v49  ;;  %v3231_v49 = vld [vmem:[%s8863_s1 + $0x90] sm:$0xf] }
 0x37e   : > { %v1956_v31 = vsel %vm1955_vm1, %v1924_v55, %v1926_v51  ;;  %5595 = vmatpush1.bf16.msra.mxu0 %v5594_v22  ;;  %4058 = vmatprep.mubr.f32.mxu0 %v3231_v49  ;;  %v3230_v55 = vld [vmem:[%s8863_s1 + $0x88] sm:$0xf] }
 0x37f   : > { %2091 = vrot.lane.b32.xlu1 %v7644_v6, %s6150_s15  ;;  %2089 = vrot.lane.b32.xlu0 %v6258_v10, %s6150_s15 }
 0x380   : > { %4059 = vmatmul.mubr.f32.gmra.mrb[2].mxu0 %v3230_v55 }
 0x381   : > { %v1930_v32 = vpop.permute.xlu1 %1929  ;;  %v1928_v29 = vpop.permute.xlu0 %1927 }
 0x382   : > { %v1957_v30 = vsel %vm1955_vm1, %v1926_v51, %v1928_v29  ;;  %v1958_v56 = vsel %vm1955_vm1, %v1928_v29, %v1930_v32  ;;  %v3220_v32 = vld [vmem:[%s8863_s1 + $0x38] sm:$0xff] }
 0x383   : > { %1982 = vst.msk [vmem:[#allocation2 + $0xa90] sm:$0xff] %vm189_vm0, %v1958_v56  ;;  %2132 = vrot.lane.b32.xlu1 %v7553_v1, %s6153_s4  ;;  %2130 = vrot.lane.b32.xlu0 %v7557_v7, %s6153_s4 }
 0x384   : > { %4129 = vmatprep.mubr.f32.mxu0 %v3220_v32 }
 0x385   : > { %v1934_v58 = vpop.permute.xlu1 %1933  ;;  %v1932_v17 = vpop.permute.xlu0 %1931 }
 0x386   : > { %v1959_v3 = vsel %vm1955_vm1, %v1932_v17, %v1934_v58 }
 0x387   : > { %2136 = vrot.lane.b32.xlu1 %v7563_v21, %s6153_s4  ;;  %2134 = vrot.lane.b32.xlu0 %v6214_v0, %s6153_s4  ;;  %v5598_v59 = vpack.c.bf16 %v1959_v3, %v1956_v31 }
 0x389   : > { %v1938_v13 = vpop.permute.xlu1 %1937  ;;  %v1936_v5 = vpop.permute.xlu0 %1935 }
 0x38a   : > { %v1960_v61 = vsel %vm1955_vm1, %v1934_v58, %v1936_v5  ;;  %v1961_v62 = vsel %vm1955_vm1, %v1936_v5, %v1938_v13 }
 0x38b   : > { %1985 = vst.msk [vmem:[#allocation2 + $0xaa8] sm:$0xff] %vm189_vm0, %v1961_v62  ;;  %2140 = vrot.lane.b32.xlu1 %v7572_v34, %s6153_s4  ;;  %2138 = vrot.lane.b32.xlu0 %v7576_v12, %s6153_s4  ;;  %v5596_v63 = vpack.c.bf16 %v1960_v61, %v1957_v30 }
 0x38d   : > { %v1942_v21 = vpop.permute.xlu1 %1941  ;;  %v1940_v2 = vpop.permute.xlu0 %1939  ;;  %5597 = vmatprep.subr.bf16.mxu0 %v5596_v63 }
 0x38e   : > { %v1962_v15 = vsel %vm1955_vm1, %v1940_v2, %v1942_v21  ;;  %5599 = vmatpush1.bf16.msra.mxu0 %v5598_v59 }
 0x38f   : > { %2144 = vrot.lane.b32.xlu1 %v7582_v41, %s6153_s4  ;;  %2142 = vrot.lane.b32.xlu0 %v6232_v4, %s6153_s4 }
 0x391   : > { %v1946_v20 = vpop.permute.xlu1 %1945  ;;  %v1944_v23 = vpop.permute.xlu0 %1943 }
 0x392   : > { %v1963_v25 = vsel %vm1955_vm1, %v1942_v21, %v1944_v23  ;;  %v1964_v27 = vsel %vm1955_vm1, %v1944_v23, %v1946_v20 }
 0x393   : > { %1988 = vst.msk [vmem:[#allocation2 + $0xac0] sm:$0xff] %vm189_vm0, %v1964_v27  ;;  %2148 = vrot.lane.b32.xlu1 %v7653_v16, %s6153_s4  ;;  %2146 = vrot.lane.b32.xlu0 %v7662_v28, %s6153_s4 }
 0x395   : > { %v1950_v35 = vpop.permute.xlu1 %1949  ;;  %v1948_v60 = vpop.permute.xlu0 %1947 }
 0x396   : > { %v1965_v41 = vsel %vm1955_vm1, %v1948_v60, %v1950_v35 }
 0x397   : > { %2152 = vrot.lane.b32.xlu1 %v7633_v45, %s6153_s4  ;;  %2150 = vrot.lane.b32.xlu0 %v6255_v9, %s6153_s4  ;;  %v5602_v45 = vpack.c.bf16 %v1965_v41, %v1962_v15 }
 0x399   : > { %v1954_v39 = vpop.permute.xlu1 %1953  ;;  %v1952_v47 = vpop.permute.xlu0 %1951 }
 0x39a   : > { %v1966_v48 = vsel %vm1955_vm1, %v1950_v35, %v1952_v47  ;;  %v1967_v57 = vsel %vm1955_vm1, %v1952_v47, %v1954_v39  ;;  %vm2507_vm1 = vcmask 138240  }
 0x39b   : > { %1991 = vst.msk [vmem:[#allocation2 + $0xad8] sm:$0xff] %vm189_vm0, %v1967_v57  ;;  %2156 = vrot.lane.b32.xlu1 %v7539_v46, %s6153_s4  ;;  %2154 = vrot.lane.b32.xlu0 %v7676_v19, %s6153_s4  ;;  %v5600_v8 = vpack.c.bf16 %v1966_v48, %v1963_v25 }
 0x39d   : > { %v1995_v22 = vpop.permute.xlu1 %1994  ;;  %v1993_v51 = vpop.permute.xlu0 %1992  ;;  %5601 = vmatprep.subr.bf16.mxu0 %v5600_v8 }
 0x39e   : > { %v2025_v31 = vsel %vm2024_vm2, %v1993_v51, %v1995_v22  ;;  %5603 = vmatpush1.bf16.msra.mxu0 %v5602_v45 }
 0x39f   : > { %2160 = vrot.lane.b32.xlu1 %v7644_v6, %s6153_s4  ;;  %2158 = vrot.lane.b32.xlu0 %v6258_v10, %s6153_s4  ;;  %s6162_s4 = smov 13  }
 0x3a1   : > { %v1999_v29 = vpop.permute.xlu1 %1998  ;;  %v1997_v30 = vpop.permute.xlu0 %1996 }
 0x3a2   : > { %v2026_v56 = vsel %vm2024_vm2, %v1995_v22, %v1997_v30  ;;  %v2027_v58 = vsel %vm2024_vm2, %v1997_v30, %v1999_v29 }
 0x3a3   : > { %2051 = vst.msk [vmem:[#allocation2 + $0xaf0] sm:$0xff] %vm189_vm0, %v2027_v58  ;;  %2201 = vrot.lane.b32.xlu1 %v7553_v1, %s6154_s16  ;;  %2199 = vrot.lane.b32.xlu0 %v7557_v7, %s6154_s16 }
 0x3a5   : > { %v2003_v6 = vpop.permute.xlu1 %2002  ;;  %v2001_v17 = vpop.permute.xlu0 %2000 }
 0x3a6   : > { %v2028_v3 = vsel %vm2024_vm2, %v2001_v17, %v2003_v6 }
 0x3a7   : > { %2209 = vrot.lane.b32.xlu1 %v7572_v34, %s6154_s16  ;;  %2203 = vrot.lane.b32.xlu0 %v6214_v0, %s6154_s16  ;;  %v5606_v59 = vpack.c.bf16 %v2028_v3, %v2025_v31 }
 0x3a9   : > { %v2007_v13 = vpop.permute.xlu1 %2006  ;;  %v2005_v5 = vpop.permute.xlu0 %2004 }
 0x3aa   : > { %v2029_v61 = vsel %vm2024_vm2, %v2003_v6, %v2005_v5  ;;  %v2030_v62 = vsel %vm2024_vm2, %v2005_v5, %v2007_v13 }
 0x3ab   : > { %2054 = vst.msk [vmem:[#allocation2 + $0xb08] sm:$0xff] %vm189_vm0, %v2030_v62  ;;  %2207 = vrot.lane.b32.xlu1 %v7576_v12, %s6154_s16  ;;  %2211 = vrot.lane.b32.xlu0 %v6232_v4, %s6154_s16  ;;  %v5604_v63 = vpack.c.bf16 %v2029_v61, %v2026_v56 }
 0x3ad   : > { %v2011_v21 = vpop.permute.xlu1 %2010  ;;  %v2009_v2 = vpop.permute.xlu0 %2008  ;;  %5605 = vmatprep.subr.bf16.mxu0 %v5604_v63 }
 0x3ae   : > { %v2031_v15 = vsel %vm2024_vm2, %v2009_v2, %v2011_v21  ;;  %5607 = vmatpush1.bf16.msra.mxu0 %v5606_v59 }
 0x3af   : > { %2219 = vrot.lane.b32.xlu1 %v6255_v9, %s6154_s16  ;;  %2217 = vrot.lane.b32.xlu0 %v7653_v16, %s6154_s16 }
 0x3b1   : > { %v2015_v20 = vpop.permute.xlu1 %2014  ;;  %v2013_v23 = vpop.permute.xlu0 %2012 }
 0x3b2   : > { %v2032_v25 = vsel %vm2024_vm2, %v2011_v21, %v2013_v23  ;;  %v2033_v27 = vsel %vm2024_vm2, %v2013_v23, %v2015_v20 }
 0x3b3   : > { %2057 = vst.msk [vmem:[#allocation2 + $0xb20] sm:$0xff] %vm189_vm0, %v2033_v27  ;;  %2227 = vrot.lane.b32.xlu1 %v6258_v10, %s6154_s16  ;;  %2225 = vrot.lane.b32.xlu0 %v7539_v46, %s6154_s16 }
 0x3b5   : > { %v2019_v35 = vpop.permute.xlu1 %2018  ;;  %v2017_v60 = vpop.permute.xlu0 %2016 }
 0x3b6   : > { %v2034_v41 = vsel %vm2024_vm2, %v2017_v60, %v2019_v35 }
 0x3b7   : > { %2223 = vrot.lane.b32.xlu1 %v7676_v19, %s6154_s16  ;;  %2215 = vrot.lane.b32.xlu0 %v7662_v28, %s6154_s16  ;;  %v5610_v45 = vpack.c.bf16 %v2034_v41, %v2031_v15 }
 0x3b9   : > { %v2023_v39 = vpop.permute.xlu1 %2022  ;;  %v2021_v47 = vpop.permute.xlu0 %2020 }
 0x3ba   : > { %v2035_v48 = vsel %vm2024_vm2, %v2019_v35, %v2021_v47  ;;  %v2036_v57 = vsel %vm2024_vm2, %v2021_v47, %v2023_v39  ;;  %vm2576_vm2 = vcmask 130048  }
 0x3bb   : > { %2060 = vst.msk [vmem:[#allocation2 + $0xb38] sm:$0xff] %vm189_vm0, %v2036_v57  ;;  %2272 = vrot.lane.b32.xlu1 %v6214_v0, %s6155_s19  ;;  %2270 = vrot.lane.b32.xlu0 %v7553_v1, %s6155_s19  ;;  %v5608_v8 = vpack.c.bf16 %v2035_v48, %v2032_v25 }
 0x3bd   : > { %v2064_v49 = vpop.permute.xlu1 %2063  ;;  %v2062_v22 = vpop.permute.xlu0 %2061  ;;  %5609 = vmatprep.subr.bf16.mxu0 %v5608_v8 }
 0x3be   : > { %v2094_v51 = vsel %vm2093_vm7, %v2062_v22, %v2064_v49  ;;  %5611 = vmatpush1.bf16.msra.mxu0 %v5610_v45 }
 0x3bf   : > { %2280 = vrot.lane.b32.xlu1 %v6232_v4, %s6155_s19  ;;  %2278 = vrot.lane.b32.xlu0 %v7572_v34, %s6155_s19 }
 0x3c1   : > { %v2068_v55 = vpop.permute.xlu1 %2067  ;;  %v2066_v31 = vpop.permute.xlu0 %2065 }
 0x3c2   : > { %v2095_v32 = vsel %vm2093_vm7, %v2064_v49, %v2066_v31  ;;  %v2096_v29 = vsel %vm2093_vm7, %v2066_v31, %v2068_v55 }
 0x3c3   : > { %2120 = vst.msk [vmem:[#allocation2 + $0xb50] sm:$0xff] %vm189_vm0, %v2096_v29  ;;  %2276 = vrot.lane.b32.xlu1 %v7576_v12, %s6155_s19  ;;  %2268 = vrot.lane.b32.xlu0 %v7557_v7, %s6155_s19  ;;  %v3244_v29 = vld [vmem:[#allocation2 + $0x28] sm:$0xff] }
 0x3c5   : > { %v2072_v30 = vpop.permute.xlu1 %2071  ;;  %v2070_v56 = vpop.permute.xlu0 %2069 }
 0x3c6   : > { %v2097_v58 = vsel %vm2093_vm7, %v2070_v56, %v2072_v30  ;;  %v3289_v56 = vld [vmem:[#allocation2 + $0x190] sm:$0xff] }
 0x3c7   : > { %2288 = vrot.lane.b32.xlu1 %v6255_v9, %s6155_s19  ;;  %2286 = vrot.lane.b32.xlu0 %v7653_v16, %s6155_s19  ;;  %v5614_v61 = vpack.c.bf16 %v2097_v58, %v2094_v51  ;;  %v3292_v51 = vld [vmem:[#allocation2 + $0x1a8] sm:$0xff] }
 0x3c8   : > { %v5764_v58 = vpack.c.bf16 %v3292_v51, %v3289_v56  ;;  %v3262_v51 = vld [vmem:[#allocation2 + $0xb8] sm:$0xff] }
 0x3c9   : > { %v2076_v6 = vpop.permute.xlu1 %2075  ;;  %v2074_v17 = vpop.permute.xlu0 %2073 }
 0x3ca   : > { %v2098_v3 = vsel %vm2093_vm7, %v2072_v30, %v2074_v17  ;;  %v2099_v13 = vsel %vm2093_vm7, %v2074_v17, %v2076_v6 }
 0x3cb   : > { %2123 = vst.msk [vmem:[#allocation2 + $0xb68] sm:$0xff] %vm189_vm0, %v2099_v13  ;;  %2296 = vrot.lane.b32.xlu1 %v6258_v10, %s6155_s19  ;;  %2294 = vrot.lane.b32.xlu0 %v7539_v46, %s6155_s19  ;;  %v5612_v5 = vpack.c.bf16 %v2098_v3, %v2095_v32  ;;  %v3241_v32 = vld [vmem:[#allocation2 + $0x10] sm:$0xff]  ;;  %v3225_v3 = vld [vmem:[%s8863_s1 + $0x60] sm:$0xff] }
 0x3cc   : > { %v5766_v13 = vpack.c.bf16 %v3244_v29, %v3241_v32  ;;  %v3316_v32 = vld [vmem:[#allocation2 + $0x268] sm:$0xff] }
 0x3cd   : > { %v3161_v62 = vpop.permute.xlu1 %3160  ;;  %v3159_v63 = vpop.permute.xlu0 %3158  ;;  %5613 = vmatprep.subr.bf16.mxu0 %v5612_v5  ;;  %v3298_v5 = vld [vmem:[#allocation2 + $0x1d8] sm:$0xff] }
 0x3ce   : > { %3203 = vst.msk [vmem:[#allocation2 + $0x1210] sm:$0xff] %vm189_vm0, %v3161_v62  ;;  %v3182_v59 = vsel %vm3180_vm8, %v3159_v63, %v3161_v62  ;;  %5615 = vmatpush1.bf16.msra.mxu0 %v5614_v61  ;;  %v3247_v62 = vld [vmem:[#allocation2 + $0x40] sm:$0xff] }
 0x3cf   : > { %2292 = vrot.lane.b32.xlu1 %v7676_v19, %s6155_s19  ;;  %2284 = vrot.lane.b32.xlu0 %v7662_v28, %s6155_s19 }
 0x3d1   : > { %v3167_v21 = vpop.permute.xlu1 %3166  ;;  %v3165_v2 = vpop.permute.xlu0 %3164 }
 0x3d2   : > { %3206 = vst.msk [vmem:[#allocation2 + $0x1228] sm:$0xff] %vm189_vm0, %v3167_v21  ;;  %v3184_v15 = vsel %vm3180_vm8, %v3165_v2, %v3167_v21 }
 0x3d3   : > { %2341 = vrot.lane.b32.xlu1 %v6214_v0, %s6156_s20  ;;  %2339 = vrot.lane.b32.xlu0 %v7553_v1, %s6156_s20  ;;  %v5756_v20 = vpack.c.bf16 %v3184_v15, %v3182_v59  ;;  %v3295_v59 = vld [vmem:[#allocation2 + $0x1c0] sm:$0xff] }
 0x3d4   : > { %v5768_v21 = vpack.c.bf16 %v3298_v5, %v3295_v59 }
 0x3d5   : > { %v3163_v23 = vpop.permute.xlu1 %3162  ;;  %v3157_v25 = vpop.permute.xlu0 %3156  ;;  %5757 = vmatprep.subr.bf16.mxu1 %v5756_v20 }
 0x3d6   : > { %v3183_v27 = vsel %vm3180_vm8, %v3163_v23, %v3165_v2  ;;  %v3181_v35 = vsel %vm3180_vm8, %v3157_v25, %v3159_v63  ;;  %v3250_v63 = vld [vmem:[#allocation2 + $0x58] sm:$0xff]  ;;  %v3304_v23 = vld [vmem:[#allocation2 + $0x208] sm:$0xff] }
 0x3d7   : > { %2349 = vrot.lane.b32.xlu1 %v6232_v4, %s6156_s20  ;;  %2347 = vrot.lane.b32.xlu0 %v7572_v34, %s6156_s20  ;;  %v5758_v60 = vpack.c.bf16 %v3183_v27, %v3181_v35  ;;  %v5770_v20 = vpack.c.bf16 %v3250_v63, %v3247_v62  ;;  %v3238_v25 = vld [vmem:[%s8863_s1 + $0xc8] sm:$0xf]  ;;  %v3322_v63 = vld [vmem:[#allocation2 + $0x298] sm:$0xff] }
 0x3d9   : > { %v3173_v41 = vpop.permute.xlu1 %3172  ;;  %v3171_v39 = vpop.permute.xlu0 %3170  ;;  %5759 = vmatpush1.bf16.msra.mxu1 %v5758_v60  ;;  %v3301_v60 = vld [vmem:[#allocation2 + $0x1f0] sm:$0xff] }
 0x3da   : > { %3209 = vst.msk [vmem:[#allocation2 + $0x1240] sm:$0xff] %vm189_vm0, %v3173_v41  ;;  %v3186_v47 = vsel %vm3180_vm8, %v3171_v39, %v3173_v41  ;;  %v3256_v41 = vld [vmem:[#allocation2 + $0x88] sm:$0xff] }
 0x3db   : > { %2345 = vrot.lane.b32.xlu1 %v7576_v12, %s6156_s20  ;;  %2337 = vrot.lane.b32.xlu0 %v7557_v7, %s6156_s20 }
 0x3dd   : > { %v3179_v48 = vpop.permute.xlu1 %3178  ;;  %v3177_v57 = vpop.permute.xlu0 %3176 }
 0x3de   : > { %3212 = vst.msk [vmem:[#allocation2 + $0x1258] sm:$0xff] %vm189_vm0, %v3179_v48  ;;  %v3188_v8 = vsel %vm3180_vm8, %v3177_v57, %v3179_v48  ;;  %v3310_v48 = vld [vmem:[#allocation2 + $0x238] sm:$0xff] }
 0x3df   : > { %2357 = vrot.lane.b32.xlu1 %v6255_v9, %s6156_s20  ;;  %2355 = vrot.lane.b32.xlu0 %v7653_v16, %s6156_s20  ;;  %v5760_v45 = vpack.c.bf16 %v3188_v8, %v3186_v47  ;;  %v3253_v8 = vld [vmem:[#allocation2 + $0x70] sm:$0xff] }
 0x3e1   : > { %v3175_v49 = vpop.permute.xlu1 %3174  ;;  %v3169_v22 = vpop.permute.xlu0 %3168  ;;  %5761 = vmatprep.subr.bf16.mxu1 %v5760_v45  ;;  %v5774_v45 = vpack.c.bf16 %v3256_v41, %v3253_v8 }
 0x3e2   : > { %v3187_v55 = vsel %vm3180_vm8, %v3175_v49, %v3177_v57  ;;  %v3185_v31 = vsel %vm3180_vm8, %v3169_v22, %v3171_v39  ;;  %v3307_v49 = vld [vmem:[#allocation2 + $0x220] sm:$0xff]  ;;  %vm2714_vm8 = vcmask 113664  }
 0x3e3   : > { %2365 = vrot.lane.b32.xlu1 %v6258_v10, %s6156_s20  ;;  %2363 = vrot.lane.b32.xlu0 %v7539_v46, %s6156_s20  ;;  %v5762_v30 = vpack.c.bf16 %v3187_v55, %v3185_v31  ;;  %v5776_v22 = vpack.c.bf16 %v3310_v48, %v3307_v49  ;;  %v3280_v48 = vld [vmem:[#allocation2 + $0x148] sm:$0xff] }
 0x3e5   : > { %v2080_v6 = vpop.permute.xlu1 %2079  ;;  %v2078_v17 = vpop.permute.xlu0 %2077  ;;  %5763 = vmatpush1.bf16.msra.mxu1 %v5762_v30  ;;  %v3259_v30 = vld [vmem:[#allocation2 + $0xa0] sm:$0xff] }
 0x3e6   : > { %v7849_v61 = vsel %vm2093_vm7, %v2078_v17, %v2080_v6  ;;  %5765 = vmatprep.subr.bf16.mxu1 %v5764_v58  ;;  %v5778_v58 = vpack.c.bf16 %v3262_v51, %v3259_v30 }
 0x3e7   : > { %2361 = vrot.lane.b32.xlu1 %v7676_v19, %s6156_s20  ;;  %2353 = vrot.lane.b32.xlu0 %v7662_v28, %s6156_s20 }
 0x3e8   : > { %5119 = vmatmul.mubr.msk.f32.vlgmr.msra.gmra.mrb[4].mxu1 %vm3827_vm10, %v3225_v3 }
 0x3e9   : > { %v2084_v2 = vpop.permute.xlu1 %2083  ;;  %v2082_v15 = vpop.permute.xlu0 %2081  ;;  %5767 = vmatpush3.bf16.msra.mxu1 %v5766_v13  ;;  %4366 = vmatprep.mubr.f32.mxu1 %v6152_v18  ;;  %v5772_v18 = vpack.c.bf16 %v3304_v23, %v3301_v60  ;;  %v3268_v13 = vld [vmem:[#allocation2 + $0xe8] sm:$0xff] }
 0x3ea   : > { %v2101_v27 = vsel %vm2093_vm7, %v2080_v6, %v2082_v15  ;;  %v2102_v35 = vsel %vm2093_vm7, %v2082_v15, %v2084_v2  ;;  %5769 = vmatprep.subr.bf16.mxu1 %v5768_v21  ;;  %v3313_v6 = vld [vmem:[#allocation2 + $0x250] sm:$0xff]  ;;  %v3319_v2 = vld [vmem:[#allocation2 + $0x280] sm:$0xff] }
 0x3eb   : > { %2126 = vst.msk [vmem:[#allocation2 + $0xb80] sm:$0xff] %vm189_vm0, %v2102_v35  ;;  %2410 = vrot.lane.b32.xlu1 %v6214_v0, %s6157_s29  ;;  %2408 = vrot.lane.b32.xlu0 %v7553_v1, %s6157_s29  ;;  %v5780_v3 = vpack.c.bf16 %v3316_v32, %v3313_v6  ;;  %v3265_v21 = vld [vmem:[#allocation2 + $0xd0] sm:$0xff]  ;;  %v5784_v15 = vpack.c.bf16 %v3322_v63, %v3319_v2 }
 0x3ec   : > { %5120 = vmatmul.mubr.msk.f32.gmra.mrb[6].mxu1 %vm3827_vm10, %v3238_v25 }
 0x3ed   : > { %v2088_v39 = vpop.permute.xlu1 %2087  ;;  %v2086_v47 = vpop.permute.xlu0 %2085  ;;  %5771 = vmatpush3.bf16.msra.mxu1 %v5770_v20  ;;  %4437 = vmatprep.mubr.f32.mxu1 %v7591_v43  ;;  %v3274_v20 = vld [vmem:[#allocation2 + $0x118] sm:$0xff] }
 0x3ee   : > { %v2103_v57 = vsel %vm2093_vm7, %v2086_v47, %v2088_v39  ;;  %5773 = vmatprep.subr.bf16.mxu1 %v5772_v18  ;;  %v3271_v18 = vld [vmem:[#allocation2 + $0x100] sm:$0xff] }
 0x3ef   : > { %2418 = vrot.lane.b32.xlu1 %v6232_v4, %s6157_s29  ;;  %2416 = vrot.lane.b32.xlu0 %v7572_v34, %s6157_s29  ;;  %v5618_v17 = vpack.c.bf16 %v2103_v57, %v7849_v61  ;;  %v5782_v61 = vpack.c.bf16 %v3268_v13, %v3265_v21  ;;  %v5786_v41 = vpack.c.bf16 %v3274_v20, %v3271_v18 }
 0x3f1   : > { %v2092_v55 = vpop.permute.xlu1 %2091  ;;  %v2090_v31 = vpop.permute.xlu0 %2089  ;;  %5775 = vmatpush3.bf16.msra.mxu1 %v5774_v45  ;;  %v3334_v45 = vld [vmem:[#allocation2 + $0x2f8] sm:$0xff] }
 0x3f2   : > { %v2104_v43 = vsel %vm2093_vm7, %v2088_v39, %v2090_v31  ;;  %v2105_v29 = vsel %vm2093_vm7, %v2090_v31, %v2092_v55  ;;  %5777 = vmatprep.subr.bf16.mxu1 %v5776_v22  ;;  %v3325_v39 = vld [vmem:[#allocation2 + $0x2b0] sm:$0xff]  ;;  %v3286_v31 = vld [vmem:[#allocation2 + $0x178] sm:$0xff]  ;;  %vm2645_vm7 = vcmask 121856  }
 0x3f3   : > { %2129 = vst.msk [vmem:[#allocation2 + $0xb98] sm:$0xff] %vm189_vm0, %v2105_v29  ;;  %2414 = vrot.lane.b32.xlu1 %v7576_v12, %s6157_s29  ;;  %2406 = vrot.lane.b32.xlu0 %v7557_v7, %s6157_s29  ;;  %v5616_v56 = vpack.c.bf16 %v2104_v43, %v2101_v27  ;;  %v3328_v27 = vld [vmem:[#allocation2 + $0x2c8] sm:$0xff]  ;;  %v3277_v22 = vld [vmem:[#allocation2 + $0x130] sm:$0xff] }
 0x3f4   : > { %v5788_v47 = vpack.c.bf16 %v3328_v27, %v3325_v39  ;;  %v5790_v51 = vpack.c.bf16 %v3280_v48, %v3277_v22  ;;  %v3388_v29 = vld [vmem:[#allocation2 + $0x4a8] sm:$0xff]  ;;  %v3358_v22 = vld [vmem:[#allocation2 + $0x3b8] sm:$0xff] }
 0x3f5   : > { %v2133_v5 = vpop.permute.xlu1 %2132  ;;  %v2131_v62 = vpop.permute.xlu0 %2130  ;;  %5617 = vmatprep.subr.bf16.mxu0 %v5616_v56  ;;  %5779 = vmatpush3.bf16.msra.mxu1 %v5778_v58  ;;  %v3283_v58 = vld [vmem:[#allocation2 + $0x160] sm:$0xff] }
 0x3f6   : > { %v7883_v59 = vsel %vm2162_vm11, %v2131_v62, %v2133_v5  ;;  %5619 = vmatpush1.bf16.msra.mxu0 %v5618_v17  ;;  %5781 = vmatprep.subr.bf16.mxu1 %v5780_v3  ;;  %v5794_v17 = vpack.c.bf16 %v3286_v31, %v3283_v58  ;;  %v3385_v3 = vld [vmem:[#allocation2 + $0x490] sm:$0xff]  ;;  %v3340_v62 = vld [vmem:[#allocation2 + $0x328] sm:$0xff] }
 0x3f7   : > { %2426 = vrot.lane.b32.xlu1 %v6255_v9, %s6157_s29  ;;  %2424 = vrot.lane.b32.xlu0 %v7653_v16, %s6157_s29 }
 0x3f9   : > { %v2137_v23 = vpop.permute.xlu1 %2136  ;;  %v2135_v25 = vpop.permute.xlu0 %2134  ;;  %5783 = vmatpush3.bf16.msra.mxu1 %v5782_v61  ;;  %v3394_v61 = vld [vmem:[#allocation2 + $0x4d8] sm:$0xff] }
 0x3fa   : > { %v2164_v35 = vsel %vm2162_vm11, %v2133_v5, %v2135_v25  ;;  %v2165_v60 = vsel %vm2162_vm11, %v2135_v25, %v2137_v23  ;;  %5785 = vmatprep.subr.bf16.mxu1 %v5784_v15  ;;  %v5796_v5 = vpack.c.bf16 %v3388_v29, %v3385_v3  ;;  %v3337_v15 = vld [vmem:[#allocation2 + $0x310] sm:$0xff]  ;;  %v3346_v23 = vld [vmem:[#allocation2 + $0x358] sm:$0xff] }
 0x3fb   : > { %2189 = vst.msk [vmem:[#allocation2 + $0xbb0] sm:$0xff] %vm189_vm0, %v2165_v60  ;;  %2434 = vrot.lane.b32.xlu1 %v6258_v10, %s6157_s29  ;;  %2432 = vrot.lane.b32.xlu0 %v7539_v46, %s6157_s29  ;;  %v3331_v46 = vld [vmem:[#allocation2 + $0x2e0] sm:$0xff] }
 0x3fc   : > { %v5792_v55 = vpack.c.bf16 %v3334_v45, %v3331_v46  ;;  %v3349_v45 = vld [vmem:[#allocation2 + $0x370] sm:$0xff] }
 0x3fd   : > { %v2141_v57 = vpop.permute.xlu1 %2140  ;;  %v2139_v8 = vpop.permute.xlu0 %2138  ;;  %5787 = vmatpush3.bf16.msra.mxu1 %v5786_v41  ;;  %v3343_v41 = vld [vmem:[#allocation2 + $0x340] sm:$0xff] }
 0x3fe   : > { %v2166_v49 = vsel %vm2162_vm11, %v2139_v8, %v2141_v57  ;;  %5789 = vmatprep.subr.bf16.mxu1 %v5788_v47  ;;  %v3352_v47 = vld [vmem:[#allocation2 + $0x388] sm:$0xff]  ;;  %v6086_v8 = vld [vmem:[%s8863_s1 + $0x18] sm:$0xff] }
 0x3ff   : > { %2430 = vrot.lane.b32.xlu1 %v7676_v19, %s6157_s29  ;;  %2422 = vrot.lane.b32.xlu0 %v7662_v28, %s6157_s29  ;;  %v5622_v13 = vpack.c.bf16 %v2166_v49, %v7883_v59  ;;  %v3391_v59 = vld [vmem:[#allocation2 + $0x4c0] sm:$0xff] }
 0x400   : > { %v5800_v20 = vpack.c.bf16 %v3394_v61, %v3391_v59 }
 0x401   : > { %v2145_v32 = vpop.permute.xlu1 %2144  ;;  %v2143_v43 = vpop.permute.xlu0 %2142  ;;  %5791 = vmatpush3.bf16.msra.mxu1 %v5790_v51 }
 0x402   : > { %v2167_v30 = vsel %vm2162_vm11, %v2141_v57, %v2143_v43  ;;  %v2168_v56 = vsel %vm2162_vm11, %v2143_v43, %v2145_v32  ;;  %5793 = vmatprep.subr.bf16.mxu1 %v5792_v55  ;;  %v3406_v57 = vld [vmem:[#allocation2 + $0x538] sm:$0xff]  ;;  %v3412_v55 = vld [vmem:[#allocation2 + $0x568] sm:$0xff]  ;;  %v3355_v43 = vld [vmem:[#allocation2 + $0x3a0] sm:$0xff] }
 0x403   : > { %2192 = vst.msk [vmem:[#allocation2 + $0xbc8] sm:$0xff] %vm189_vm0, %v2168_v56  ;;  %2479 = vrot.lane.b32.xlu1 %v6214_v0, %s6158_s30  ;;  %2477 = vrot.lane.b32.xlu0 %v7553_v1, %s6158_s30  ;;  %v5620_v6 = vpack.c.bf16 %v2167_v30, %v2164_v35  ;;  %v5798_v1 = vpack.c.bf16 %v3340_v62, %v3337_v15  ;;  %v3400_v35 = vld [vmem:[#allocation2 + $0x508] sm:$0xff]  ;;  %v3409_v56 = vld [vmem:[#allocation2 + $0x550] sm:$0xff] }
 0x404   : > { %v5810_v30 = vpack.c.bf16 %v3358_v22, %v3355_v43 }
 0x405   : > { %v2149_v63 = vpop.permute.xlu1 %2148  ;;  %v2147_v21 = vpop.permute.xlu0 %2146  ;;  %5621 = vmatprep.subr.bf16.mxu0 %v5620_v6  ;;  %5795 = vmatpush3.bf16.msra.mxu1 %v5794_v17  ;;  %v5812_v6 = vpack.c.bf16 %v3412_v55, %v3409_v56  ;;  %v3364_v17 = vld [vmem:[#allocation2 + $0x3e8] sm:$0xff]  ;;  %v3379_v55 = vld [vmem:[#allocation2 + $0x460] sm:$0xff] }
 0x406   : > { %v7910_v2 = vsel %vm2162_vm11, %v2147_v21, %v2149_v63  ;;  %5623 = vmatpush1.bf16.msra.mxu0 %v5622_v13  ;;  %5797 = vmatprep.subr.bf16.mxu1 %v5796_v5  ;;  %v3418_v5 = vld [vmem:[#allocation2 + $0x598] sm:$0xff]  ;;  %v7948_v21 = vld [vmem:[%s8863_s1 + $0x30] sm:$0xff]  ;;  %v3436_v56 = vld [vmem:[#allocation2 + $0x628] sm:$0xff] }
 0x407   : > { %2487 = vrot.lane.b32.xlu1 %v6232_v4, %s6158_s30  ;;  %2485 = vrot.lane.b32.xlu0 %v7572_v34, %s6158_s30  ;;  %v5802_v34 = vpack.c.bf16 %v3346_v23, %v3343_v41  ;;  %v3424_v23 = vld [vmem:[#allocation2 + $0x5c8] sm:$0xff] }
 0x408   : > { %4438 = vmatmul.mubr.f32.vlgmr.msra.gmra.mrb[8].mxu1 %v7597_v44  ;;  %v3397_v44 = vld [vmem:[#allocation2 + $0x4f0] sm:$0xff] }
 0x409   : > { %v2153_v25 = vpop.permute.xlu1 %2152  ;;  %v2151_v27 = vpop.permute.xlu0 %2150  ;;  %5799 = vmatpush3.bf16.msra.mxu1 %v5798_v1  ;;  %4442 = vmatprep.mubr.f32.mxu1 %v7622_v37  ;;  %v5804_v39 = vpack.c.bf16 %v3400_v35, %v3397_v44  ;;  %v3370_v1 = vld [vmem:[#allocation2 + $0x418] sm:$0xff]  ;;  %v3421_v35 = vld [vmem:[#allocation2 + $0x5b0] sm:$0xff] }
 0x40a   : > { %v2170_v60 = vsel %vm2162_vm11, %v2149_v63, %v2151_v27  ;;  %v2171_v18 = vsel %vm2162_vm11, %v2151_v27, %v2153_v25  ;;  %5801 = vmatprep.subr.bf16.mxu1 %v5800_v20  ;;  %v3361_v63 = vld [vmem:[#allocation2 + $0x3d0] sm:$0xff]  ;;  %v3367_v27 = vld [vmem:[#allocation2 + $0x400] sm:$0xff]  ;;  %v3430_v44 = vld [vmem:[#allocation2 + $0x5f8] sm:$0xff] }
 0x40b   : > { %2195 = vst.msk [vmem:[#allocation2 + $0xbe0] sm:$0xff] %vm189_vm0, %v2171_v18  ;;  %2483 = vrot.lane.b32.xlu1 %v7576_v12, %s6158_s30  ;;  %2475 = vrot.lane.b32.xlu0 %v7557_v7, %s6158_s30  ;;  %v5806_v7 = vpack.c.bf16 %v3352_v47, %v3349_v45  ;;  %v5814_v61 = vpack.c.bf16 %v3364_v17, %v3361_v63  ;;  %v3376_v18 = vld [vmem:[#allocation2 + $0x448] sm:$0xff]  ;;  %v3427_v45 = vld [vmem:[#allocation2 + $0x5e0] sm:$0xff]  ;;  %v3490_v17 = vld [vmem:[#allocation2 + $0x7d8] sm:$0xff] }
 0x40c   : > { %4443 = vmatmul.mubr.f32.gmra.mrb[10].mxu1 %v7628_v33  ;;  %v3403_v33 = vld [vmem:[#allocation2 + $0x520] sm:$0xff] }
 0x40d   : > { %v2157_v37 = vpop.permute.xlu1 %2156  ;;  %v2155_v48 = vpop.permute.xlu0 %2154  ;;  %5803 = vmatpush3.bf16.msra.mxu1 %v5802_v34  ;;  %4512 = vmatprep.mubr.f32.mxu1 %v6086_v8  ;;  %v5808_v49 = vpack.c.bf16 %v3406_v57, %v3403_v33  ;;  %v3382_v33 = vld [vmem:[#allocation2 + $0x478] sm:$0xff] }
 0x40e   : > { %v2172_v12 = vsel %vm2162_vm11, %v2155_v48, %v2157_v37  ;;  %5805 = vmatprep.subr.bf16.mxu1 %v5804_v39  ;;  %v7972_v48 = vld [vmem:[#allocation2 + $0x20] sm:$0xff]  ;;  %v5826_v43 = vpack.c.bf16 %v3382_v33, %v3379_v55  ;;  %v6096_v33 = vld [vmem:[%s8863_s1 + $0x28] sm:$0xff] }
 0x40f   : > { %2495 = vrot.lane.b32.xlu1 %v6255_v9, %s6158_s30  ;;  %2493 = vrot.lane.b32.xlu0 %v7653_v16, %s6158_s30  ;;  %v7939_v16 = vld [vmem:[#allocation2 + $0x50] sm:$0xff]  ;;  %v5626_v58 = vpack.c.bf16 %v2172_v12, %v7910_v2  ;;  %v3415_v2 = vld [vmem:[#allocation2 + $0x580] sm:$0xff] }
 0x410   : > { %v5816_v15 = vpack.c.bf16 %v3418_v5, %v3415_v2  ;;  %v7994_v5 = vld [vmem:[#allocation2 + $0x38] sm:$0xff]  ;;  %v6093_v2 = vld [vmem:[%s8863_s1 + $0x10] sm:$0xff]  ;;  %v3499_v55 = vld [vmem:[#allocation2 + $0x820] sm:$0xff] }
 0x411   : > { %v2161_v51 = vpop.permute.xlu1 %2160  ;;  %v2159_v46 = vpop.permute.xlu0 %2158  ;;  %5807 = vmatpush3.bf16.msra.mxu1 %v5806_v7  ;;  %v5824_v7 = vpack.c.bf16 %v3430_v44, %v3427_v45  ;;  %v3493_v44 = vld [vmem:[#allocation2 + $0x7f0] sm:$0xff] }
 0x412   : > { %v2173_v31 = vsel %vm2162_vm11, %v2157_v37, %v2159_v46  ;;  %v2174_v32 = vsel %vm2162_vm11, %v2159_v46, %v2161_v51  ;;  %5809 = vmatprep.subr.bf16.mxu1 %v5808_v49  ;;  %v3373_v37 = vld [vmem:[#allocation2 + $0x430] sm:$0xff]  ;;  %v3484_v51 = vld [vmem:[#allocation2 + $0x7a8] sm:$0xff]  ;;  %vm2783_vm11 = vcmask 105472  }
 0x413   : > { %2198 = vst.msk [vmem:[#allocation2 + $0xbf8] sm:$0xff] %vm189_vm0, %v2174_v32  ;;  %2503 = vrot.lane.b32.xlu1 %v6258_v10, %s6158_s30  ;;  %2501 = vrot.lane.b32.xlu0 %v7939_v16, %s6158_s30  ;;  %v5624_v29 = vpack.c.bf16 %v2173_v31, %v2170_v60  ;;  %v5820_v60 = vpack.c.bf16 %v3424_v23, %v3421_v35  ;;  %v7980_v31 = vld [vmem:[#allocation2 + $0x18] sm:$0xff]  ;;  %v7984_v32 = vld [vmem:[#allocation2] sm:$0xff] }
 0x414   : > { %v5822_v8 = vpack.c.bf16 %v3376_v18, %v3373_v37  ;;  %v3439_v35 = vld [vmem:[#allocation2 + $0x640] sm:$0xff]  ;;  %v6095_v37 = vld [vmem:[%s8863_s1 + $0x78] sm:$0xf] }
 0x415   : > { %v2202_v3 = vpop.permute.xlu1 %2201  ;;  %v2200_v13 = vpop.permute.xlu0 %2199  ;;  %5625 = vmatprep.subr.bf16.mxu0 %v5624_v29  ;;  %5811 = vmatpush3.bf16.msra.mxu1 %v5810_v30  ;;  %v3481_v29 = vld [vmem:[#allocation2 + $0x790] sm:$0xff] }
 0x416   : > { %v2232_v62 = vsel %vm2231_vm12, %v2200_v13, %v2202_v3  ;;  %5627 = vmatpush1.bf16.msra.mxu0 %v5626_v58  ;;  %5813 = vmatprep.subr.bf16.mxu1 %v5812_v6  ;;  %v5828_v30 = vpack.c.bf16 %v3484_v51, %v3481_v29  ;;  %v3433_v13 = vld [vmem:[#allocation2 + $0x610] sm:$0xff]  ;;  %v3454_v29 = vld [vmem:[#allocation2 + $0x6b8] sm:$0xff] }
 0x417   : > { %2499 = vrot.lane.b32.xlu1 %v7676_v19, %s6158_s30  ;;  %2491 = vrot.lane.b32.xlu0 %v7662_v28, %s6158_s30  ;;  %v7961_v28 = vld [vmem:[#allocation2 + $0x8] sm:$0xff]  ;;  %v5818_v19 = vpack.c.bf16 %v3370_v1, %v3367_v27  ;;  %v5830_v63 = vpack.c.bf16 %v3436_v56, %v3433_v13  ;;  %v3442_v1 = vld [vmem:[#allocation2 + $0x658] sm:$0xff]  ;;  %v8024_v51 = vld [vmem:[#allocation2 + $0x30] sm:$0xff] }
 0x419   : > { %v2210_v59 = vpop.permute.xlu1 %2209  ;;  %v7954_v20 = vpop.permute.xlu0 %2203  ;;  %5815 = vmatpush3.bf16.msra.mxu1 %v5814_v61  ;;  %4130 = vmatmul.mubr.f32.vlgmr.msra.gmra.mrb[0].mxu0 %v7948_v21  ;;  %v3487_v61 = vld [vmem:[#allocation2 + $0x7c0] sm:$0xff] }
 0x41a   : > { %v2233_v25 = vsel %vm2231_vm12, %v2202_v3, %v7954_v20  ;;  %5817 = vmatprep.subr.bf16.mxu1 %v5816_v15  ;;  %v5832_v15 = vpack.c.bf16 %v3490_v17, %v3487_v61 }
 0x41b   : > { %2548 = vrot.lane.b32.xlu1 %v6214_v0, %s6159_s9  ;;  %2546 = vrot.lane.b32.xlu0 %v7961_v28, %s6159_s9 }
 0x41d   : > { %v2208_v41 = vpop.permute.xlu1 %2207  ;;  %v7965_v34 = vpop.permute.xlu0 %2211  ;;  %5819 = vmatpush3.bf16.msra.mxu1 %v5818_v19 }
 0x41e   : > { %v2235_v39 = vsel %vm2231_vm12, %v2208_v41, %v2210_v59  ;;  %v2236_v47 = vsel %vm2231_vm12, %v2210_v59, %v7965_v34  ;;  %5821 = vmatprep.subr.bf16.mxu1 %v5820_v60  ;;  %v6094_v60 = vld [vmem:[%s8863_s1 + $0x80] sm:$0xf]  ;;  %v5834_v41 = vpack.c.bf16 %v3442_v1, %v3439_v35 }
 0x41f   : > { %2556 = vrot.lane.b32.xlu1 %v6232_v4, %s6159_s9  ;;  %2554 = vrot.lane.b32.xlu0 %v7972_v48, %s6159_s9  ;;  %v5628_v57 = vpack.c.bf16 %v2236_v47, %v2233_v25  ;;  %v5630_v12 = vpack.c.bf16 %v2235_v39, %v2232_v62  ;;  %v3496_v25 = vld [vmem:[#allocation2 + $0x808] sm:$0xff] }
 0x420   : > { %v5836_v39 = vpack.c.bf16 %v3496_v25, %v3493_v44  ;;  %v3448_v47 = vld [vmem:[#allocation2 + $0x688] sm:$0xff] }
 0x421   : > { %v7976_v49 = vpop.permute.xlu1 %2219  ;;  %v2218_v22 = vpop.permute.xlu0 %2217  ;;  %5629 = vmatprep.subr.bf16.mxu0 %v5628_v57  ;;  %5823 = vmatpush3.bf16.msra.mxu1 %v5822_v8 }
 0x422   : > { %v2239_v46 = vsel %vm2231_vm12, %v2218_v22, %v7976_v49  ;;  %5631 = vmatpush1.bf16.msra.mxu0 %v5630_v12  ;;  %5825 = vmatprep.subr.bf16.mxu1 %v5824_v7  ;;  %v3502_v12 = vld [vmem:[#allocation2 + $0x838] sm:$0xff]  ;;  %v3445_v7 = vld [vmem:[#allocation2 + $0x670] sm:$0xff] }
 0x423   : > { %2552 = vrot.lane.b32.xlu1 %v7980_v31, %s6159_s9  ;;  %2544 = vrot.lane.b32.xlu0 %v7984_v32, %s6159_s9 }
 0x425   : > { %v7988_v58 = vpop.permute.xlu1 %2227  ;;  %v2226_v6 = vpop.permute.xlu0 %2225  ;;  %5827 = vmatpush3.bf16.msra.mxu1 %v5826_v43  ;;  %v5840_v43 = vpack.c.bf16 %v3502_v12, %v3499_v55 }
 0x426   : > { %v2242_v3 = vsel %vm2231_vm12, %v2226_v6, %v7988_v58  ;;  %5829 = vmatprep.subr.bf16.mxu1 %v5828_v30 }
 0x427   : > { %2564 = vrot.lane.b32.xlu1 %v6255_v9, %s6159_s9  ;;  %2562 = vrot.lane.b32.xlu0 %v7994_v5, %s6159_s9  ;;  %v5632_v62 = vpack.c.bf16 %v2242_v3, %v2239_v46  ;;  %v5838_v46 = vpack.c.bf16 %v3448_v47, %v3445_v7  ;;  %v3451_v3 = vld [vmem:[#allocation2 + $0x6a0] sm:$0xff]  ;;  %v3520_v47 = vld [vmem:[#allocation2 + $0x8c8] sm:$0xff] }
 0x428   : > { %4513 = vmatmul.mubr.f32.vlgmr.msra.gmra.mrb[12].mxu1 %v6093_v2  ;;  %v3460_v2 = vld [vmem:[#allocation2 + $0x6e8] sm:$0xff] }
 0x429   : > { %v2224_v59 = vpop.permute.xlu1 %2223  ;;  %v2216_v23 = vpop.permute.xlu0 %2215  ;;  %5633 = vmatprep.subr.bf16.mxu0 %v5632_v62  ;;  %5831 = vmatpush3.bf16.msra.mxu1 %v5830_v63  ;;  %v5842_v62 = vpack.c.bf16 %v3454_v29, %v3451_v3  ;;  %v3505_v63 = vld [vmem:[#allocation2 + $0x850] sm:$0xff]  ;;  %v3523_v3 = vld [vmem:[#allocation2 + $0x8e0] sm:$0xff] }
 0x42a   : > { %v2241_v27 = vsel %vm2231_vm12, %v2224_v59, %v2226_v6  ;;  %v2238_v19 = vsel %vm2231_vm12, %v2216_v23, %v2218_v22  ;;  %5833 = vmatprep.subr.bf16.mxu1 %v5832_v15  ;;  %4517 = vmatprep.mubr.f32.mxu1 %v6094_v60  ;;  %v8020_v22 = vld [vmem:[#allocation2 + $0x48] sm:$0xff]  ;;  %v3514_v59 = vld [vmem:[#allocation2 + $0x898] sm:$0xff]  ;;  %v3511_v60 = vld [vmem:[#allocation2 + $0x880] sm:$0xff] }
 0x42b   : > { %2572 = vrot.lane.b32.xlu1 %v6258_v10, %s6159_s9  ;;  %2570 = vrot.lane.b32.xlu0 %v7939_v16, %s6159_s9  ;;  %v5634_v18 = vpack.c.bf16 %v2241_v27, %v2238_v19  ;;  %v3508_v6 = vld [vmem:[#allocation2 + $0x868] sm:$0xff]  ;;  %v3457_v27 = vld [vmem:[#allocation2 + $0x6d0] sm:$0xff] }
 0x42c   : > { %4518 = vmatmul.mubr.f32.gmra.mrb[14].mxu1 %v6095_v37  ;;  %v5844_v61 = vpack.c.bf16 %v3508_v6, %v3505_v63  ;;  %v5846_v35 = vpack.c.bf16 %v3460_v2, %v3457_v27  ;;  %v3580_v2 = vld [vmem:[#allocation2 + $0xaa8] sm:$0xff]  ;;  %v3577_v27 = vld [vmem:[#allocation2 + $0xa90] sm:$0xff] }
 0x42d   : > { %v8013_v57 = vpop.permute.xlu1 %2272  ;;  %v2271_v8 = vpop.permute.xlu0 %2270  ;;  %5635 = vmatpush1.bf16.msra.mxu0 %v5634_v18  ;;  %5835 = vmatpush3.bf16.msra.mxu1 %v5834_v41  ;;  %v5848_v18 = vpack.c.bf16 %v3514_v59, %v3511_v60  ;;  %v3466_v41 = vld [vmem:[#allocation2 + $0x718] sm:$0xff]  ;;  %v3475_v59 = vld [vmem:[#allocation2 + $0x760] sm:$0xff] }
 0x42e   : > { %v2302_v45 = vsel %vm2300_vm13, %v2271_v8, %v8013_v57  ;;  %5837 = vmatprep.subr.bf16.mxu1 %v5836_v39  ;;  %4587 = vmatprep.mubr.f32.mxu1 %v6096_v33  ;;  %v3472_v33 = vld [vmem:[#allocation2 + $0x748] sm:$0xff] }
 0x42f   : > { %2568 = vrot.lane.b32.xlu1 %v8020_v22, %s6159_s9  ;;  %2560 = vrot.lane.b32.xlu0 %v8024_v51, %s6159_s9 }
 0x431   : > { %v8028_v30 = vpop.permute.xlu1 %2280  ;;  %v2279_v56 = vpop.permute.xlu0 %2278  ;;  %5839 = vmatpush3.bf16.msra.mxu1 %v5838_v46 }
 0x432   : > { %v2305_v17 = vsel %vm2300_vm13, %v2279_v56, %v8028_v30  ;;  %5841 = vmatprep.subr.bf16.mxu1 %v5840_v43  ;;  %v3526_v43 = vld [vmem:[#allocation2 + $0x8f8] sm:$0xff] }
 0x433   : > { %2617 = vrot.lane.b32.xlu1 %v6214_v0, %s6160_s6  ;;  %2615 = vrot.lane.b32.xlu0 %v7961_v28, %s6160_s6  ;;  %v5636_v13 = vpack.c.bf16 %v2305_v17, %v2302_v45  ;;  %v3517_v45 = vld [vmem:[#allocation2 + $0x8b0] sm:$0xff] }
 0x434   : > { %v5852_v7 = vpack.c.bf16 %v3520_v47, %v3517_v45  ;;  %v3529_v47 = vld [vmem:[#allocation2 + $0x910] sm:$0xff] }
 0x435   : > { %v2277_v15 = vpop.permute.xlu1 %2276  ;;  %v2269_v1 = vpop.permute.xlu0 %2268  ;;  %5637 = vmatprep.subr.bf16.mxu0 %v5636_v13  ;;  %5843 = vmatpush3.bf16.msra.mxu1 %v5842_v62  ;;  %v5856_v13 = vpack.c.bf16 %v3526_v43, %v3523_v3  ;;  %v3478_v62 = vld [vmem:[#allocation2 + $0x778] sm:$0xff]  ;;  %v3592_v43 = vld [vmem:[#allocation2 + $0xb08] sm:$0xff] }
 0x436   : > { %v2304_v23 = vsel %vm2300_vm13, %v2277_v15, %v2279_v56  ;;  %v2301_v25 = vsel %vm2300_vm13, %v2269_v1, %v2271_v8  ;;  %5845 = vmatprep.subr.bf16.mxu1 %v5844_v61  ;;  %v3463_v8 = vld [vmem:[#allocation2 + $0x700] sm:$0xff]  ;;  %v3469_v56 = vld [vmem:[#allocation2 + $0x730] sm:$0xff] }
 0x437   : > { %2625 = vrot.lane.b32.xlu1 %v6232_v4, %s6160_s6  ;;  %2623 = vrot.lane.b32.xlu0 %v7972_v48, %s6160_s6  ;;  %v5638_v19 = vpack.c.bf16 %v2304_v23, %v2301_v25  ;;  %v5850_v12 = vpack.c.bf16 %v3466_v41, %v3463_v8  ;;  %v5854_v17 = vpack.c.bf16 %v3472_v33, %v3469_v56  ;;  %v3586_v41 = vld [vmem:[#allocation2 + $0xad8] sm:$0xff]  ;;  %v3583_v8 = vld [vmem:[#allocation2 + $0xac0] sm:$0xff] }
 0x438   : > { %v5858_v25 = vpack.c.bf16 %v3478_v62, %v3475_v59  ;;  %v5864_v45 = vpack.c.bf16 %v3586_v41, %v3583_v8  ;;  %v3595_v41 = vld [vmem:[#allocation2 + $0xb20] sm:$0xff]  ;;  %v3604_v8 = vld [vmem:[#allocation2 + $0xb68] sm:$0xff] }
 0x439   : > { %v8042_v44 = vpop.permute.xlu1 %2288  ;;  %v2287_v39 = vpop.permute.xlu0 %2286  ;;  %5639 = vmatpush1.bf16.msra.mxu0 %v5638_v19  ;;  %5847 = vmatpush3.bf16.msra.mxu1 %v5846_v35  ;;  %v5860_v19 = vpack.c.bf16 %v3580_v2, %v3577_v27  ;;  %v3532_v35 = vld [vmem:[#allocation2 + $0x928] sm:$0xff]  ;;  %v6102_v27 = vld [vmem:[%s8863_s1 + $0x38] sm:$0xff] }
 0x43a   : > { %v2308_v37 = vsel %vm2300_vm13, %v2287_v39, %v8042_v44  ;;  %5849 = vmatprep.subr.bf16.mxu1 %v5848_v18 }
 0x43b   : > { %2621 = vrot.lane.b32.xlu1 %v7980_v31, %s6160_s6  ;;  %2613 = vrot.lane.b32.xlu0 %v7984_v32, %s6160_s6 }
 0x43d   : > { %v8050_v46 = vpop.permute.xlu1 %2296  ;;  %v2295_v55 = vpop.permute.xlu0 %2294  ;;  %5851 = vmatpush3.bf16.msra.mxu1 %v5850_v12  ;;  %v6099_v12 = vld [vmem:[%s8863_s1 + $0x20] sm:$0xff] }
 0x43e   : > { %v2311_v29 = vsel %vm2300_vm13, %v2295_v55, %v8050_v46  ;;  %5853 = vmatprep.subr.bf16.mxu1 %v5852_v7  ;;  %v3538_v7 = vld [vmem:[#allocation2 + $0x958] sm:$0xff] }
 0x43f   : > { %2633 = vrot.lane.b32.xlu1 %v6255_v9, %s6160_s6  ;;  %2631 = vrot.lane.b32.xlu0 %v7994_v5, %s6160_s6  ;;  %v5640_v6 = vpack.c.bf16 %v2311_v29, %v2308_v37  ;;  %v5862_v37 = vpack.c.bf16 %v3532_v35, %v3529_v47  ;;  %v6100_v29 = vld [vmem:[%s8863_s1 + $0x90] sm:$0xf]  ;;  %v3550_v47 = vld [vmem:[#allocation2 + $0x9b8] sm:$0xff] }
 0x441   : > { %v2293_v63 = vpop.permute.xlu1 %2292  ;;  %v2285_v61 = vpop.permute.xlu0 %2284  ;;  %5641 = vmatprep.subr.bf16.mxu0 %v5640_v6  ;;  %5855 = vmatpush3.bf16.msra.mxu1 %v5854_v17  ;;  %v3535_v6 = vld [vmem:[#allocation2 + $0x940] sm:$0xff] }
 0x442   : > { %v2310_v15 = vsel %vm2300_vm13, %v2293_v63, %v2295_v55  ;;  %v2307_v1 = vsel %vm2300_vm13, %v2285_v61, %v2287_v39  ;;  %5857 = vmatprep.subr.bf16.mxu1 %v5856_v13  ;;  %v5866_v3 = vpack.c.bf16 %v3538_v7, %v3535_v6  ;;  %v3589_v13 = vld [vmem:[#allocation2 + $0xaf0] sm:$0xff]  ;;  %v3544_v63 = vld [vmem:[#allocation2 + $0x988] sm:$0xff] }
 0x443   : > { %2641 = vrot.lane.b32.xlu1 %v6258_v10, %s6160_s6  ;;  %2639 = vrot.lane.b32.xlu0 %v7939_v16, %s6160_s6  ;;  %v5642_v23 = vpack.c.bf16 %v2310_v15, %v2307_v1  ;;  %v5868_v62 = vpack.c.bf16 %v3592_v43, %v3589_v13  ;;  %v6101_v61 = vld [vmem:[%s8863_s1 + $0x88] sm:$0xf]  ;;  %v3598_v1 = vld [vmem:[#allocation2 + $0xb38] sm:$0xff]  ;;  %v3553_v13 = vld [vmem:[#allocation2 + $0x9d0] sm:$0xff] }
 0x445   : > { %v8064_v60 = vpop.permute.xlu1 %2341  ;;  %v2340_v18 = vpop.permute.xlu0 %2339  ;;  %5643 = vmatpush1.bf16.msra.mxu0 %v5642_v23  ;;  %5859 = vmatpush3.bf16.msra.mxu1 %v5858_v25  ;;  %v3541_v25 = vld [vmem:[#allocation2 + $0x970] sm:$0xff] }
 0x446   : > { %v2371_v39 = vsel %vm2369_vm14, %v2340_v18, %v8064_v60  ;;  %5861 = vmatprep.subr.bf16.mxu1 %v5860_v19  ;;  %v5870_v35 = vpack.c.bf16 %v3544_v63, %v3541_v25 }
 0x447   : > { %2637 = vrot.lane.b32.xlu1 %v8020_v22, %s6160_s6  ;;  %2629 = vrot.lane.b32.xlu0 %v8024_v51, %s6160_s6 }
 0x448   : > { %4588 = vmatmul.mubr.f32.vlgmr.msra.gmra.mrb[16].mxu1 %v6099_v12 }
 0x449   : > { %v8075_v33 = vpop.permute.xlu1 %2349  ;;  %v2348_v55 = vpop.permute.xlu0 %2347  ;;  %5863 = vmatpush3.bf16.msra.mxu1 %v5862_v37  ;;  %4592 = vmatprep.mubr.f32.mxu1 %v6100_v29  ;;  %v3556_v29 = vld [vmem:[#allocation2 + $0x9e8] sm:$0xff] }
 0x44a   : > { %v2374_v56 = vsel %vm2369_vm14, %v2348_v55, %v8075_v33  ;;  %5865 = vmatprep.subr.bf16.mxu1 %v5864_v45  ;;  %v3547_v45 = vld [vmem:[#allocation2 + $0x9a0] sm:$0xff]  ;;  %v5878_v63 = vpack.c.bf16 %v3556_v29, %v3553_v13 }
 0x44b   : > { %2686 = vrot.lane.b32.xlu1 %v6214_v0, %s6161_s25  ;;  %2684 = vrot.lane.b32.xlu0 %v7961_v28, %s6161_s25  ;;  %v5644_v17 = vpack.c.bf16 %v2374_v56, %v2371_v39  ;;  %v5872_v39 = vpack.c.bf16 %v3598_v1, %v3595_v41  ;;  %v5874_v7 = vpack.c.bf16 %v3550_v47, %v3547_v45  ;;  %v3619_v29 = vld [vmem:[#allocation2 + $0xbe0] sm:$0xff] }
 0x44c   : > { %4593 = vmatmul.mubr.f32.gmra.mrb[18].mxu1 %v6101_v61  ;;  %v3607_v61 = vld [vmem:[#allocation2 + $0xb80] sm:$0xff] }
 0x44d   : > { %v2346_v2 = vpop.permute.xlu1 %2345  ;;  %v2338_v15 = vpop.permute.xlu0 %2337  ;;  %5645 = vmatprep.subr.bf16.mxu0 %v5644_v17  ;;  %5867 = vmatpush3.bf16.msra.mxu1 %v5866_v3  ;;  %v3610_v17 = vld [vmem:[#allocation2 + $0xb98] sm:$0xff] }
 0x44e   : > { %v2373_v59 = vsel %vm2369_vm14, %v2346_v2, %v2348_v55  ;;  %v2370_v23 = vsel %vm2369_vm14, %v2338_v15, %v2340_v18  ;;  %5869 = vmatprep.subr.bf16.mxu1 %v5868_v62  ;;  %4662 = vmatprep.mubr.f32.mxu1 %v6102_v27  ;;  %v3601_v55 = vld [vmem:[#allocation2 + $0xb50] sm:$0xff]  ;;  %v5880_v2 = vpack.c.bf16 %v3610_v17, %v3607_v61  ;;  %v3562_v15 = vld [vmem:[#allocation2 + $0xa18] sm:$0xff] }
 0x44f   : > { %2694 = vrot.lane.b32.xlu1 %v6232_v4, %s6161_s25  ;;  %2692 = vrot.lane.b32.xlu0 %v7972_v48, %s6161_s25  ;;  %v5646_v19 = vpack.c.bf16 %v2373_v59, %v2370_v23  ;;  %v5876_v43 = vpack.c.bf16 %v3604_v8, %v3601_v55  ;;  %v3616_v23 = vld [vmem:[#allocation2 + $0xbc8] sm:$0xff]  ;;  %v3565_v55 = vld [vmem:[#allocation2 + $0xa30] sm:$0xff]  ;;  %v3574_v17 = vld [vmem:[#allocation2 + $0xa78] sm:$0xff] }
 0x450   : > { %v3568_v8 = vld [vmem:[#allocation2 + $0xa48] sm:$0xff]  ;;  %v8133_v61 = vld [vmem:[%s6211_s17 + $0x38] sm:$0xff] }
 0x451   : > { %v8098_v37 = vpop.permute.xlu1 %2357  ;;  %v2356_v18 = vpop.permute.xlu0 %2355  ;;  %5647 = vmatpush1.bf16.msra.mxu0 %v5646_v19  ;;  %5871 = vmatpush3.bf16.msra.mxu1 %v5870_v35  ;;  %v3559_v19 = vld [vmem:[#allocation2 + $0xa00] sm:$0xff] }
 0x452   : > { %v2377_v12 = vsel %vm2369_vm14, %v2356_v18, %v8098_v37  ;;  %5873 = vmatprep.subr.bf16.mxu1 %v5872_v39  ;;  %v5882_v41 = vpack.c.bf16 %v3562_v15, %v3559_v19  ;;  %v3613_v39 = vld [vmem:[#allocation2 + $0xbb0] sm:$0xff] }
 0x453   : > { %2690 = vrot.lane.b32.xlu1 %v7980_v31, %s6161_s25  ;;  %2682 = vrot.lane.b32.xlu0 %v7984_v32, %s6161_s25  ;;  %v5884_v47 = vpack.c.bf16 %v3616_v23, %v3613_v39  ;;  %v3232_v23 = vld [vmem:[%s8863_s1 + $0x98] sm:$0xf]  ;;  %v3222_v39 = vld [vmem:[%s8863_s1 + $0x48] sm:$0xff] }
 0x455   : > { %v8106_v56 = vpop.permute.xlu1 %2365  ;;  %v2364_v6 = vpop.permute.xlu0 %2363  ;;  %5875 = vmatpush3.bf16.msra.mxu1 %v5874_v7 }
 0x456   : > { %v2380_v3 = vsel %vm2369_vm14, %v2364_v6, %v8106_v56  ;;  %5877 = vmatprep.subr.bf16.mxu1 %v5876_v43  ;;  %v5886_v43 = vpack.c.bf16 %v3568_v8, %v3565_v55 }
 0x457   : > { %2702 = vrot.lane.b32.xlu1 %v6255_v9, %s6161_s25  ;;  %2700 = vrot.lane.b32.xlu0 %v7994_v5, %s6161_s25  ;;  %v5648_v62 = vpack.c.bf16 %v2380_v3, %v2377_v12 }
 0x459   : > { %v2362_v1 = vpop.permute.xlu1 %2361  ;;  %v2354_v59 = vpop.permute.xlu0 %2353  ;;  %5649 = vmatprep.subr.bf16.mxu0 %v5648_v62  ;;  %5879 = vmatpush3.bf16.msra.mxu1 %v5878_v63  ;;  %v3571_v63 = vld [vmem:[#allocation2 + $0xa60] sm:$0xff] }
 0x45a   : > { %v2379_v25 = vsel %vm2369_vm14, %v2362_v1, %v2364_v6  ;;  %v2376_v27 = vsel %vm2369_vm14, %v2354_v59, %v2356_v18  ;;  %5881 = vmatprep.subr.bf16.mxu1 %v5880_v2  ;;  %v3622_v18 = vld [vmem:[#allocation2 + $0xbf8] sm:$0xff]  ;;  %v5890_v1 = vpack.c.bf16 %v3574_v17, %v3571_v63  ;;  %v3233_v59 = vld [vmem:[%s8863_s1 + $0xa0] sm:$0xf] }
 0x45b   : > { %2710 = vrot.lane.b32.xlu1 %v6258_v10, %s6161_s25  ;;  %2708 = vrot.lane.b32.xlu0 %v7939_v16, %s6161_s25  ;;  %v5650_v35 = vpack.c.bf16 %v2379_v25, %v2376_v27  ;;  %v5888_v6 = vpack.c.bf16 %v3622_v18, %v3619_v29  ;;  %v8138_v2 = vld [vmem:[%s6211_s17 + $0x18] sm:$0xff] }
 0x45c   : > { %4135 = vmatprep.mubr.f32.mxu0 %v3233_v59 }
 0x45d   : > { %v8120_v12 = vpop.permute.xlu1 %2410  ;;  %v2409_v45 = vpop.permute.xlu0 %2408  ;;  %5651 = vmatpush1.bf16.msra.mxu0 %v5650_v35  ;;  %5883 = vmatpush3.bf16.msra.mxu1 %v5882_v41 }
 0x45e   : > { %v2440_v7 = vsel %vm2438_vm15, %v2409_v45, %v8120_v12  ;;  %5885 = vmatprep.subr.bf16.mxu1 %v5884_v47  ;;  %4136 = vmatmul.mubr.f32.gmra.mrb[2].mxu0 %v3232_v23 }
 0x45f   : > { %2706 = vrot.lane.b32.xlu1 %v8020_v22, %s6161_s25  ;;  %2698 = vrot.lane.b32.xlu0 %v8024_v51, %s6161_s25 }
 0x460   : > { %4206 = vmatprep.mubr.f32.mxu0 %v3222_v39 }
 0x461   : > { %v8128_v3 = vpop.permute.xlu1 %2418  ;;  %v2417_v13 = vpop.permute.xlu0 %2416  ;;  %5887 = vmatpush3.bf16.msra.mxu1 %v5886_v43 }
 0x462   : > { %v2443_v62 = vsel %vm2438_vm15, %v2417_v13, %v8128_v3  ;;  %5889 = vmatprep.subr.bf16.mxu1 %v5888_v6 }
 0x463   : > { %2489 = vrot.lane.b32.xlu1 %v8133_v61, %s6158_s30  ;;  %2481 = vrot.lane.b32.xlu0 %v8138_v2, %s6158_s30  ;;  %v5652_v15 = vpack.c.bf16 %v2443_v62, %v2440_v7 }
 0x465   : > { %v2415_v25 = vpop.permute.xlu1 %2414  ;;  %v2407_v27 = vpop.permute.xlu0 %2406  ;;  %5653 = vmatprep.subr.bf16.mxu0 %v5652_v15  ;;  %5891 = vmatpush3.bf16.msra.mxu1 %v5890_v1  ;;  %v8185_v1 = vld [vmem:[%s6211_s17 + $0x78] sm:$0xff] }
 0x466   : > { %v2442_v19 = vsel %vm2438_vm15, %v2415_v25, %v2417_v13  ;;  %v2439_v35 = vsel %vm2438_vm15, %v2407_v27, %v2409_v45 }
 0x467   : > { %2213 = vrot.lane.b32.xlu1 %v8133_v61, %s6154_s16  ;;  %2205 = vrot.lane.b32.xlu0 %v8138_v2, %s6154_s16  ;;  %v5654_v41 = vpack.c.bf16 %v2442_v19, %v2439_v35 }
 0x468   : > { %4663 = vmatmul.mubr.f32.vlgmr.msra.gmra.mrb[20].mxu1 %v7948_v21 }
 0x469   : > { %v8158_v47 = vpop.permute.xlu1 %2426  ;;  %v2425_v8 = vpop.permute.xlu0 %2424  ;;  %5655 = vmatpush1.bf16.msra.mxu0 %v5654_v41  ;;  %4667 = vmatprep.mubr.f32.mxu1 %v3233_v59  ;;  %v8190_v59 = vld [vmem:[%s6211_s17 + $0x58] sm:$0xff]  ;;  %s6163_s17 = smov 12  }
 0x46a   : > { %v2446_v45 = vsel %vm2438_vm15, %v2425_v8, %v8158_v47 }
 0x46b   : > { %2755 = vrot.lane.b32.xlu1 %v6214_v0, %s6162_s4  ;;  %2753 = vrot.lane.b32.xlu0 %v7961_v28, %s6162_s4 }
 0x46c   : > { %4668 = vmatmul.mubr.f32.gmra.mrb[22].mxu1 %v3232_v23 }
 0x46d   : > { %v8166_v18 = vpop.permute.xlu1 %2434  ;;  %v2433_v21 = vpop.permute.xlu0 %2432  ;;  %4737 = vmatprep.mubr.f32.mxu1 %v3222_v39 }
 0x46e   : > { %v2449_v7 = vsel %vm2438_vm15, %v2433_v21, %v8166_v18 }
 0x46f   : > { %2763 = vrot.lane.b32.xlu1 %v6232_v4, %s6162_s4  ;;  %2761 = vrot.lane.b32.xlu0 %v7972_v48, %s6162_s4  ;;  %v5656_v55 = vpack.c.bf16 %v2449_v7, %v2446_v45 }
 0x471   : > { %v2431_v43 = vpop.permute.xlu1 %2430  ;;  %v2423_v29 = vpop.permute.xlu0 %2422  ;;  %5657 = vmatprep.subr.bf16.mxu0 %v5656_v55 }
 0x472   : > { %v2448_v6 = vsel %vm2438_vm15, %v2431_v43, %v2433_v21  ;;  %v2445_v17 = vsel %vm2438_vm15, %v2423_v29, %v2425_v8 }
 0x473   : > { %2759 = vrot.lane.b32.xlu1 %v7980_v31, %s6162_s4  ;;  %2751 = vrot.lane.b32.xlu0 %v7984_v32, %s6162_s4  ;;  %v5658_v13 = vpack.c.bf16 %v2448_v6, %v2445_v17 }
 0x475   : > { %v8180_v62 = vpop.permute.xlu1 %2479  ;;  %v2478_v63 = vpop.permute.xlu0 %2477  ;;  %5659 = vmatpush1.bf16.msra.mxu0 %v5658_v13 }
 0x476   : > { %v2509_v15 = vsel %vm2507_vm1, %v2478_v63, %v8180_v62 }
 0x477   : > { %2505 = vrot.lane.b32.xlu1 %v8185_v1, %s6158_s30  ;;  %2497 = vrot.lane.b32.xlu0 %v8190_v59, %s6158_s30 }
 0x479   : > { %v8194_v23 = vpop.permute.xlu1 %2487  ;;  %v2486_v25 = vpop.permute.xlu0 %2485 }
 0x47a   : > { %v2512_v27 = vsel %vm2507_vm1, %v2486_v25, %v8194_v23 }
 0x47b   : > { %2229 = vrot.lane.b32.xlu1 %v8185_v1, %s6154_s16  ;;  %2221 = vrot.lane.b32.xlu0 %v8190_v59, %s6154_s16  ;;  %v5660_v19 = vpack.c.bf16 %v2512_v27, %v2509_v15 }
 0x47d   : > { %v2484_v35 = vpop.permute.xlu1 %2483  ;;  %v2476_v41 = vpop.permute.xlu0 %2475  ;;  %5661 = vmatprep.subr.bf16.mxu0 %v5660_v19 }
 0x47e   : > { %v2511_v39 = vsel %vm2507_vm1, %v2484_v35, %v2486_v25  ;;  %v2508_v8 = vsel %vm2507_vm1, %v2476_v41, %v2478_v63 }
 0x47f   : > { %2771 = vrot.lane.b32.xlu1 %v6255_v9, %s6162_s4  ;;  %2769 = vrot.lane.b32.xlu0 %v7994_v5, %s6162_s4  ;;  %v5662_v45 = vpack.c.bf16 %v2511_v39, %v2508_v8 }
 0x481   : > { %v8208_v21 = vpop.permute.xlu1 %2495  ;;  %v2494_v7 = vpop.permute.xlu0 %2493  ;;  %5663 = vmatpush1.bf16.msra.mxu0 %v5662_v45 }
 0x482   : > { %v2515_v55 = vsel %vm2507_vm1, %v2494_v7, %v8208_v21 }
 0x483   : > { %2779 = vrot.lane.b32.xlu1 %v6258_v10, %s6162_s4  ;;  %2777 = vrot.lane.b32.xlu0 %v7939_v16, %s6162_s4 }
 0x485   : > { %v8216_v43 = vpop.permute.xlu1 %2503  ;;  %v2502_v29 = vpop.permute.xlu0 %2501 }
 0x486   : > { %v2518_v6 = vsel %vm2507_vm1, %v2502_v29, %v8216_v43 }
 0x487   : > { %2775 = vrot.lane.b32.xlu1 %v8020_v22, %s6162_s4  ;;  %2767 = vrot.lane.b32.xlu0 %v8024_v51, %s6162_s4  ;;  %v5664_v17 = vpack.c.bf16 %v2518_v6, %v2515_v55 }
 0x489   : > { %v2500_v13 = vpop.permute.xlu1 %2499  ;;  %v2492_v63 = vpop.permute.xlu0 %2491  ;;  %5665 = vmatprep.subr.bf16.mxu0 %v5664_v17 }
 0x48a   : > { %v2517_v15 = vsel %vm2507_vm1, %v2500_v13, %v2502_v29  ;;  %v2514_v25 = vsel %vm2507_vm1, %v2492_v63, %v2494_v7 }
 0x48b   : > { %2558 = vrot.lane.b32.xlu1 %v8133_v61, %s6159_s9  ;;  %2550 = vrot.lane.b32.xlu0 %v8138_v2, %s6159_s9  ;;  %v5666_v27 = vpack.c.bf16 %v2517_v15, %v2514_v25 }
 0x48d   : > { %v8230_v19 = vpop.permute.xlu1 %2548  ;;  %v2547_v35 = vpop.permute.xlu0 %2546  ;;  %5667 = vmatpush1.bf16.msra.mxu0 %v5666_v27 }
 0x48e   : > { %v2578_v41 = vsel %vm2576_vm2, %v2547_v35, %v8230_v19 }
 0x48f   : > { %2282 = vrot.lane.b32.xlu1 %v8133_v61, %s6155_s19  ;;  %2274 = vrot.lane.b32.xlu0 %v8138_v2, %s6155_s19 }
 0x491   : > { %v8238_v39 = vpop.permute.xlu1 %2556  ;;  %v2555_v8 = vpop.permute.xlu0 %2554 }
 0x492   : > { %v2581_v45 = vsel %vm2576_vm2, %v2555_v8, %v8238_v39 }
 0x493   : > { %2824 = vrot.lane.b32.xlu1 %v6214_v0, %s6163_s17  ;;  %2822 = vrot.lane.b32.xlu0 %v7961_v28, %s6163_s17  ;;  %v5668_v7 = vpack.c.bf16 %v2581_v45, %v2578_v41 }
 0x495   : > { %v2553_v55 = vpop.permute.xlu1 %2552  ;;  %v2545_v29 = vpop.permute.xlu0 %2544  ;;  %5669 = vmatprep.subr.bf16.mxu0 %v5668_v7 }
 0x496   : > { %v2580_v6 = vsel %vm2576_vm2, %v2553_v55, %v2555_v8  ;;  %v2577_v17 = vsel %vm2576_vm2, %v2545_v29, %v2547_v35 }
 0x497   : > { %2832 = vrot.lane.b32.xlu1 %v6232_v4, %s6163_s17  ;;  %2830 = vrot.lane.b32.xlu0 %v7972_v48, %s6163_s17  ;;  %v5670_v13 = vpack.c.bf16 %v2580_v6, %v2577_v17 }
 0x499   : > { %v8252_v63 = vpop.permute.xlu1 %2564  ;;  %v2563_v15 = vpop.permute.xlu0 %2562  ;;  %5671 = vmatpush1.bf16.msra.mxu0 %v5670_v13 }
 0x49a   : > { %v2584_v28 = vsel %vm2576_vm2, %v2563_v15, %v8252_v63 }
 0x49b   : > { %2828 = vrot.lane.b32.xlu1 %v7980_v31, %s6163_s17  ;;  %2820 = vrot.lane.b32.xlu0 %v7984_v32, %s6163_s17 }
 0x49d   : > { %v8260_v25 = vpop.permute.xlu1 %2572  ;;  %v2571_v27 = vpop.permute.xlu0 %2570 }
 0x49e   : > { %v2587_v48 = vsel %vm2576_vm2, %v2571_v27, %v8260_v25 }
 0x49f   : > { %2574 = vrot.lane.b32.xlu1 %v8185_v1, %s6159_s9  ;;  %2566 = vrot.lane.b32.xlu0 %v8190_v59, %s6159_s9  ;;  %v5672_v35 = vpack.c.bf16 %v2587_v48, %v2584_v28  ;;  %s6165_s9 = smov 120  }
 0x4a1   : > { %v2569_v41 = vpop.permute.xlu1 %2568  ;;  %v2561_v8 = vpop.permute.xlu0 %2560  ;;  %5673 = vmatprep.subr.bf16.mxu0 %v5672_v35 }
 0x4a2   : > { %v2586_v31 = vsel %vm2576_vm2, %v2569_v41, %v2571_v27  ;;  %v2583_v32 = vsel %vm2576_vm2, %v2561_v8, %v2563_v15 }
 0x4a3   : > { %2298 = vrot.lane.b32.xlu1 %v8185_v1, %s6155_s19  ;;  %2290 = vrot.lane.b32.xlu0 %v8190_v59, %s6155_s19  ;;  %v5674_v45 = vpack.c.bf16 %v2586_v31, %v2583_v32  ;;  %s6168_s19 = smov 74  }
 0x4a5   : > { %v8274_v7 = vpop.permute.xlu1 %2617  ;;  %v2616_v55 = vpop.permute.xlu0 %2615  ;;  %5675 = vmatpush1.bf16.msra.mxu0 %v5674_v45 }
 0x4a6   : > { %v2647_v29 = vsel %vm2645_vm7, %v2616_v55, %v8274_v7 }
 0x4a7   : > { %2840 = vrot.lane.b32.xlu1 %v6255_v9, %s6163_s17  ;;  %2838 = vrot.lane.b32.xlu0 %v7994_v5, %s6163_s17 }
 0x4a9   : > { %v8282_v6 = vpop.permute.xlu1 %2625  ;;  %v2624_v17 = vpop.permute.xlu0 %2623 }
 0x4aa   : > { %v2650_v13 = vsel %vm2645_vm7, %v2624_v17, %v8282_v6 }
 0x4ab   : > { %2848 = vrot.lane.b32.xlu1 %v6258_v10, %s6163_s17  ;;  %2846 = vrot.lane.b32.xlu0 %v7939_v16, %s6163_s17  ;;  %v5676_v15 = vpack.c.bf16 %v2650_v13, %v2647_v29 }
 0x4ad   : > { %v2622_v28 = vpop.permute.xlu1 %2621  ;;  %v2614_v27 = vpop.permute.xlu0 %2613  ;;  %5677 = vmatprep.subr.bf16.mxu0 %v5676_v15 }
 0x4ae   : > { %v2649_v48 = vsel %vm2645_vm7, %v2622_v28, %v2624_v17  ;;  %v2646_v5 = vsel %vm2645_vm7, %v2614_v27, %v2616_v55 }
 0x4af   : > { %2844 = vrot.lane.b32.xlu1 %v8020_v22, %s6163_s17  ;;  %2836 = vrot.lane.b32.xlu0 %v8024_v51, %s6163_s17  ;;  %v5678_v35 = vpack.c.bf16 %v2649_v48, %v2646_v5 }
 0x4b1   : > { %v8296_v41 = vpop.permute.xlu1 %2633  ;;  %v2632_v8 = vpop.permute.xlu0 %2631  ;;  %5679 = vmatpush1.bf16.msra.mxu0 %v5678_v35 }
 0x4b2   : > { %v2653_v16 = vsel %vm2645_vm7, %v2632_v8, %v8296_v41 }
 0x4b3   : > { %2627 = vrot.lane.b32.xlu1 %v8133_v61, %s6160_s6  ;;  %2619 = vrot.lane.b32.xlu0 %v8138_v2, %s6160_s6 }
 0x4b5   : > { %v8304_v31 = vpop.permute.xlu1 %2641  ;;  %v2640_v22 = vpop.permute.xlu0 %2639 }
 0x4b6   : > { %v2656_v51 = vsel %vm2645_vm7, %v2640_v22, %v8304_v31 }
 0x4b7   : > { %2351 = vrot.lane.b32.xlu1 %v8133_v61, %s6156_s20  ;;  %2343 = vrot.lane.b32.xlu0 %v8138_v2, %s6156_s20  ;;  %v5680_v32 = vpack.c.bf16 %v2656_v51, %v2653_v16 }
 0x4b9   : > { %v2638_v45 = vpop.permute.xlu1 %2637  ;;  %v2630_v55 = vpop.permute.xlu0 %2629  ;;  %5681 = vmatprep.subr.bf16.mxu0 %v5680_v32 }
 0x4ba   : > { %v2655_v29 = vsel %vm2645_vm7, %v2638_v45, %v2640_v22  ;;  %v2652_v17 = vsel %vm2645_vm7, %v2630_v55, %v2632_v8 }
 0x4bb   : > { %2891 = vrot.lane.b32.xlu1 %v8133_v61, %s6124_s21  ;;  %2889 = vrot.lane.b32.xlu0 %v8138_v2, %s6124_s21  ;;  %v5682_v13 = vpack.c.bf16 %v2655_v29, %v2652_v17 }
 0x4bd   : > { %v8318_v15 = vpop.permute.xlu1 %2686  ;;  %v2685_v28 = vpop.permute.xlu0 %2684  ;;  %5683 = vmatpush1.bf16.msra.mxu0 %v5682_v13 }
 0x4be   : > { %v2716_v27 = vsel %vm2714_vm8, %v2685_v28, %v8318_v15 }
 0x4bf   : > { %2643 = vrot.lane.b32.xlu1 %v8185_v1, %s6160_s6  ;;  %2635 = vrot.lane.b32.xlu0 %v8190_v59, %s6160_s6  ;;  %s6166_s6 = smov 119  }
 0x4c1   : > { %v8326_v48 = vpop.permute.xlu1 %2694  ;;  %v2693_v5 = vpop.permute.xlu0 %2692 }
 0x4c2   : > { %v2719_v35 = vsel %vm2714_vm8, %v2693_v5, %v8326_v48 }
 0x4c3   : > { %2367 = vrot.lane.b32.xlu1 %v8185_v1, %s6156_s20  ;;  %2359 = vrot.lane.b32.xlu0 %v8190_v59, %s6156_s20  ;;  %v5684_v8 = vpack.c.bf16 %v2719_v35, %v2716_v27 }
 0x4c5   : > { %v2691_v16 = vpop.permute.xlu1 %2690  ;;  %v2683_v22 = vpop.permute.xlu0 %2682  ;;  %5685 = vmatprep.subr.bf16.mxu0 %v5684_v8 }
 0x4c6   : > { %v2718_v51 = vsel %vm2714_vm8, %v2691_v16, %v2693_v5  ;;  %v2715_v32 = vsel %vm2714_vm8, %v2683_v22, %v2685_v28 }
 0x4c7   : > { %2895 = vrot.lane.b32.xlu1 %v8185_v1, %s6124_s21  ;;  %2893 = vrot.lane.b32.xlu0 %v8190_v59, %s6124_s21  ;;  %v5686_v45 = vpack.c.bf16 %v2718_v51, %v2715_v32 }
 0x4c9   : > { %v8340_v55 = vpop.permute.xlu1 %2702  ;;  %v2701_v29 = vpop.permute.xlu0 %2700  ;;  %5687 = vmatpush1.bf16.msra.mxu0 %v5686_v45 }
 0x4ca   : > { %v2722_v17 = vsel %vm2714_vm8, %v2701_v29, %v8340_v55 }
 0x4cb   : > { %2696 = vrot.lane.b32.xlu1 %v8133_v61, %s6161_s25  ;;  %2688 = vrot.lane.b32.xlu0 %v8138_v2, %s6161_s25 }
 0x4cd   : > { %v8348_v13 = vpop.permute.xlu1 %2710  ;;  %v2709_v28 = vpop.permute.xlu0 %2708 }
 0x4ce   : > { %v2725_v27 = vsel %vm2714_vm8, %v2709_v28, %v8348_v13 }
 0x4cf   : > { %2420 = vrot.lane.b32.xlu1 %v8133_v61, %s6157_s29  ;;  %2412 = vrot.lane.b32.xlu0 %v8138_v2, %s6157_s29  ;;  %v5688_v5 = vpack.c.bf16 %v2725_v27, %v2722_v17  ;;  %v8365_v17 = vld [vmem:[%s8863_s1 + $0x40] sm:$0xff] }
 0x4d1   : > { %v2707_v35 = vpop.permute.xlu1 %2706  ;;  %v2699_v8 = vpop.permute.xlu0 %2698  ;;  %5689 = vmatprep.subr.bf16.mxu0 %v5688_v5 }
 0x4d2   : > { %v2724_v16 = vsel %vm2714_vm8, %v2707_v35, %v2709_v28  ;;  %v2721_v22 = vsel %vm2714_vm8, %v2699_v8, %v2701_v29 }
 0x4d3   : > { %2923 = vrot.lane.b32.xlu1 %v8133_v61, %s6125_s22  ;;  %2921 = vrot.lane.b32.xlu0 %v8138_v2, %s6125_s22  ;;  %v5690_v51 = vpack.c.bf16 %v2724_v16, %v2721_v22 }
 0x4d5   : > { %v2490_v32 = vpop.permute.xlu1 %2489  ;;  %v2482_v45 = vpop.permute.xlu0 %2481  ;;  %5691 = vmatpush1.bf16.msra.mxu0 %v5690_v51  ;;  %v8399_v51 = vld [vmem:[%s8863_s1 + $0xb0] sm:$0xf] }
 0x4d6   : > { %v2513_v28 = vsel %vm2507_vm1, %v8194_v23, %v2490_v32  ;;  %v2510_v29 = vsel %vm2507_vm1, %v8180_v62, %v2482_v45  ;;  %8872 = vst [vmem:[#allocation5_spill] sm:$0xff] %v8399_v51  ;;  %v8404_v32 = vld [vmem:[%s8863_s1 + $0xa8] sm:$0xf] }
 0x4d7   : > { %2537 = vst.msk [vmem:[#allocation2 + $0xda8] sm:$0xff] %vm189_vm0, %v2513_v28  ;;  %2534 = vst.msk [vmem:[#allocation2 + $0xd90] sm:$0xff] %vm189_vm0, %v2510_v29  ;;  %2712 = vrot.lane.b32.xlu1 %v8185_v1, %s6161_s25  ;;  %2704 = vrot.lane.b32.xlu0 %v8190_v59, %s6161_s25  ;;  %s6174_s25 = smov 92  }
 0x4d8   : > { %4207 = vmatmul.mubr.f32.vlgmr.msra.gmra.mrb[0].mxu0 %v8365_v17  ;;  %8873 = vst [vmem:[#allocation6_spill] sm:$0xff] %v8404_v32 }
 0x4d9   : > { %v2214_v27 = vpop.permute.xlu1 %2213  ;;  %v2206_v5 = vpop.permute.xlu0 %2205  ;;  %4212 = vmatprep.mubr.f32.mxu0 %v8399_v51 }
 0x4da   : > { %v2237_v23 = vsel %vm2231_vm12, %v7965_v34, %v2214_v27  ;;  %v2234_v62 = vsel %vm2231_vm12, %v7954_v20, %v2206_v5 }
 0x4db   : > { %2261 = vst.msk [vmem:[#allocation2 + $0xc28] sm:$0xff] %vm189_vm0, %v2237_v23  ;;  %2258 = vst.msk [vmem:[#allocation2 + $0xc10] sm:$0xff] %vm189_vm0, %v2234_v62  ;;  %2436 = vrot.lane.b32.xlu1 %v8185_v1, %s6157_s29  ;;  %2428 = vrot.lane.b32.xlu0 %v8190_v59, %s6157_s29 }
 0x4dc   : > { %4213 = vmatmul.mubr.f32.gmra.mrb[2].mxu0 %v8404_v32 }
 0x4dd   : > { %v8388_v35 = vpop.permute.xlu1 %2755  ;;  %v2754_v8 = vpop.permute.xlu0 %2753 }
 0x4de   : > { %v2785_v34 = vsel %vm2783_vm11, %v2754_v8, %v8388_v35  ;;  %v3673_v16 = vld [vmem:[#allocation2 + $0xd90] sm:$0xff]  ;;  %v3676_v22 = vld [vmem:[#allocation2 + $0xda8] sm:$0xff] }
 0x4df   : > { %2927 = vrot.lane.b32.xlu1 %v8185_v1, %s6125_s22  ;;  %2925 = vrot.lane.b32.xlu0 %v8190_v59, %s6125_s22  ;;  %v5892_v20 = vpack.c.bf16 %v3676_v22, %v3673_v16  ;;  %s6164_s22 = smov 121  }
 0x4e1   : > { %v8407_v45 = vpop.permute.xlu1 %2763  ;;  %v2762_v28 = vpop.permute.xlu0 %2761  ;;  %5893 = vmatprep.subr.bf16.mxu1 %v5892_v20 }
 0x4e2   : > { %v2788_v29 = vsel %vm2783_vm11, %v2762_v28, %v8407_v45  ;;  %v3625_v27 = vld [vmem:[#allocation2 + $0xc10] sm:$0xff]  ;;  %v3628_v5 = vld [vmem:[#allocation2 + $0xc28] sm:$0xff] }
 0x4e3   : > { %2765 = vrot.lane.b32.xlu1 %v8133_v61, %s6162_s4  ;;  %2757 = vrot.lane.b32.xlu0 %v8138_v2, %s6162_s4  ;;  %v5894_v23 = vpack.c.bf16 %v3628_v5, %v3625_v27  ;;  %v5692_v62 = vpack.c.bf16 %v2788_v29, %v2785_v34 }
 0x4e5   : > { %v2760_v16 = vpop.permute.xlu1 %2759  ;;  %v2752_v22 = vpop.permute.xlu0 %2751  ;;  %5895 = vmatpush3.bf16.msra.mxu1 %v5894_v23  ;;  %5693 = vmatprep.subr.bf16.mxu0 %v5692_v62 }
 0x4e6   : > { %v2787_v20 = vsel %vm2783_vm11, %v2760_v16, %v2762_v28  ;;  %v2784_v50 = vsel %vm2783_vm11, %v2752_v22, %v2754_v8 }
 0x4e7   : > { %2955 = vrot.lane.b32.xlu1 %v8133_v61, %s6126_s23  ;;  %2953 = vrot.lane.b32.xlu0 %v8138_v2, %s6126_s23  ;;  %v5694_v53 = vpack.c.bf16 %v2787_v20, %v2784_v50 }
 0x4e9   : > { %v2506_v32 = vpop.permute.xlu1 %2505  ;;  %v2498_v51 = vpop.permute.xlu0 %2497  ;;  %5695 = vmatpush1.bf16.msra.mxu0 %v5694_v53 }
 0x4ea   : > { %v2519_v34 = vsel %vm2507_vm1, %v8216_v43, %v2506_v32  ;;  %v2516_v29 = vsel %vm2507_vm1, %v8208_v21, %v2498_v51 }
 0x4eb   : > { %2543 = vst.msk [vmem:[#allocation2 + $0xdd8] sm:$0xff] %vm189_vm0, %v2519_v34  ;;  %2540 = vst.msk [vmem:[#allocation2 + $0xdc0] sm:$0xff] %vm189_vm0, %v2516_v29  ;;  %2781 = vrot.lane.b32.xlu1 %v8185_v1, %s6162_s4  ;;  %2773 = vrot.lane.b32.xlu0 %v8190_v59, %s6162_s4 }
 0x4ed   : > { %v2230_v50 = vpop.permute.xlu1 %2229  ;;  %v2222_v8 = vpop.permute.xlu0 %2221 }
 0x4ee   : > { %v2243_v53 = vsel %vm2231_vm12, %v7988_v58, %v2230_v50  ;;  %v2240_v43 = vsel %vm2231_vm12, %v7976_v49, %v2222_v8  ;;  %vm2852_vm12 = vcmask 97280  }
 0x4ef   : > { %2267 = vst.msk [vmem:[#allocation2 + $0xc58] sm:$0xff] %vm189_vm0, %v2243_v53  ;;  %2264 = vst.msk [vmem:[#allocation2 + $0xc40] sm:$0xff] %vm189_vm0, %v2240_v43  ;;  %2959 = vrot.lane.b32.xlu1 %v8185_v1, %s6126_s23  ;;  %2957 = vrot.lane.b32.xlu0 %v8190_v59, %s6126_s23 }
 0x4f1   : > { %v8442_v21 = vpop.permute.xlu1 %2771  ;;  %v2770_v51 = vpop.permute.xlu0 %2769 }
 0x4f2   : > { %v2791_v32 = vsel %vm2783_vm11, %v2770_v51, %v8442_v21  ;;  %v3679_v58 = vld [vmem:[#allocation2 + $0xdc0] sm:$0xff]  ;;  %v3682_v28 = vld [vmem:[#allocation2 + $0xdd8] sm:$0xff] }
 0x4f3   : > { %2834 = vrot.lane.b32.xlu1 %v8133_v61, %s6163_s17  ;;  %2826 = vrot.lane.b32.xlu0 %v8138_v2, %s6163_s17  ;;  %v5896_v49 = vpack.c.bf16 %v3682_v28, %v3679_v58 }
 0x4f5   : > { %v8450_v27 = vpop.permute.xlu1 %2779  ;;  %v2778_v5 = vpop.permute.xlu0 %2777  ;;  %5897 = vmatprep.subr.bf16.mxu1 %v5896_v49  ;;  %v8474_v49 = vld [vmem:[#allocation2 + $0x8] sm:$0xff] }
 0x4f6   : > { %v2794_v23 = vsel %vm2783_vm11, %v2778_v5, %v8450_v27  ;;  %v3631_v62 = vld [vmem:[#allocation2 + $0xc40] sm:$0xff]  ;;  %v3634_v16 = vld [vmem:[#allocation2 + $0xc58] sm:$0xff] }
 0x4f7   : > { %2989 = vrot.lane.b32.xlu1 %v8138_v2, %s6164_s22  ;;  %2987 = vrot.lane.b32.xlu0 %v6214_v0, %s6164_s22  ;;  %v5898_v22 = vpack.c.bf16 %v3634_v16, %v3631_v62  ;;  %v5696_v20 = vpack.c.bf16 %v2794_v23, %v2791_v32 }
 0x4f9   : > { %v2776_v34 = vpop.permute.xlu1 %2775  ;;  %v2768_v29 = vpop.permute.xlu0 %2767  ;;  %5899 = vmatpush3.bf16.msra.mxu1 %v5898_v22  ;;  %5697 = vmatprep.subr.bf16.mxu0 %v5696_v20 }
 0x4fa   : > { %v2793_v50 = vsel %vm2783_vm11, %v2776_v34, %v2778_v5  ;;  %v2790_v8 = vsel %vm2783_vm11, %v2768_v29, %v2770_v51  ;;  %v8470_v51 = vld [vmem:[#allocation2 + $0x20] sm:$0xff] }
 0x4fb   : > { %2995 = vrot.lane.b32.xlu1 %v8133_v61, %s6164_s22  ;;  %2993 = vrot.lane.b32.xlu0 %v6232_v4, %s6164_s22  ;;  %v5698_v53 = vpack.c.bf16 %v2793_v50, %v2790_v8 }
 0x4fd   : > { %v2559_v43 = vpop.permute.xlu1 %2558  ;;  %v2551_v58 = vpop.permute.xlu0 %2550  ;;  %5699 = vmatpush1.bf16.msra.mxu0 %v5698_v53 }
 0x4fe   : > { %v2582_v32 = vsel %vm2576_vm2, %v8238_v39, %v2559_v43  ;;  %v2579_v28 = vsel %vm2576_vm2, %v8230_v19, %v2551_v58 }
 0x4ff   : > { %2606 = vst.msk [vmem:[#allocation2 + $0xe08] sm:$0xff] %vm189_vm0, %v2582_v32  ;;  %2603 = vst.msk [vmem:[#allocation2 + $0xdf0] sm:$0xff] %vm189_vm0, %v2579_v28  ;;  %2991 = vrot.lane.b32.xlu1 %v8470_v51, %s6164_s22  ;;  %2985 = vrot.lane.b32.xlu0 %v8474_v49, %s6164_s22 }
 0x501   : > { %v2283_v5 = vpop.permute.xlu1 %2282  ;;  %v2275_v23 = vpop.permute.xlu0 %2274 }
 0x502   : > { %v2306_v39 = vsel %vm2300_vm13, %v8028_v30, %v2283_v5  ;;  %v2303_v19 = vsel %vm2300_vm13, %v8013_v57, %v2275_v23 }
 0x503   : > { %2330 = vst.msk [vmem:[#allocation2 + $0xc88] sm:$0xff] %vm189_vm0, %v2306_v39  ;;  %2327 = vst.msk [vmem:[#allocation2 + $0xc70] sm:$0xff] %vm189_vm0, %v2303_v19  ;;  %2850 = vrot.lane.b32.xlu1 %v8185_v1, %s6163_s17  ;;  %2842 = vrot.lane.b32.xlu0 %v8190_v59, %s6163_s17  ;;  %v8506_v39 = vld [vmem:[#allocation2 + $0x50] sm:$0xff]  ;;  %v8510_v19 = vld [vmem:[#allocation2 + $0x38] sm:$0xff] }
 0x505   : > { %v8488_v62 = vpop.permute.xlu1 %2824  ;;  %v2823_v16 = vpop.permute.xlu0 %2822 }
 0x506   : > { %v2854_v30 = vsel %vm2852_vm12, %v2823_v16, %v8488_v62  ;;  %v3685_v22 = vld [vmem:[#allocation2 + $0xdf0] sm:$0xff]  ;;  %v3688_v20 = vld [vmem:[#allocation2 + $0xe08] sm:$0xff] }
 0x507   : > { %3001 = vrot.lane.b32.xlu1 %v8190_v59, %s6164_s22  ;;  %2999 = vrot.lane.b32.xlu0 %v6255_v9, %s6164_s22  ;;  %v5900_v57 = vpack.c.bf16 %v3688_v20, %v3685_v22 }
 0x509   : > { %v8496_v34 = vpop.permute.xlu1 %2832  ;;  %v2831_v29 = vpop.permute.xlu0 %2830  ;;  %5901 = vmatprep.subr.bf16.mxu1 %v5900_v57 }
 0x50a   : > { %v2857_v50 = vsel %vm2852_vm12, %v2831_v29, %v8496_v34  ;;  %v3637_v8 = vld [vmem:[#allocation2 + $0xc70] sm:$0xff]  ;;  %v3640_v53 = vld [vmem:[#allocation2 + $0xc88] sm:$0xff] }
 0x50b   : > { %3007 = vrot.lane.b32.xlu1 %v8185_v1, %s6164_s22  ;;  %3005 = vrot.lane.b32.xlu0 %v6258_v10, %s6164_s22  ;;  %v5902_v43 = vpack.c.bf16 %v3640_v53, %v3637_v8  ;;  %v5700_v58 = vpack.c.bf16 %v2857_v50, %v2854_v30 }
 0x50d   : > { %v2829_v32 = vpop.permute.xlu1 %2828  ;;  %v2821_v28 = vpop.permute.xlu0 %2820  ;;  %5903 = vmatpush3.bf16.msra.mxu1 %v5902_v43  ;;  %5701 = vmatprep.subr.bf16.mxu0 %v5700_v58 }
 0x50e   : > { %v2856_v5 = vsel %vm2852_vm12, %v2829_v32, %v2831_v29  ;;  %v2853_v23 = vsel %vm2852_vm12, %v2821_v28, %v2823_v16 }
 0x50f   : > { %3003 = vrot.lane.b32.xlu1 %v8506_v39, %s6164_s22  ;;  %2997 = vrot.lane.b32.xlu0 %v8510_v19, %s6164_s22  ;;  %v5702_v22 = vpack.c.bf16 %v2856_v5, %v2853_v23  ;;  %s6169_s22 = smov 116  }
 0x511   : > { %v2575_v30 = vpop.permute.xlu1 %2574  ;;  %v2567_v20 = vpop.permute.xlu0 %2566  ;;  %5703 = vmatpush1.bf16.msra.mxu0 %v5702_v22 }
 0x512   : > { %v2588_v57 = vsel %vm2576_vm2, %v8260_v25, %v2575_v30  ;;  %v2585_v16 = vsel %vm2576_vm2, %v8252_v63, %v2567_v20 }
 0x513   : > { %2612 = vst.msk [vmem:[#allocation2 + $0xe38] sm:$0xff] %vm189_vm0, %v2588_v57  ;;  %2609 = vst.msk [vmem:[#allocation2 + $0xe20] sm:$0xff] %vm189_vm0, %v2585_v16  ;;  %3046 = vrot.lane.b32.xlu1 %v8138_v2, %s6165_s9  ;;  %3044 = vrot.lane.b32.xlu0 %v6214_v0, %s6165_s9 }
 0x515   : > { %v2299_v29 = vpop.permute.xlu1 %2298  ;;  %v2291_v50 = vpop.permute.xlu0 %2290 }
 0x516   : > { %v2312_v8 = vsel %vm2300_vm13, %v8050_v46, %v2299_v29  ;;  %v2309_v25 = vsel %vm2300_vm13, %v8042_v44, %v2291_v50  ;;  %vm5007_vm13 = vcmask 523264  }
 0x517   : > { %2336 = vst.msk [vmem:[#allocation2 + $0xcb8] sm:$0xff] %vm189_vm0, %v2312_v8  ;;  %2333 = vst.msk [vmem:[#allocation2 + $0xca0] sm:$0xff] %vm189_vm0, %v2309_v25  ;;  %3052 = vrot.lane.b32.xlu1 %v8133_v61, %s6165_s9  ;;  %3050 = vrot.lane.b32.xlu0 %v6232_v4, %s6165_s9 }
 0x519   : > { %v8534_v63 = vpop.permute.xlu1 %2840  ;;  %v2839_v53 = vpop.permute.xlu0 %2838 }
 0x51a   : > { %v2860_v43 = vsel %vm2852_vm12, %v2839_v53, %v8534_v63  ;;  %v3691_v46 = vld [vmem:[#allocation2 + $0xe20] sm:$0xff]  ;;  %v3694_v58 = vld [vmem:[#allocation2 + $0xe38] sm:$0xff] }
 0x51b   : > { %3048 = vrot.lane.b32.xlu1 %v8470_v51, %s6165_s9  ;;  %3042 = vrot.lane.b32.xlu0 %v8474_v49, %s6165_s9  ;;  %v5904_v44 = vpack.c.bf16 %v3694_v58, %v3691_v46 }
 0x51d   : > { %v8542_v32 = vpop.permute.xlu1 %2848  ;;  %v2847_v28 = vpop.permute.xlu0 %2846  ;;  %5905 = vmatprep.subr.bf16.mxu1 %v5904_v44 }
 0x51e   : > { %v2863_v5 = vsel %vm2852_vm12, %v2847_v28, %v8542_v32  ;;  %v3643_v23 = vld [vmem:[#allocation2 + $0xca0] sm:$0xff]  ;;  %v3646_v22 = vld [vmem:[#allocation2 + $0xcb8] sm:$0xff] }
 0x51f   : > { %3058 = vrot.lane.b32.xlu1 %v8190_v59, %s6165_s9  ;;  %3056 = vrot.lane.b32.xlu0 %v6255_v9, %s6165_s9  ;;  %v5906_v30 = vpack.c.bf16 %v3646_v22, %v3643_v23  ;;  %v5704_v20 = vpack.c.bf16 %v2863_v5, %v2860_v43  ;;  %v3746_v23 = vld [vmem:[#allocation2 + $0xfd8] sm:$0xff] }
 0x521   : > { %v2845_v57 = vpop.permute.xlu1 %2844  ;;  %v2837_v16 = vpop.permute.xlu0 %2836  ;;  %5907 = vmatpush3.bf16.msra.mxu1 %v5906_v30  ;;  %5705 = vmatprep.subr.bf16.mxu0 %v5704_v20  ;;  %v3743_v20 = vld [vmem:[#allocation2 + $0xfc0] sm:$0xff] }
 0x522   : > { %v2862_v29 = vsel %vm2852_vm12, %v2845_v57, %v2847_v28  ;;  %v2859_v50 = vsel %vm2852_vm12, %v2837_v16, %v2839_v53  ;;  %v5710_v57 = vpack.c.bf16 %v3746_v23, %v3743_v20 }
 0x523   : > { %3064 = vrot.lane.b32.xlu1 %v8185_v1, %s6165_s9  ;;  %3062 = vrot.lane.b32.xlu0 %v6258_v10, %s6165_s9  ;;  %v5706_v8 = vpack.c.bf16 %v2862_v29, %v2859_v50 }
 0x525   : > { %v2628_v25 = vpop.permute.xlu1 %2627  ;;  %v2620_v46 = vpop.permute.xlu0 %2619  ;;  %5707 = vmatpush1.bf16.msra.mxu0 %v5706_v8 }
 0x526   : > { %v2651_v43 = vsel %vm2645_vm7, %v8282_v6, %v2628_v25  ;;  %v2648_v58 = vsel %vm2645_vm7, %v8274_v7, %v2620_v46  ;;  %v8603_v46 = vld [vmem:[%s8863_s1 + $0x58] sm:$0xff] }
 0x527   : > { %2675 = vst.msk [vmem:[#allocation2 + $0xe68] sm:$0xff] %vm189_vm0, %v2651_v43  ;;  %2672 = vst.msk [vmem:[#allocation2 + $0xe50] sm:$0xff] %vm189_vm0, %v2648_v58  ;;  %3060 = vrot.lane.b32.xlu1 %v8506_v39, %s6165_s9  ;;  %3054 = vrot.lane.b32.xlu0 %v8510_v19, %s6165_s9  ;;  %s6171_s9 = smov 110  }
 0x528   : > { %4283 = vmatprep.mubr.f32.mxu0 %v8603_v46 }
 0x529   : > { %v2352_v53 = vpop.permute.xlu1 %2351  ;;  %v2344_v44 = vpop.permute.xlu0 %2343 }
 0x52a   : > { %v2375_v28 = vsel %vm2369_vm14, %v8075_v33, %v2352_v53  ;;  %v2372_v6 = vsel %vm2369_vm14, %v8064_v60, %v2344_v44  ;;  %v3749_v44 = vld [vmem:[#allocation2 + $0xff0] sm:$0xff] }
 0x52b   : > { %2399 = vst.msk [vmem:[#allocation2 + $0xce8] sm:$0xff] %vm189_vm0, %v2375_v28  ;;  %2396 = vst.msk [vmem:[#allocation2 + $0xcd0] sm:$0xff] %vm189_vm0, %v2372_v6  ;;  %3103 = vrot.lane.b32.xlu1 %v8138_v2, %s6166_s6  ;;  %3101 = vrot.lane.b32.xlu0 %v6214_v0, %s6166_s6 }
 0x52d   : > { %v2892_v7 = vpop.permute.xlu1 %2891  ;;  %v2890_v5 = vpop.permute.xlu0 %2889 }
 0x52e   : > { %v2898_v33 = vsel %vm407_vm4, %v6488_v42, %v2892_v7  ;;  %2914 = vst.msk [vmem:[#allocation2 + $0xfe8] sm:$0xff] %vm189_vm0, %v2892_v7  ;;  %v2897_v60 = vsel %vm407_vm4, %v6478_v40, %v2890_v5  ;;  %2911 = vst.msk [vmem:[#allocation2 + $0xfd0] sm:$0xff] %vm189_vm0, %v2890_v5  ;;  %v3697_v22 = vld [vmem:[#allocation2 + $0xe50] sm:$0xff]  ;;  %v3700_v30 = vld [vmem:[#allocation2 + $0xe68] sm:$0xff] }
 0x52f   : > { %3109 = vrot.lane.b32.xlu1 %v8133_v61, %s6166_s6  ;;  %3107 = vrot.lane.b32.xlu0 %v6232_v4, %s6166_s6  ;;  %v5908_v0 = vpack.c.bf16 %v3700_v30, %v3697_v22  ;;  %v5708_v2 = vpack.c.bf16 %v2898_v33, %v2897_v60  ;;  %v8638_v60 = vpop.f32.mrb[0].mxu1  ;;  %v3758_v30 = vld [vmem:[#allocation2 + $0x1038] sm:$0xff] }
 0x531   : > { %v2644_v42 = vpop.permute.xlu1 %2643  ;;  %v2636_v16 = vpop.permute.xlu0 %2635  ;;  %5909 = vmatprep.subr.bf16.mxu1 %v5908_v0  ;;  %5709 = vmatprep.subr.bf16.mxu0 %v5708_v2 }
 0x532   : > { %v2657_v40 = vsel %vm2645_vm7, %v8304_v31, %v2644_v42  ;;  %v2654_v29 = vsel %vm2645_vm7, %v8296_v41, %v2636_v16  ;;  %v3649_v50 = vld [vmem:[#allocation2 + $0xcd0] sm:$0xff]  ;;  %v3652_v8 = vld [vmem:[#allocation2 + $0xce8] sm:$0xff]  ;;  %5711 = vmatpush1.bf16.msra.mxu0 %v5710_v57  ;;  %v8646_v2 = vpop.f32.mrb[1].mxu1  ;;  %v3755_v42 = vld [vmem:[#allocation2 + $0x1020] sm:$0xff] }
 0x533   : > { %2681 = vst.msk [vmem:[#allocation2 + $0xe98] sm:$0xff] %vm189_vm0, %v2657_v40  ;;  %2678 = vst.msk [vmem:[#allocation2 + $0xe80] sm:$0xff] %vm189_vm0, %v2654_v29  ;;  %3105 = vrot.lane.b32.xlu1 %v8470_v51, %s6166_s6  ;;  %3099 = vrot.lane.b32.xlu0 %v8474_v49, %s6166_s6  ;;  %v5910_v4 = vpack.c.bf16 %v3652_v8, %v3649_v50  ;;  %v8648_v16 = vpop.f32.mrb[2].mxu1  ;;  %v5718_v40 = vpack.c.bf16 %v3758_v30, %v3755_v42  ;;  %v3770_v42 = vld [vmem:[#allocation2 + $0x1098] sm:$0xff] }
 0x534   : > { %v8650_v29 = vpop.f32.mrb[3].mxu1 }
 0x535   : > { %v2368_v61 = vpop.permute.xlu1 %2367  ;;  %v2360_v25 = vpop.permute.xlu0 %2359  ;;  %5911 = vmatpush3.bf16.msra.mxu1 %v5910_v4 }
 0x536   : > { %v2381_v41 = vsel %vm2369_vm14, %v8106_v56, %v2368_v61  ;;  %v2378_v31 = vsel %vm2369_vm14, %v8098_v37, %v2360_v25  ;;  %v3752_v37 = vld [vmem:[#allocation2 + $0x1008] sm:$0xff]  ;;  %v8656_v25 = vpop.f32.mrb[4].mxu1  ;;  %vm5004_vm14 = vcmask 392192  }
 0x537   : > { %2405 = vst.msk [vmem:[#allocation2 + $0xd18] sm:$0xff] %vm189_vm0, %v2381_v41  ;;  %2402 = vst.msk [vmem:[#allocation2 + $0xd00] sm:$0xff] %vm189_vm0, %v2378_v31  ;;  %3115 = vrot.lane.b32.xlu1 %v8190_v59, %s6166_s6  ;;  %3113 = vrot.lane.b32.xlu0 %v6255_v9, %s6166_s6  ;;  %v5714_v28 = vpack.c.bf16 %v3752_v37, %v3749_v44  ;;  %v8660_v31 = vpop.f32.mrb[5].mxu1 }
 0x539   : > { %v2896_v56 = vpop.permute.xlu1 %2895  ;;  %v2894_v51 = vpop.permute.xlu0 %2893 }
 0x53a   : > { %v2900_v49 = vsel %vm407_vm4, %v6514_v54, %v2896_v56  ;;  %2920 = vst.msk [vmem:[#allocation2 + $0x1018] sm:$0xff] %vm189_vm0, %v2896_v56  ;;  %v2899_v43 = vsel %vm407_vm4, %v6504_v52, %v2894_v51  ;;  %2917 = vst.msk [vmem:[#allocation2 + $0x1000] sm:$0xff] %vm189_vm0, %v2894_v51  ;;  %v3703_v58 = vld [vmem:[#allocation2 + $0xe80] sm:$0xff]  ;;  %v3706_v59 = vld [vmem:[#allocation2 + $0xe98] sm:$0xff]  ;;  %v8662_v56 = vpop.f32.mrb[6].mxu1  ;;  %vm3009_vm4 = vcmask 990208  }
 0x53b   : > { %3121 = vrot.lane.b32.xlu1 %v8185_v1, %s6166_s6  ;;  %3119 = vrot.lane.b32.xlu0 %v6258_v10, %s6166_s6  ;;  %v5912_v9 = vpack.c.bf16 %v3706_v59, %v3703_v58  ;;  %v5712_v53 = vpack.c.bf16 %v2900_v49, %v2899_v43  ;;  %v8668_v49 = vpop.f32.mrb[7].mxu1 }
 0x53c   : > { %v5159_v43 = vpop.f32.mrb[8].mxu1 }
 0x53d   : > { %v2697_v54 = vpop.permute.xlu1 %2696  ;;  %v2689_v6 = vpop.permute.xlu0 %2688  ;;  %5913 = vmatprep.subr.bf16.mxu1 %v5912_v9  ;;  %5713 = vmatprep.subr.bf16.mxu0 %v5712_v53  ;;  %v3764_v53 = vld [vmem:[#allocation2 + $0x1068] sm:$0xff] }
 0x53e   : > { %v2720_v52 = vsel %vm2714_vm8, %v8326_v48, %v2697_v54  ;;  %v2717_v7 = vsel %vm2714_vm8, %v8318_v15, %v2689_v6  ;;  %v3655_v5 = vld [vmem:[#allocation2 + $0xd00] sm:$0xff]  ;;  %v3658_v23 = vld [vmem:[#allocation2 + $0xd18] sm:$0xff]  ;;  %5715 = vmatpush1.bf16.msra.mxu0 %v5714_v28  ;;  %v5160_v58 = vpop.f32.mrb[9].mxu1 }
 0x53f   : > { %2744 = vst.msk [vmem:[#allocation2 + $0xec8] sm:$0xff] %vm189_vm0, %v2720_v52  ;;  %2741 = vst.msk [vmem:[#allocation2 + $0xeb0] sm:$0xff] %vm189_vm0, %v2717_v7  ;;  %3117 = vrot.lane.b32.xlu1 %v8506_v39, %s6166_s6  ;;  %3111 = vrot.lane.b32.xlu0 %v8510_v19, %s6166_s6  ;;  %v5914_v10 = vpack.c.bf16 %v3658_v23, %v3655_v5  ;;  %v5161_v44 = vadd.f32 %v5160_v58, %v5159_v43  ;;  %v5162_v6 = vpop.f32.mrb[10].mxu1  ;;  %v3761_v5 = vld [vmem:[#allocation2 + $0x1050] sm:$0xff]  ;;  %s6172_s6 = smov 98  }
 0x540   : > { %v5163_v23 = vpop.f32.mrb[11].mxu1 }
 0x541   : > { %v2421_v1 = vpop.permute.xlu1 %2420  ;;  %v2413_v33 = vpop.permute.xlu0 %2412  ;;  %5915 = vmatpush3.bf16.msra.mxu1 %v5914_v10  ;;  %v5722_v10 = vpack.c.bf16 %v3764_v53, %v3761_v5  ;;  %v8875_v53 = vld [vmem:[#allocation6_spill] sm:$0xff]  ;;  %v8876_v5 = vld [vmem:[#allocation4_spill] sm:$0xff] }
 0x542   : > { %v2444_v15 = vsel %vm2438_vm15, %v8128_v3, %v2421_v1  ;;  %v2441_v48 = vsel %vm2438_vm15, %v8120_v12, %v2413_v33  ;;  %v5164_v1 = vadd.f32 %v5163_v23, %v5162_v6  ;;  %v5197_v33 = vpop.f32.mrb[12].mxu1 }
 0x543   : > { %2468 = vst.msk [vmem:[#allocation2 + $0xd48] sm:$0xff] %vm189_vm0, %v2444_v15  ;;  %2465 = vst.msk [vmem:[#allocation2 + $0xd30] sm:$0xff] %vm189_vm0, %v2441_v48  ;;  %v5198_v30 = vpop.f32.mrb[13].mxu1 }
 0x545   : > { %v2924_v39 = vpop.permute.xlu1 %2923  ;;  %v2922_v22 = vpop.permute.xlu0 %2921 }
 0x546   : > { %v2930_v19 = vsel %vm464_vm5, %v6540_v14, %v2924_v39  ;;  %2946 = vst.msk [vmem:[#allocation2 + $0x1048] sm:$0xff] %vm189_vm0, %v2924_v39  ;;  %v2929_v3 = vsel %vm464_vm5, %v6530_v11, %v2922_v22  ;;  %2943 = vst.msk [vmem:[#allocation2 + $0x1030] sm:$0xff] %vm189_vm0, %v2922_v22  ;;  %v3709_v12 = vld [vmem:[#allocation2 + $0xeb0] sm:$0xff]  ;;  %v3712_v0 = vld [vmem:[#allocation2 + $0xec8] sm:$0xff] }
 0x547   : > { %v5916_v20 = vpack.c.bf16 %v3712_v0, %v3709_v12  ;;  %v5716_v57 = vpack.c.bf16 %v2930_v19, %v2929_v3  ;;  %v5199_v3 = vadd.f32 %v5198_v30, %v5197_v33  ;;  %v5200_v12 = vpop.f32.mrb[14].mxu1 }
 0x548   : > { %v5201_v0 = vpop.f32.mrb[15].mxu1 }
 0x549   : > { %v2713_v14 = vpop.permute.xlu1 %2712  ;;  %v2705_v50 = vpop.permute.xlu0 %2704  ;;  %5917 = vmatprep.subr.bf16.mxu1 %v5916_v20  ;;  %5717 = vmatprep.subr.bf16.mxu0 %v5716_v57 }
 0x54a   : > { %v2726_v11 = vsel %vm2714_vm8, %v8348_v13, %v2713_v14  ;;  %v2723_v8 = vsel %vm2714_vm8, %v8340_v55, %v2705_v50  ;;  %v3661_v4 = vld [vmem:[#allocation2 + $0xd30] sm:$0xff]  ;;  %v3664_v61 = vld [vmem:[#allocation2 + $0xd48] sm:$0xff]  ;;  %5719 = vmatpush1.bf16.msra.mxu0 %v5718_v40  ;;  %v5202_v40 = vadd.f32 %v5201_v0, %v5200_v12  ;;  %v5235_v50 = vpop.f32.mrb[16].mxu1 }
 0x54b   : > { %2750 = vst.msk [vmem:[#allocation2 + $0xef8] sm:$0xff] %vm189_vm0, %v2726_v11  ;;  %2747 = vst.msk [vmem:[#allocation2 + $0xee0] sm:$0xff] %vm189_vm0, %v2723_v8  ;;  %v5918_v41 = vpack.c.bf16 %v3664_v61, %v3661_v4  ;;  %v3767_v8 = vld [vmem:[#allocation2 + $0x1080] sm:$0xff]  ;;  %v5236_v61 = vpop.f32.mrb[17].mxu1 }
 0x54c   : > { %v4520_v4 = vadd.f32 %v5202_v40, %v5164_v1 }
 0x54d   : > { %v2437_v51 = vpop.permute.xlu1 %2436  ;;  %v2429_v37 = vpop.permute.xlu0 %2428  ;;  %5919 = vmatpush3.bf16.msra.mxu1 %v5918_v41  ;;  %v5726_v41 = vpack.c.bf16 %v3770_v42, %v3767_v8 }
 0x54e   : > { %v2450_v55 = vsel %vm2438_vm15, %v8166_v18, %v2437_v51  ;;  %v2447_v13 = vsel %vm2438_vm15, %v8158_v47, %v2429_v37  ;;  %v5237_v51 = vadd.f32 %v5236_v61, %v5235_v50  ;;  %v5238_v37 = vpop.f32.mrb[18].mxu1  ;;  %vm5014_vm15 = vcmask 916480  }
 0x54f   : > { %2474 = vst.msk [vmem:[#allocation2 + $0xd78] sm:$0xff] %vm189_vm0, %v2450_v55  ;;  %2471 = vst.msk [vmem:[#allocation2 + $0xd60] sm:$0xff] %vm189_vm0, %v2447_v13 }
 0x551   : > { %v2928_v59 = vpop.permute.xlu1 %2927  ;;  %v2926_v9 = vpop.permute.xlu0 %2925 }
 0x552   : > { %v2932_v28 = vsel %vm464_vm5, %v6566_v26, %v2928_v59  ;;  %2952 = vst.msk [vmem:[#allocation2 + $0x1078] sm:$0xff] %vm189_vm0, %v2928_v59  ;;  %v2931_v47 = vsel %vm464_vm5, %v6556_v24, %v2926_v9  ;;  %2949 = vst.msk [vmem:[#allocation2 + $0x1060] sm:$0xff] %vm189_vm0, %v2926_v9  ;;  %v3715_v18 = vld [vmem:[#allocation2 + $0xee0] sm:$0xff]  ;;  %v3718_v54 = vld [vmem:[#allocation2 + $0xef8] sm:$0xff]  ;;  %v5239_v59 = vpop.f32.mrb[19].mxu1  ;;  %vm3066_vm5 = vcmask 982016  }
 0x553   : > { %v5920_v52 = vpack.c.bf16 %v3718_v54, %v3715_v18  ;;  %v5720_v7 = vpack.c.bf16 %v2932_v28, %v2931_v47  ;;  %v5273_v9 = vpop.f32.mrb[20].mxu1 }
 0x554   : > { %v5274_v47 = vpop.f32.mrb[21].mxu1 }
 0x555   : > { %v2766_v15 = vpop.permute.xlu1 %2765  ;;  %v2758_v48 = vpop.permute.xlu0 %2757  ;;  %5921 = vmatprep.subr.bf16.mxu1 %v5920_v52  ;;  %5721 = vmatprep.subr.bf16.mxu0 %v5720_v7  ;;  %v3776_v52 = vld [vmem:[#allocation2 + $0x10c8] sm:$0xff]  ;;  %v5275_v7 = vadd.f32 %v5274_v47, %v5273_v9 }
 0x556   : > { %v2789_v26 = vsel %vm2783_vm11, %v8407_v45, %v2766_v15  ;;  %v2786_v24 = vsel %vm2783_vm11, %v8388_v35, %v2758_v48  ;;  %v3667_v39 = vld [vmem:[#allocation2 + $0xd60] sm:$0xff]  ;;  %v3670_v22 = vld [vmem:[#allocation2 + $0xd78] sm:$0xff]  ;;  %5723 = vmatpush1.bf16.msra.mxu0 %v5722_v10  ;;  %v4515_v45 = vadd.f32 %v5199_v3, %v5161_v44  ;;  %v5276_v15 = vpop.f32.mrb[22].mxu1 }
 0x557   : > { %2813 = vst.msk [vmem:[#allocation2 + $0xf28] sm:$0xff] %vm189_vm0, %v2789_v26  ;;  %2810 = vst.msk [vmem:[#allocation2 + $0xf10] sm:$0xff] %vm189_vm0, %v2786_v24  ;;  %v5922_v19 = vpack.c.bf16 %v3670_v22, %v3667_v39  ;;  %v8877_v10 = vld [vmem:[#allocation3_spill] sm:$0xff]  ;;  %v3773_v24 = vld [vmem:[#allocation2 + $0x10b0] sm:$0xff] }
 0x558   : > { %v4590_v58 = vadd.f32 %v5237_v51, %v4515_v45  ;;  %v5730_v22 = vpack.c.bf16 %v3776_v52, %v3773_v24 }
 0x559   : > { %v2956_v20 = vpop.permute.xlu1 %2955  ;;  %v2954_v57 = vpop.permute.xlu0 %2953  ;;  %5923 = vmatpush3.bf16.msra.mxu1 %v5922_v19 }
 0x55a   : > { %v2962_v35 = vsel %vm521_vm6, %v6592_v38, %v2956_v20  ;;  %2978 = vst.msk [vmem:[#allocation2 + $0x10a8] sm:$0xff] %vm189_vm0, %v2956_v20  ;;  %v2961_v14 = vsel %vm521_vm6, %v6582_v36, %v2954_v57  ;;  %2975 = vst.msk [vmem:[#allocation2 + $0x1090] sm:$0xff] %vm189_vm0, %v2954_v57  ;;  %v8874_v38 = vld [vmem:[#allocation5_spill] sm:$0xff]  ;;  %v8706_v39 = vadd.f32 %v5275_v7, %v4590_v58 }
 0x55b   : > { %v5724_v11 = vpack.c.bf16 %v2962_v35, %v2961_v14 }
 0x55c   : > { %4738 = vmatmul.mubr.f32.vlgmr.msra.gmra.mrb[24].mxu1 %v8365_v17  ;;  %v5240_v17 = vadd.f32 %v5239_v59, %v5238_v37 }
 0x55d   : > { %v2782_v55 = vpop.permute.xlu1 %2781  ;;  %v2774_v13 = vpop.permute.xlu0 %2773  ;;  %4742 = vmatprep.mubr.f32.mxu1 %v8874_v38  ;;  %5725 = vmatprep.subr.bf16.mxu0 %v5724_v11 }
 0x55e   : > { %v2795_v36 = vsel %vm2783_vm11, %v8450_v27, %v2782_v55  ;;  %v2792_v43 = vsel %vm2783_vm11, %v8442_v21, %v2774_v13  ;;  %5727 = vmatpush1.bf16.msra.mxu0 %v5726_v41  ;;  %v3721_v44 = vld [vmem:[#allocation2 + $0xf10] sm:$0xff]  ;;  %v3724_v28 = vld [vmem:[#allocation2 + $0xf28] sm:$0xff]  ;;  %v4595_v21 = vadd.f32 %v5240_v17, %v4520_v4 }
 0x55f   : > { %2819 = vst.msk [vmem:[#allocation2 + $0xf58] sm:$0xff] %vm189_vm0, %v2795_v36  ;;  %2816 = vst.msk [vmem:[#allocation2 + $0xf40] sm:$0xff] %vm189_vm0, %v2792_v43  ;;  %v5926_v48 = vpack.c.bf16 %v3724_v28, %v3721_v44 }
 0x560   : > { %4743 = vmatmul.mubr.f32.gmra.mrb[26].mxu1 %v8875_v53 }
 0x561   : > { %v2960_v18 = vpop.permute.xlu1 %2959  ;;  %v2958_v54 = vpop.permute.xlu0 %2957  ;;  %v3769_v27 = vld [vmem:[#allocation2 + $0x1090] sm:$0xff]  ;;  %v3772_v6 = vld [vmem:[#allocation2 + $0x10a8] sm:$0xff]  ;;  %4812 = vmatprep.mubr.f32.mxu1 %v8603_v46 }
 0x562   : > { %v2964_v23 = vsel %vm521_vm6, %v8876_v5, %v2960_v18  ;;  %2984 = vst.msk [vmem:[#allocation2 + $0x10d8] sm:$0xff] %vm189_vm0, %v2960_v18  ;;  %v2963_v1 = vsel %vm521_vm6, %v8877_v10, %v2958_v54  ;;  %2981 = vst.msk [vmem:[#allocation2 + $0x10c0] sm:$0xff] %vm189_vm0, %v2958_v54  ;;  %v5924_v33 = vpack.c.bf16 %v3772_v6, %v3769_v27  ;;  %v5277_v46 = vpop.f32.mrb[23].mxu1  ;;  %vm3123_vm6 = vcmask 973824  }
 0x563   : > { %v5728_v26 = vpack.c.bf16 %v2964_v23, %v2963_v1  ;;  %v5278_v30 = vadd.f32 %v5277_v46, %v5276_v15 }
 0x564   : > { %5925 = vmatprep.subr.bf16.mxu1 %v5924_v33 }
 0x565   : > { %v2835_v19 = vpop.permute.xlu1 %2834  ;;  %v2827_v3 = vpop.permute.xlu0 %2826  ;;  %5927 = vmatpush3.bf16.msra.mxu1 %v5926_v48  ;;  %5729 = vmatprep.subr.bf16.mxu0 %v5728_v26  ;;  %v8712_v20 = vadd.f32 %v5278_v30, %v4595_v21 }
 0x566   : > { %v2858_v12 = vsel %vm2852_vm12, %v8496_v34, %v2835_v19  ;;  %v2855_v0 = vsel %vm2852_vm12, %v8488_v62, %v2827_v3  ;;  %5731 = vmatpush1.bf16.msra.mxu0 %v5730_v22  ;;  %v3727_v57 = vld [vmem:[#allocation2 + $0xf40] sm:$0xff]  ;;  %v3730_v42 = vld [vmem:[#allocation2 + $0xf58] sm:$0xff] }
 0x567   : > { %2882 = vst.msk [vmem:[#allocation2 + $0xf88] sm:$0xff] %vm189_vm0, %v2858_v12  ;;  %2879 = vst.msk [vmem:[#allocation2 + $0xf70] sm:$0xff] %vm189_vm0, %v2855_v0  ;;  %v5930_v62 = vpack.c.bf16 %v3730_v42, %v3727_v57 }
 0x569   : > { %v2990_v45 = vpop.permute.xlu1 %2989  ;;  %v2988_v40 = vpop.permute.xlu0 %2987  ;;  %v3775_v35 = vld [vmem:[#allocation2 + $0x10c0] sm:$0xff]  ;;  %v3778_v14 = vld [vmem:[#allocation2 + $0x10d8] sm:$0xff] }
 0x56a   : > { %3032 = vst.msk [vmem:[#allocation2 + $0x10f0] sm:$0xff] %vm189_vm0, %v2990_v45  ;;  %v3011_v34 = vsel %vm3009_vm4, %v2988_v40, %v2990_v45  ;;  %v5928_v50 = vpack.c.bf16 %v3778_v14, %v3775_v35  ;;  %v3745_v35 = vld [vmem:[#allocation2 + $0xfd0] sm:$0xff]  ;;  %v3748_v14 = vld [vmem:[#allocation2 + $0xfe8] sm:$0xff] }
 0x56c   : > { %5929 = vmatprep.subr.bf16.mxu1 %v5928_v50 }
 0x56d   : > { %v2996_v11 = vpop.permute.xlu1 %2995  ;;  %v2994_v8 = vpop.permute.xlu0 %2993  ;;  %5931 = vmatpush3.bf16.msra.mxu1 %v5930_v62 }
 0x56e   : > { %3035 = vst.msk [vmem:[#allocation2 + $0x1108] sm:$0xff] %vm189_vm0, %v2996_v11  ;;  %v3013_v4 = vsel %vm3009_vm4, %v2994_v8, %v2996_v11  ;;  %v3733_v38 = vld [vmem:[#allocation2 + $0xf70] sm:$0xff]  ;;  %v3736_v36 = vld [vmem:[#allocation2 + $0xf88] sm:$0xff] }
 0x56f   : > { %v5732_v61 = vpack.c.bf16 %v3013_v4, %v3011_v34  ;;  %v5934_v28 = vpack.c.bf16 %v3736_v36, %v3733_v38 }
 0x571   : > { %v2992_v41 = vpop.permute.xlu1 %2991  ;;  %v2986_v51 = vpop.permute.xlu0 %2985  ;;  %5733 = vmatprep.subr.bf16.mxu0 %v5732_v61  ;;  %v3781_v59 = vld [vmem:[#allocation2 + $0x10f0] sm:$0xff]  ;;  %v5942_v61 = vpack.c.bf16 %v3748_v14, %v3745_v35  ;;  %v3763_v35 = vld [vmem:[#allocation2 + $0x1060] sm:$0xff]  ;;  %v3766_v14 = vld [vmem:[#allocation2 + $0x1078] sm:$0xff] }
 0x572   : > { %v3012_v37 = vsel %vm3009_vm4, %v2992_v41, %v2994_v8  ;;  %v3010_v55 = vsel %vm3009_vm4, %v2986_v51, %v2988_v40 }
 0x573   : > { %v5734_v13 = vpack.c.bf16 %v3012_v37, %v3010_v55 }
 0x575   : > { %v2851_v43 = vpop.permute.xlu1 %2850  ;;  %v2843_v58 = vpop.permute.xlu0 %2842  ;;  %v3784_v17 = vld [vmem:[#allocation2 + $0x1108] sm:$0xff]  ;;  %5735 = vmatpush1.bf16.msra.mxu0 %v5734_v13 }
 0x576   : > { %v2864_v9 = vsel %vm2852_vm12, %v8542_v32, %v2851_v43  ;;  %v2861_v53 = vsel %vm2852_vm12, %v8534_v63, %v2843_v58  ;;  %v5932_v44 = vpack.c.bf16 %v3784_v17, %v3781_v59  ;;  %v3751_v59 = vld [vmem:[#allocation2 + $0x1000] sm:$0xff]  ;;  %v3754_v17 = vld [vmem:[#allocation2 + $0x1018] sm:$0xff] }
 0x577   : > { %2888 = vst.msk [vmem:[#allocation2 + $0xfb8] sm:$0xff] %vm189_vm0, %v2864_v9  ;;  %2885 = vst.msk [vmem:[#allocation2 + $0xfa0] sm:$0xff] %vm189_vm0, %v2861_v53 }
 0x578   : > { %5933 = vmatprep.subr.bf16.mxu1 %v5932_v44 }
 0x579   : > { %v3002_v47 = vpop.permute.xlu1 %3001  ;;  %v3000_v18 = vpop.permute.xlu0 %2999  ;;  %5935 = vmatpush3.bf16.msra.mxu1 %v5934_v28 }
 0x57a   : > { %3038 = vst.msk [vmem:[#allocation2 + $0x1120] sm:$0xff] %vm189_vm0, %v3002_v47  ;;  %v3015_v54 = vsel %vm3009_vm4, %v3000_v18, %v3002_v47 }
 0x57d   : > { %v3008_v27 = vpop.permute.xlu1 %3007  ;;  %v3006_v6 = vpop.permute.xlu0 %3005 }
 0x57e   : > { %3041 = vst.msk [vmem:[#allocation2 + $0x1138] sm:$0xff] %vm189_vm0, %v3008_v27  ;;  %v3017_v63 = vsel %vm3009_vm4, %v3006_v6, %v3008_v27  ;;  %v3739_v10 = vld [vmem:[#allocation2 + $0xfa0] sm:$0xff]  ;;  %v3742_v1 = vld [vmem:[#allocation2 + $0xfb8] sm:$0xff] }
 0x57f   : > { %v5736_v32 = vpack.c.bf16 %v3017_v63, %v3015_v54  ;;  %v5938_v22 = vpack.c.bf16 %v3742_v1, %v3739_v10  ;;  %v5946_v54 = vpack.c.bf16 %v3754_v17, %v3751_v59  ;;  %v3757_v10 = vld [vmem:[#allocation2 + $0x1030] sm:$0xff]  ;;  %v3760_v1 = vld [vmem:[#allocation2 + $0x1048] sm:$0xff] }
 0x581   : > { %v3004_v52 = vpop.permute.xlu1 %3003  ;;  %v2998_v21 = vpop.permute.xlu0 %2997  ;;  %5737 = vmatprep.subr.bf16.mxu0 %v5736_v32  ;;  %v3787_v48 = vld [vmem:[#allocation2 + $0x1120] sm:$0xff] }
 0x582   : > { %v3016_v7 = vsel %vm3009_vm4, %v3004_v52, %v3006_v6  ;;  %v3014_v5 = vsel %vm3009_vm4, %v2998_v21, %v3000_v18 }
 0x583   : > { %v5738_v23 = vpack.c.bf16 %v3016_v7, %v3014_v5 }
 0x585   : > { %v3047_v33 = vpop.permute.xlu1 %3046  ;;  %v3045_v15 = vpop.permute.xlu0 %3044  ;;  %v3790_v26 = vld [vmem:[#allocation2 + $0x1138] sm:$0xff]  ;;  %5739 = vmatpush1.bf16.msra.mxu0 %v5738_v23 }
 0x586   : > { %3089 = vst.msk [vmem:[#allocation2 + $0x1150] sm:$0xff] %vm189_vm0, %v3047_v33  ;;  %v3068_v24 = vsel %vm3066_vm5, %v3045_v15, %v3047_v33  ;;  %v5936_v46 = vpack.c.bf16 %v3790_v26, %v3787_v48 }
 0x588   : > { %5937 = vmatprep.subr.bf16.mxu1 %v5936_v46 }
 0x589   : > { %v3053_v30 = vpop.permute.xlu1 %3052  ;;  %v3051_v19 = vpop.permute.xlu0 %3050  ;;  %5939 = vmatpush3.bf16.msra.mxu1 %v5938_v22  ;;  %v5950_v22 = vpack.c.bf16 %v3760_v1, %v3757_v10 }
 0x58a   : > { %3092 = vst.msk [vmem:[#allocation2 + $0x1168] sm:$0xff] %vm189_vm0, %v3053_v30  ;;  %v3070_v3 = vsel %vm3066_vm5, %v3051_v19, %v3053_v30 }
 0x58b   : > { %v5740_v12 = vpack.c.bf16 %v3070_v3, %v3068_v24 }
 0x58d   : > { %v3049_v0 = vpop.permute.xlu1 %3048  ;;  %v3043_v57 = vpop.permute.xlu0 %3042  ;;  %5741 = vmatprep.subr.bf16.mxu0 %v5740_v12  ;;  %v3793_v62 = vld [vmem:[#allocation2 + $0x1150] sm:$0xff] }
 0x58e   : > { %v3069_v42 = vsel %vm3066_vm5, %v3049_v0, %v3051_v19  ;;  %v3067_v45 = vsel %vm3066_vm5, %v3043_v57, %v3045_v15 }
 0x58f   : > { %v5742_v40 = vpack.c.bf16 %v3069_v42, %v3067_v45 }
 0x591   : > { %v3059_v34 = vpop.permute.xlu1 %3058  ;;  %v3057_v50 = vpop.permute.xlu0 %3056  ;;  %v3796_v11 = vld [vmem:[#allocation2 + $0x1168] sm:$0xff]  ;;  %5743 = vmatpush1.bf16.msra.mxu0 %v5742_v40 }
 0x592   : > { %3095 = vst.msk [vmem:[#allocation2 + $0x1180] sm:$0xff] %vm189_vm0, %v3059_v34  ;;  %v3072_v8 = vsel %vm3066_vm5, %v3057_v50, %v3059_v34  ;;  %v5940_v4 = vpack.c.bf16 %v3796_v11, %v3793_v62  ;;  %v3820_v34 = vld [vmem:[#allocation2 + $0x1228] sm:$0xff]  ;;  %v3223_v11 = vld [vmem:[%s8863_s1 + $0x50] sm:$0xff] }
 0x594   : > { %5941 = vmatprep.subr.bf16.mxu1 %v5940_v4  ;;  %v3237_v4 = vld [vmem:[%s8863_s1 + $0xc0] sm:$0xf] }
 0x595   : > { %v3065_v41 = vpop.permute.xlu1 %3064  ;;  %v3063_v51 = vpop.permute.xlu0 %3062  ;;  %5943 = vmatpush3.bf16.msra.mxu1 %v5942_v61  ;;  %v5954_v61 = vpack.c.bf16 %v3766_v14, %v3763_v35 }
 0x596   : > { %3098 = vst.msk [vmem:[#allocation2 + $0x1198] sm:$0xff] %vm189_vm0, %v3065_v41  ;;  %v3074_v37 = vsel %vm3066_vm5, %v3063_v51, %v3065_v41  ;;  %v3817_v41 = vld [vmem:[#allocation2 + $0x1210] sm:$0xff] }
 0x597   : > { %v5744_v55 = vpack.c.bf16 %v3074_v37, %v3072_v8  ;;  %v3826_v37 = vld [vmem:[#allocation2 + $0x1258] sm:$0xff] }
 0x599   : > { %v3061_v13 = vpop.permute.xlu1 %3060  ;;  %v3055_v38 = vpop.permute.xlu0 %3054  ;;  %5745 = vmatprep.subr.bf16.mxu0 %v5744_v55  ;;  %v3799_v44 = vld [vmem:[#allocation2 + $0x1180] sm:$0xff]  ;;  %v3236_v55 = vld [vmem:[%s8863_s1 + $0xb8] sm:$0xf] }
 0x59a   : > { %v3073_v36 = vsel %vm3066_vm5, %v3061_v13, %v3063_v51  ;;  %v3071_v43 = vsel %vm3066_vm5, %v3055_v38, %v3057_v50  ;;  %v5956_v51 = vpack.c.bf16 %v3820_v34, %v3817_v41  ;;  %v3823_v13 = vld [vmem:[#allocation2 + $0x1240] sm:$0xff] }
 0x59b   : > { %v5746_v58 = vpack.c.bf16 %v3073_v36, %v3071_v43  ;;  %v5960_v38 = vpack.c.bf16 %v3826_v37, %v3823_v13  ;;  %v6111_v36 = vld [vmem:[%s8863_s1 + $0x60] sm:$0xff]  ;;  %v6112_v43 = vld [vmem:[%s8863_s1 + $0xc8] sm:$0xf] }
 0x59d   : > { %v3104_v9 = vpop.permute.xlu1 %3103  ;;  %v3102_v53 = vpop.permute.xlu0 %3101  ;;  %v3802_v28 = vld [vmem:[#allocation2 + $0x1198] sm:$0xff]  ;;  %5747 = vmatpush1.bf16.msra.mxu0 %v5746_v58  ;;  %v6167_v58 = vmov 0  }
 0x59e   : > { %3146 = vst.msk [vmem:[#allocation2 + $0x11b0] sm:$0xff] %vm189_vm0, %v3104_v9  ;;  %v3125_v47 = vsel %vm3123_vm6, %v3102_v53, %v3104_v9  ;;  %v5944_v18 = vpack.c.bf16 %v3802_v28, %v3799_v44  ;;  %6052 = vset.pattern.permute.xlu0 %v6167_v58  ;;  %6053 = vset.pattern.permute.xlu1 %v6167_v58 }
 0x5a0   : > { %5945 = vmatprep.subr.bf16.mxu1 %v5944_v18 }
 0x5a1   : > { %v3110_v27 = vpop.permute.xlu1 %3109  ;;  %v3108_v6 = vpop.permute.xlu0 %3107  ;;  %5947 = vmatpush3.bf16.msra.mxu1 %v5946_v54 }
 0x5a2   : > { %3149 = vst.msk [vmem:[#allocation2 + $0x11c8] sm:$0xff] %vm189_vm0, %v3110_v27  ;;  %v3127_v63 = vsel %vm3123_vm6, %v3108_v6, %v3110_v27 }
 0x5a3   : > { %v5748_v32 = vpack.c.bf16 %v3127_v63, %v3125_v47 }
 0x5a5   : > { %v3106_v52 = vpop.permute.xlu1 %3105  ;;  %v3100_v21 = vpop.permute.xlu0 %3099  ;;  %5749 = vmatprep.subr.bf16.mxu0 %v5748_v32  ;;  %v3805_v48 = vld [vmem:[#allocation2 + $0x11b0] sm:$0xff] }
 0x5a6   : > { %v3126_v7 = vsel %vm3123_vm6, %v3106_v52, %v3108_v6  ;;  %v3124_v5 = vsel %vm3123_vm6, %v3100_v21, %v3102_v53 }
 0x5a7   : > { %v5750_v23 = vpack.c.bf16 %v3126_v7, %v3124_v5 }
 0x5a9   : > { %v3116_v33 = vpop.permute.xlu1 %3115  ;;  %v3114_v15 = vpop.permute.xlu0 %3113  ;;  %v3808_v26 = vld [vmem:[#allocation2 + $0x11c8] sm:$0xff]  ;;  %5751 = vmatpush1.bf16.msra.mxu0 %v5750_v23 }
 0x5aa   : > { %3152 = vst.msk [vmem:[#allocation2 + $0x11e0] sm:$0xff] %vm189_vm0, %v3116_v33  ;;  %v3129_v24 = vsel %vm3123_vm6, %v3114_v15, %v3116_v33  ;;  %v5948_v46 = vpack.c.bf16 %v3808_v26, %v3805_v48  ;;  %v5032_v26 = vld [vmem:[%s8864_s2 + $0x8] sm:$0xf] }
 0x5ac   : > { %5949 = vmatprep.subr.bf16.mxu1 %v5948_v46 }
 0x5ad   : > { %v3122_v30 = vpop.permute.xlu1 %3121  ;;  %v3120_v19 = vpop.permute.xlu0 %3119  ;;  %5951 = vmatpush3.bf16.msra.mxu1 %v5950_v22 }
 0x5ae   : > { %3155 = vst.msk [vmem:[#allocation2 + $0x11f8] sm:$0xff] %vm189_vm0, %v3122_v30  ;;  %v3131_v3 = vsel %vm3123_vm6, %v3120_v19, %v3122_v30 }
 0x5af   : > { %v5752_v12 = vpack.c.bf16 %v3131_v3, %v3129_v24 }
 0x5b1   : > { %v3118_v0 = vpop.permute.xlu1 %3117  ;;  %v3112_v57 = vpop.permute.xlu0 %3111  ;;  %5753 = vmatprep.subr.bf16.mxu0 %v5752_v12  ;;  %v3811_v50 = vld [vmem:[#allocation2 + $0x11e0] sm:$0xff] }
 0x5b2   : > { %v3130_v42 = vsel %vm3123_vm6, %v3118_v0, %v3120_v19  ;;  %v3128_v45 = vsel %vm3123_vm6, %v3112_v57, %v3114_v15 }
 0x5b3   : > { %v5754_v40 = vpack.c.bf16 %v3130_v42, %v3128_v45 }
 0x5b5   : > { %v3814_v62 = vld [vmem:[#allocation2 + $0x11f8] sm:$0xff]  ;;  %5755 = vmatpush1.bf16.msra.mxu0 %v5754_v40 }
 0x5b6   : > { %v5952_v8 = vpack.c.bf16 %v3814_v62, %v3811_v50 }
 0x5b8   : > { %5953 = vmatprep.subr.bf16.mxu1 %v5952_v8  ;;  %4284 = vmatmul.mubr.f32.vlgmr.msra.gmra.mrb[0].mxu0 %v3223_v11 }
 0x5b9   : > { %5955 = vmatpush3.bf16.msra.mxu1 %v5954_v61  ;;  %4289 = vmatprep.mubr.f32.mxu0 %v3237_v4 }
 0x5ba   : > { %5957 = vmatprep.subr.bf16.mxu1 %v5956_v51 }
 0x5bc   : > { %4813 = vmatmul.mubr.f32.vlgmr.msra.gmra.mrb[28].mxu1 %v3223_v11  ;;  %4290 = vmatmul.mubr.f32.gmra.mrb[2].mxu0 %v3236_v55 }
 0x5bd   : > { %5959 = vmatpush3.bf16.msra.mxu1 %v5956_v51  ;;  %4817 = vmatprep.mubr.f32.mxu1 %v3237_v4 }
 0x5be   : > { %5961 = vmatprep.subr.bf16.mxu1 %v5960_v38 }
 0x5c0   : > { %4818 = vmatmul.mubr.f32.gmra.mrb[30].mxu1 %v3236_v55 }
 0x5c1   : > { %5963 = vmatpush3.bf16.msra.mxu1 %v5960_v38  ;;  %5369 = vmatprep.mubr.msk.f32.mxu1 %vm3827_vm10, %v6111_v36 }
 0x5c4   : > { %5370 = vmatmul.mubr.msk.f32.vlgmr.msra.gmra.mrb[32].mxu1 %vm3827_vm10, %v6112_v43 }
 0x62f   : > { %v5311_v59 = vpop.f32.mrb[24].mxu1 }
 0x630   : > { %v5312_v17 = vpop.f32.mrb[25].mxu1 }
 0x631   : > { %v5313_v9 = vadd.f32 %v5312_v17, %v5311_v59 }
 0x633   : > { %v4740_v53 = vadd.f32 %v5313_v9, %v8706_v39  ;;  %v5314_v44 = vpop.f32.mrb[26].mxu1 }
 0x634   : > { %v5315_v28 = vpop.f32.mrb[27].mxu1 }
 0x635   : > { %v5316_v47 = vadd.f32 %v5315_v28, %v5314_v44 }
 0x637   : > { %v4745_v18 = vadd.f32 %v5316_v47, %v8712_v20 }
 0x68b   : > { %v4285_v54 = vpop.f32.mrb[0].mxu0 }
 0x68c   : > { %v5964_v27 = vadd.f32 %v4285_v54, %v8638_v60  ;;  %v4287_v6 = vpop.f32.mrb[1].mxu0 }
 0x68d   : > { %v5966_v63 = vadd.f32 %v4287_v6, %v8646_v2 }
 0x68e   : > { %v8780_v32 = vadd.f32 %v5964_v27, %v8656_v25 }
 0x68f   : > { %v5349_v52 = vpop.f32.mrb[28].mxu1  ;;  %v5967_v21 = vadd.f32 %v5966_v63, %v8660_v31  ;;  %v4291_v7 = vpop.f32.mrb[2].mxu0 }
 0x690   : > { %v5350_v5 = vpop.f32.mrb[29].mxu1  ;;  %v5968_v39 = vadd.f32 %v4291_v7, %v8648_v16  ;;  %v4293_v23 = vpop.f32.mrb[3].mxu0  ;;  %4900 = vrot.lane.b32.xlu0 %v8780_v32, %s6126_s23 }
 0x691   : > { %v5351_v20 = vadd.f32 %v5350_v5, %v5349_v52  ;;  %v5970_v60 = vadd.f32 %v4293_v23, %v8650_v29 }
 0x692   : > { %v8788_v10 = vadd.f32 %v5968_v39, %v8662_v56 }
 0x693   : > { %v5352_v2 = vpop.f32.mrb[30].mxu1  ;;  %v5971_v25 = vadd.f32 %v5970_v60, %v8668_v49  ;;  %v4815_v1 = vadd.f32 %v5351_v20, %v4740_v53  ;;  %v5031_v49 = vld [vmem:[%s8864_s2] sm:$0xff] }
 0x694   : > { %v5353_v33 = vpop.f32.mrb[31].mxu1  ;;  %4902 = vrot.lane.b32.xlu1 %v8788_v10, %s6126_s23  ;;  %4944 = vrot.lane.b32.xlu0 %v5967_v21, %s6138_s10 }
 0x695   : > { %v5354_v16 = vadd.f32 %v5353_v33, %v5352_v2 }
 0x697   : > { %v4820_v31 = vadd.f32 %v5354_v16, %v4745_v18  ;;  %v5371_v15 = vpop.f32.mrb[32].mxu1 }
 0x698   : > { %v4889_v48 = vpop.f32.mrb[33].mxu1  ;;  %4946 = vrot.lane.b32.xlu1 %v5971_v25, %s6138_s10  ;;  %4950 = vrot.lane.b32.xlu0 %v5967_v21, %s6168_s19  ;;  %s6170_s10 = smov 68  }
 0x699   : > { %v4895_v29 = vadd.f32 %v5371_v15, %v4820_v31  ;;  %v4890_v56 = vadd.f32 %v4889_v48, %v4815_v1 }
 0x69c   : > { %4952 = vrot.lane.b32.xlu1 %v5971_v25, %s6168_s19  ;;  %5035 = vperm.xlu0 %6052, %v5031_v49  }
 0x6a0   : > { %5040 = vperm.xlu1 %6053, %v5032_v26   ;;  %4908 = vrot.lane.b32.xlu0 %v8788_v10, %s6169_s22 }
 0x6a4   : > { %4906 = vrot.lane.b32.xlu1 %v8780_v32, %s6169_s22  ;;  %4958 = vrot.lane.b32.xlu0 %v5971_v25, %s6170_s10 }
 0x6a8   : > { %4956 = vrot.lane.b32.xlu1 %v5967_v21, %s6170_s10  ;;  %4966 = vrot.lane.b32.xlu0 %v4890_v56, %s6141_s18 }
 0x6ac   : > { %4964 = vrot.lane.b32.xlu1 %v5967_v21, %s6141_s18  ;;  %4970 = vrot.lane.b32.xlu0 %v4895_v29, %s6141_s18 }
 0x6b0   : > { %4968 = vrot.lane.b32.xlu1 %v5971_v25, %s6141_s18  ;;  %4914 = vrot.lane.b32.xlu0 %v8788_v10, %s6171_s9  ;;  %s6173_s18 = smov 50  }
 0x6b4   : > { %4912 = vrot.lane.b32.xlu1 %v8780_v32, %s6171_s9  ;;  %4920 = vrot.lane.b32.xlu0 %v8788_v10, %s6129_s26 }
 0x6b8   : > { %4918 = vrot.lane.b32.xlu1 %v8780_v32, %s6129_s26  ;;  %4978 = vrot.lane.b32.xlu0 %v4895_v29, %s6147_s7  ;;  %s5126_s26 = sshll.u32 %s8879_s13, 5 }
 0x6bc   : > { %4976 = vrot.lane.b32.xlu1 %v4890_v56, %s6147_s7  ;;  %4926 = vrot.lane.b32.xlu0 %v8788_v10, %s6172_s6 }
 0x6c0   : > { %4924 = vrot.lane.b32.xlu1 %v8780_v32, %s6172_s6  ;;  %4984 = vrot.lane.b32.xlu0 %v4895_v29, %s6173_s18 }
 0x6c4   : > { %4982 = vrot.lane.b32.xlu1 %v4890_v56, %s6173_s18  ;;  %4934 = vrot.lane.b32.xlu0 %v5971_v25, %s6174_s25 }
 0x6c8   : > { %4932 = vrot.lane.b32.xlu1 %v5967_v21, %s6174_s25  ;;  %4990 = vrot.lane.b32.xlu0 %v4895_v29, %s6175_s5 }
 0x6cc   : > { %4988 = vrot.lane.b32.xlu1 %v4890_v56, %s6175_s5  ;;  %4940 = vrot.lane.b32.xlu0 %v5971_v25, %s6176_s8 }
 0x6d0   : > { %4938 = vrot.lane.b32.xlu1 %v5967_v21, %s6176_s8  ;;  %4996 = vrot.lane.b32.xlu0 %v4895_v29, %s6150_s15 }
 0x6d4   : > { %4994 = vrot.lane.b32.xlu1 %v4890_v56, %s6150_s15  ;;  %s170_s15 = scalar_lea.vmem %s8865_s3, %s5126_s26 }
 0x702   : > { %v4901_v24 = vpop.permute.xlu0 %4900 }
 0x703   : > { %v5000_v44 = vsel %vm2576_vm2, %v8780_v32, %v4901_v24 }
 0x706   : > { %v4903_v46 = vpop.permute.xlu1 %4902  ;;  %v4945_v22 = vpop.permute.xlu0 %4944 }
 0x707   : > { %v5001_v36 = vsel %vm2576_vm2, %v8788_v10, %v4903_v46 }
 0x70a   : > { %v4947_v30 = vpop.permute.xlu1 %4946  ;;  %v4951_v19 = vpop.permute.xlu0 %4950 }
 0x70b   : > { %v5017_v20 = vsel %vm2576_vm2, %v4945_v22, %v4951_v19 }
 0x70e   : > { %v4953_v3 = vpop.permute.xlu1 %4952 }
 0x70f   : > { %v5018_v28 = vsel %vm2576_vm2, %v4947_v30, %v4953_v3 }
 0x71b   : > { %v8819_v12 = vpop.permute.xlu0 %5035 }
 0x71f   : > { %v5041_v0 = vpop.permute.xlu1 %5040  ;;  %v4909_v57 = vpop.permute.xlu0 %4908 }
 0x720   : > { %v5003_v43 = vsel %vm3827_vm10, %v5001_v36, %v4909_v57 }
 0x723   : > { %v4907_v42 = vpop.permute.xlu1 %4906  ;;  %v4959_v45 = vpop.permute.xlu0 %4958 }
 0x724   : > { %v5002_v18 = vsel %vm3827_vm10, %v5000_v44, %v4907_v42  ;;  %v5020_v54 = vsel %vm3827_vm10, %v5018_v28, %v4959_v45 }
 0x727   : > { %v4957_v40 = vpop.permute.xlu1 %4956  ;;  %v4967_v35 = vpop.permute.xlu0 %4966 }
 0x728   : > { %v5019_v2 = vsel %vm3827_vm10, %v5017_v20, %v4957_v40 }
 0x72b   : > { %v4965_v14 = vpop.permute.xlu1 %4964  ;;  %v4971_v34 = vpop.permute.xlu0 %4970 }
 0x72c   : > { %v4972_v32 = vsel %vm1472_vm9, %v4965_v14, %v4967_v35 }
 0x72d   : > { %v5021_v15 = vsel %vm5004_vm14, %v5019_v2, %v4972_v32 }
 0x72f   : > { %v4969_v50 = vpop.permute.xlu1 %4968  ;;  %v4915_v62 = vpop.permute.xlu0 %4914 }
 0x730   : > { %v5006_v17 = vsel %vm5004_vm14, %v5003_v43, %v4915_v62  ;;  %v4973_v9 = vsel %vm1472_vm9, %v4969_v50, %v4971_v34 }
 0x731   : > { %v5022_v21 = vsel %vm5004_vm14, %v5020_v54, %v4973_v9 }
 0x733   : > { %v4913_v11 = vpop.permute.xlu1 %4912  ;;  %v4921_v8 = vpop.permute.xlu0 %4920 }
 0x734   : > { %v5009_v53 = vsel %vm5007_vm13, %v5006_v17, %v4921_v8  ;;  %v5005_v52 = vsel %vm5004_vm14, %v5002_v18, %v4913_v11 }
 0x737   : > { %v4919_v4 = vpop.permute.xlu1 %4918  ;;  %v4979_v61 = vpop.permute.xlu0 %4978 }
 0x738   : > { %v5008_v5 = vsel %vm5007_vm13, %v5005_v52, %v4919_v4  ;;  %v5024_v39 = vsel %vm5007_vm13, %v5022_v21, %v4979_v61 }
 0x73b   : > { %v4977_v41 = vpop.permute.xlu1 %4976  ;;  %v4927_v51 = vpop.permute.xlu0 %4926 }
 0x73c   : > { %v5011_v47 = vsel %vm1265_vm3, %v5009_v53, %v4927_v51  ;;  %v5023_v56 = vsel %vm5007_vm13, %v5021_v15, %v4977_v41 }
 0x73f   : > { %v4925_v37 = vpop.permute.xlu1 %4924  ;;  %v4985_v55 = vpop.permute.xlu0 %4984 }
 0x740   : > { %v5010_v60 = vsel %vm1265_vm3, %v5008_v5, %v4925_v37  ;;  %v5026_v10 = vsel %vm1265_vm3, %v5024_v39, %v4985_v55 }
 0x743   : > { %v4983_v13 = vpop.permute.xlu1 %4982  ;;  %v4935_v38 = vpop.permute.xlu0 %4934 }
 0x744   : > { %v5013_v27 = vsel %vm189_vm0, %v5011_v47, %v4935_v38  ;;  %v5025_v24 = vsel %vm1265_vm3, %v5023_v56, %v4983_v13 }
 0x747   : > { %v4933_v58 = vpop.permute.xlu1 %4932  ;;  %v4991_v59 = vpop.permute.xlu0 %4990 }
 0x748   : > { %v5012_v25 = vsel %vm189_vm0, %v5010_v60, %v4933_v58  ;;  %v5028_v1 = vsel %vm189_vm0, %v5026_v10, %v4991_v59 }
 0x74b   : > { %v4989_v6 = vpop.permute.xlu1 %4988  ;;  %v4941_v63 = vpop.permute.xlu0 %4940 }
 0x74c   : > { %v5016_v7 = vsel %vm5014_vm15, %v5013_v27, %v4941_v63  ;;  %v5027_v46 = vsel %vm189_vm0, %v5025_v24, %v4989_v6 }
 0x74d   : > { %v5045_v23 = vadd.f32 %v5041_v0, %v5016_v7 }
 0x74f   : > { %v5049_v33 = vmax.f32 %v5045_v23, 0.0  ;;  %v4939_v16 = vpop.permute.xlu1 %4938  ;;  %v4997_v31 = vpop.permute.xlu0 %4996 }
 0x750   : > { %v5015_v48 = vsel %vm5014_vm15, %v5012_v25, %v4939_v16  ;;  %v5030_v29 = vsel %vm5014_vm15, %v5028_v1, %v4997_v31 }
 0x751   : > { %5053 = vst [vmem:[%s170_s15 + $0x10] sm:$0xf] %v5049_v33  ;;  %v5043_v49 = vadd.f32 %v8819_v12, %v5015_v48  ;;  %v5046_v26 = vadd.f32 %v5041_v0, %v5030_v29 }
 0x753   : > { %v5047_v22 = vmax.f32 %v5043_v49, 0.0  ;;  %v5050_v30 = vmax.f32 %v5046_v26, 0.0  ;;  %v4995_v19 = vpop.permute.xlu1 %4994 }
 0x754   : > { %v5029_v3 = vsel %vm5014_vm15, %v5027_v46, %v4995_v19 }
 0x755   : > { %5051 = vst [vmem:[%s170_s15] sm:$0xff] %v5047_v22  ;;  %5054 = vst [vmem:[%s170_s15 + $0x18] sm:$0xf] %v5050_v30  ;;  %v5044_v57 = vadd.f32 %v8819_v12, %v5029_v3 }
 0x757   : > { %v5048_v42 = vmax.f32 %v5044_v57, 0.0 }
 0x759   : > { %5052 = vst [vmem:[%s170_s15 + $0x8] sm:$0xff] %v5048_v42 }
 0x75a PF: > { %s13_s12 = sadd.s32 1, %s6119_s12  }
 0x75b   : > { %p10_p4 = scmp.ge.s32.totalorder %s13_s12, 4  }
 0x75d   :  { %12 = sbr.rel (!%p10_p4) target bundleno = 1 (0x1), region = 62 }

</bundles_post_ra>
